<compile_context>
chip_gen: v7x
topology: tpu7x:2x2x1
jax: 0.10.0
libtpu: 0.0.40
codegen_flags: <defaults>
</compile_context>

<pallas_src>
import functools

import numpy as np

import jax
import jax.numpy as jnp
from jax.experimental import pallas as pl
from jax.experimental.pallas import tpu as pltpu


N_QUBITS = 4
N_STATES = 1 << N_QUBITS          # 16 basis states
N_PATCH = 14 * 14                 # 196 real 2x2 patches per image
P_PAD = 256                       # patch (lane) axis padded to multiple of 128
OUT_PAD = 128                     # fc4 outputs padded 10 -> 128 (full-lane store)
TB = 8                            # images per grid step (sublane multiple)


def _entangler() -> np.ndarray:
    """Deterministic 16x16 orthogonal 'entangler' (placeholder circuit)."""
    rng = np.random.default_rng(0)
    q, _ = np.linalg.qr(rng.standard_normal((N_STATES, N_STATES)))
    return np.asarray(q, dtype=np.float32)


_UQ = _entangler()                # phi[t] = sum_s UQ[s, t] * psi[s]


# --------------------------------------------------------------------------
# Fused kernel: quanvolution + fc1..fc4 (+ReLU) for one batch tile
# --------------------------------------------------------------------------
def fused_net_kernel(ang_ref, w1_ref, b1_ref, w2_ref, b2_ref,
                     w3_ref, b3_ref, w4_ref, b4_ref, out_ref):
    # ---- quanvolution on lane-dense (TB, P_PAD) slabs ---------------------
    cos_k, sin_k = [], []
    for k in range(N_QUBITS):                       # RY(theta) encoding
        half = ang_ref[k] * 0.5                     # (TB, P_PAD)
        cos_k.append(jnp.cos(half))
        sin_k.append(jnp.sin(half))

    # amplitude of each basis state s: product of cos/sin picked by the bits
    # of s (selection resolved at trace time -> no iota / jnp.where).
    psi = []
    for s in range(N_STATES):
        amp = None
        for k in range(N_QUBITS):
            f = sin_k[k] if (s >> (N_QUBITS - 1 - k)) & 1 else cos_k[k]
            amp = f if amp is None else amp * f
        psi.append(amp)                             # (TB, P_PAD)

    # fixed orthogonal entangler, Born-rule probabilities, per-qubit <Z>.
    # The 16x16 contraction is unrolled into constant-coefficient VPU FMAs.
    zexp = [None] * N_QUBITS
    for t in range(N_STATES):
        phi_t = None
        for s in range(N_STATES):
            term = psi[s] * float(_UQ[s, t])
            phi_t = term if phi_t is None else phi_t + term
        prob_t = phi_t * phi_t                      # (TB, P_PAD)
        for ch in range(N_QUBITS):                  # <Z_ch> = sum_t (+/-) p_t
            if (t >> (N_QUBITS - 1 - ch)) & 1:
                zexp[ch] = -prob_t if zexp[ch] is None else zexp[ch] - prob_t
            else:
                zexp[ch] = prob_t if zexp[ch] is None else zexp[ch] + prob_t

    # ---- fc1: contract (channel, patch) against reshaped / padded w1 ------
    acc = None
    for ch in range(N_QUBITS):
        d = jnp.dot(zexp[ch], w1_ref[ch],           # (TB,256) @ (256,64)
                    preferred_element_type=jnp.float32)
        acc = d if acc is None else acc + d
    h = jnp.maximum(acc + b1_ref[...], 0.0)

    # ---- fc2 .. fc4 (final ReLU matches the reference Net) ----------------
    h = jnp.maximum(
        jnp.dot(h, w2_ref[...], preferred_element_type=jnp.float32) + b2_ref[...], 0.0)
    h = jnp.maximum(
        jnp.dot(h, w3_ref[...], preferred_element_type=jnp.float32) + b3_ref[...], 0.0)
    h = jnp.maximum(
        jnp.dot(h, w4_ref[...], preferred_element_type=jnp.float32) + b4_ref[...], 0.0)
    out_ref[...] = h                                # (TB, OUT_PAD) full-lane store


# --------------------------------------------------------------------------
# Parameters (deterministic, in-script)
# --------------------------------------------------------------------------
def init_params(key):
    keys = jax.random.split(key, 4)

    def linear(k, fan_in, fan_out):
        kw, kb = jax.random.split(k)
        bound = 1.0 / (fan_in ** 0.5)               # PyTorch Linear init
        w = jax.random.uniform(kw, (fan_in, fan_out), jnp.float32, -bound, bound)
        bvec = jax.random.uniform(kb, (1, fan_out), jnp.float32, -bound, bound)
        return w, bvec

    w1, b1 = linear(keys[0], N_PATCH * N_QUBITS, 64)    # (784, 64)
    w2, b2 = linear(keys[1], 64, 32)
    w3, b3 = linear(keys[2], 32, 16)
    w4, b4 = linear(keys[3], 16, 10)

    # Fold torch.flatten(NCHW) ordering (feature = ch*196 + r*14 + c) into w1
    # once at init: reshape to (4, 196, 64), zero-pad the patch axis to 256 so
    # the kernel's per-channel (TB, 256) activations contract against it
    # directly (padded patch columns hit zero weight rows).
    w1 = jnp.pad(w1.reshape(N_QUBITS, N_PATCH, 64),
                 ((0, 0), (0, P_PAD - N_PATCH), (0, 0)))

    # Zero-pad fc4 to 128 output columns -> unmasked final store; wrapper
    # slices logits[:, :10].
    w4 = jnp.pad(w4, ((0, 0), (0, OUT_PAD - 10)))
    b4 = jnp.pad(b4, ((0, 0), (0, OUT_PAD - 10)))

    return dict(w1=w1, b1=b1, w2=w2, b2=b2, w3=w3, b3=b3, w4=w4, b4=b4)


# --------------------------------------------------------------------------
# Forward pass (patch extraction in plain JAX, everything else fused in Pallas)
# --------------------------------------------------------------------------
def net_forward(x, params):
    b = x.shape[0]
    # 2x2 / stride-2 patch extraction on the raw input:
    # (B,1,28,28) -> angles (4, B, 196): pixel-in-patch k = 2*dr + dc leading,
    # image on sublanes, patch p = r*14 + c on lanes.
    xr = x.reshape(b, 14, 2, 14, 2)                     # (b, r, dr, c, dc)
    ang = xr.transpose(2, 4, 0, 1, 3).reshape(N_QUBITS, b, N_PATCH)

    bpad = pl.cdiv(b, TB) * TB                          # batch-size agnostic
    ang = jnp.pad(ang, ((0, 0), (0, bpad - b), (0, P_PAD - N_PATCH)))

    out = pl.pallas_call(
        fused_net_kernel,
        out_shape=jax.ShapeDtypeStruct((bpad, OUT_PAD), jnp.float32),
        grid=(bpad // TB,),
        in_specs=[
            pl.BlockSpec((N_QUBITS, TB, P_PAD), lambda i: (0, i, 0)),   # angles
            pl.BlockSpec((N_QUBITS, P_PAD, 64), lambda i: (0, 0, 0)),   # w1 (resident)
            pl.BlockSpec((1, 64), lambda i: (0, 0)),                    # b1
            pl.BlockSpec((64, 32), lambda i: (0, 0)),                   # w2
            pl.BlockSpec((1, 32), lambda i: (0, 0)),                    # b2
            pl.BlockSpec((32, 16), lambda i: (0, 0)),                   # w3
            pl.BlockSpec((1, 16), lambda i: (0, 0)),                    # b3
            pl.BlockSpec((16, OUT_PAD), lambda i: (0, 0)),              # w4 (padded)
            pl.BlockSpec((1, OUT_PAD), lambda i: (0, 0)),               # b4 (padded)
        ],
        out_specs=pl.BlockSpec((TB, OUT_PAD), lambda i: (i, 0)),
        compiler_params=pltpu.CompilerParams(
            dimension_semantics=("parallel",)),
    )(ang, params["w1"], params["b1"], params["w2"], params["b2"],
      params["w3"], params["b3"], params["w4"], params["b4"])

    return out[:b, :10]


if __name__ == "__main__":
    params = init_params(jax.random.PRNGKey(0))
    x = jax.random.uniform(jax.random.PRNGKey(0), (2, 1, 28, 28),
                           dtype=jnp.float32)

    fwd = jax.jit(functools.partial(net_forward, params=params))
    out = jax.block_until_ready(fwd(x))

    assert out.shape == (2, 10), out.shape
    assert out.dtype == jnp.float32
    assert bool(jnp.all(jnp.isfinite(out)))
    print("KERNEL_OK")
</pallas_src>

<mosaic_0001>
module attributes {stable_mosaic.version = 11 : i64} {
  func.func @fused_net_kernel(%arg0: i32, %arg1: memref<4x8x256xf32, #tpu.memory_space<vmem>>, %arg2: memref<4x256x64xf32, #tpu.memory_space<vmem>>, %arg3: memref<1x64xf32, #tpu.memory_space<vmem>>, %arg4: memref<64x32xf32, #tpu.memory_space<vmem>>, %arg5: memref<1x32xf32, #tpu.memory_space<vmem>>, %arg6: memref<32x16xf32, #tpu.memory_space<vmem>>, %arg7: memref<1x16xf32, #tpu.memory_space<vmem>>, %arg8: memref<16x128xf32, #tpu.memory_space<vmem>>, %arg9: memref<1x128xf32, #tpu.memory_space<vmem>>, %arg10: memref<8x128xf32, #tpu.memory_space<vmem>>) attributes {dimension_semantics = [#tpu.dimension_semantics<parallel>], iteration_bounds = array<i64: 1>, scalar_prefetch = 0 : i64, scratch_operands = 0 : i64, tpu.core_type = #tpu.core_type<tc>, window_params = [{transform_indices = @transform_0, window_bounds = array<i64: 4, 8, 256>}, {pipeline_mode = #tpu.pipeline_mode<synchronous>, transform_indices = @transform_1, window_bounds = array<i64: 4, 256, 64>}, {pipeline_mode = #tpu.pipeline_mode<synchronous>, transform_indices = @transform_2, window_bounds = array<i64: 1, 64>}, {pipeline_mode = #tpu.pipeline_mode<synchronous>, transform_indices = @transform_3, window_bounds = array<i64: 64, 32>}, {pipeline_mode = #tpu.pipeline_mode<synchronous>, transform_indices = @transform_4, window_bounds = array<i64: 1, 32>}, {pipeline_mode = #tpu.pipeline_mode<synchronous>, transform_indices = @transform_5, window_bounds = array<i64: 32, 16>}, {pipeline_mode = #tpu.pipeline_mode<synchronous>, transform_indices = @transform_6, window_bounds = array<i64: 1, 16>}, {pipeline_mode = #tpu.pipeline_mode<synchronous>, transform_indices = @transform_7, window_bounds = array<i64: 16, 128>}, {pipeline_mode = #tpu.pipeline_mode<synchronous>, transform_indices = @transform_8, window_bounds = array<i64: 1, 128>}, {transform_indices = @transform_9, window_bounds = array<i64: 8, 128>}]} {
    %c0 = arith.constant 0 : index
    %c0_0 = arith.constant 0 : index
    %c0_1 = arith.constant 0 : index
    %0 = vector.load %arg1[%c0, %c0_0, %c0_1] : memref<4x8x256xf32, #tpu.memory_space<vmem>>, vector<1x8x256xf32>
    %1 = vector.shape_cast %0 : vector<1x8x256xf32> to vector<8x256xf32>
    %cst = arith.constant 5.000000e-01 : f32
    %2 = vector.broadcast %cst : f32 to vector<8x256xf32>
    %3 = arith.mulf %1, %2 : vector<8x256xf32>
    %4 = math.cos %3 : vector<8x256xf32>
    %5 = math.sin %3 : vector<8x256xf32>
    %c1 = arith.constant 1 : index
    %c0_2 = arith.constant 0 : index
    %c0_3 = arith.constant 0 : index
    %6 = vector.load %arg1[%c1, %c0_2, %c0_3] : memref<4x8x256xf32, #tpu.memory_space<vmem>>, vector<1x8x256xf32>
    %7 = vector.shape_cast %6 : vector<1x8x256xf32> to vector<8x256xf32>
    %cst_4 = arith.constant 5.000000e-01 : f32
    %8 = vector.broadcast %cst_4 : f32 to vector<8x256xf32>
    %9 = arith.mulf %7, %8 : vector<8x256xf32>
    %10 = math.cos %9 : vector<8x256xf32>
    %11 = math.sin %9 : vector<8x256xf32>
    %c2 = arith.constant 2 : index
    %c0_5 = arith.constant 0 : index
    %c0_6 = arith.constant 0 : index
    %12 = vector.load %arg1[%c2, %c0_5, %c0_6] : memref<4x8x256xf32, #tpu.memory_space<vmem>>, vector<1x8x256xf32>
    %13 = vector.shape_cast %12 : vector<1x8x256xf32> to vector<8x256xf32>
    %cst_7 = arith.constant 5.000000e-01 : f32
    %14 = vector.broadcast %cst_7 : f32 to vector<8x256xf32>
    %15 = arith.mulf %13, %14 : vector<8x256xf32>
    %16 = math.cos %15 : vector<8x256xf32>
    %17 = math.sin %15 : vector<8x256xf32>
    %c3 = arith.constant 3 : index
    %c0_8 = arith.constant 0 : index
    %c0_9 = arith.constant 0 : index
    %18 = vector.load %arg1[%c3, %c0_8, %c0_9] : memref<4x8x256xf32, #tpu.memory_space<vmem>>, vector<1x8x256xf32>
    %19 = vector.shape_cast %18 : vector<1x8x256xf32> to vector<8x256xf32>
    %cst_10 = arith.constant 5.000000e-01 : f32
    %20 = vector.broadcast %cst_10 : f32 to vector<8x256xf32>
    %21 = arith.mulf %19, %20 : vector<8x256xf32>
    %22 = math.cos %21 : vector<8x256xf32>
    %23 = math.sin %21 : vector<8x256xf32>
    %24 = arith.mulf %4, %10 : vector<8x256xf32>
    %25 = arith.mulf %24, %16 : vector<8x256xf32>
    %26 = arith.mulf %25, %22 : vector<8x256xf32>
    %27 = arith.mulf %4, %10 : vector<8x256xf32>
    %28 = arith.mulf %27, %16 : vector<8x256xf32>
    %29 = arith.mulf %28, %23 : vector<8x256xf32>
    %30 = arith.mulf %4, %10 : vector<8x256xf32>
    %31 = arith.mulf %30, %17 : vector<8x256xf32>
    %32 = arith.mulf %31, %22 : vector<8x256xf32>
    %33 = arith.mulf %4, %10 : vector<8x256xf32>
    %34 = arith.mulf %33, %17 : vector<8x256xf32>
    %35 = arith.mulf %34, %23 : vector<8x256xf32>
    %36 = arith.mulf %4, %11 : vector<8x256xf32>
    %37 = arith.mulf %36, %16 : vector<8x256xf32>
    %38 = arith.mulf %37, %22 : vector<8x256xf32>
    %39 = arith.mulf %4, %11 : vector<8x256xf32>
    %40 = arith.mulf %39, %16 : vector<8x256xf32>
    %41 = arith.mulf %40, %23 : vector<8x256xf32>
    %42 = arith.mulf %4, %11 : vector<8x256xf32>
    %43 = arith.mulf %42, %17 : vector<8x256xf32>
    %44 = arith.mulf %43, %22 : vector<8x256xf32>
    %45 = arith.mulf %4, %11 : vector<8x256xf32>
    %46 = arith.mulf %45, %17 : vector<8x256xf32>
    %47 = arith.mulf %46, %23 : vector<8x256xf32>
    %48 = arith.mulf %5, %10 : vector<8x256xf32>
    %49 = arith.mulf %48, %16 : vector<8x256xf32>
    %50 = arith.mulf %49, %22 : vector<8x256xf32>
    %51 = arith.mulf %5, %10 : vector<8x256xf32>
    %52 = arith.mulf %51, %16 : vector<8x256xf32>
    %53 = arith.mulf %52, %23 : vector<8x256xf32>
    %54 = arith.mulf %5, %10 : vector<8x256xf32>
    %55 = arith.mulf %54, %17 : vector<8x256xf32>
    %56 = arith.mulf %55, %22 : vector<8x256xf32>
    %57 = arith.mulf %5, %10 : vector<8x256xf32>
    %58 = arith.mulf %57, %17 : vector<8x256xf32>
    %59 = arith.mulf %58, %23 : vector<8x256xf32>
    %60 = arith.mulf %5, %11 : vector<8x256xf32>
    %61 = arith.mulf %60, %16 : vector<8x256xf32>
    %62 = arith.mulf %61, %22 : vector<8x256xf32>
    %63 = arith.mulf %5, %11 : vector<8x256xf32>
    %64 = arith.mulf %63, %16 : vector<8x256xf32>
    %65 = arith.mulf %64, %23 : vector<8x256xf32>
    %66 = arith.mulf %5, %11 : vector<8x256xf32>
    %67 = arith.mulf %66, %17 : vector<8x256xf32>
    %68 = arith.mulf %67, %22 : vector<8x256xf32>
    %69 = arith.mulf %5, %11 : vector<8x256xf32>
    %70 = arith.mulf %69, %17 : vector<8x256xf32>
    %71 = arith.mulf %70, %23 : vector<8x256xf32>
    %cst_11 = arith.constant -0.0398484878 : f32
    %72 = vector.broadcast %cst_11 : f32 to vector<8x256xf32>
    %73 = arith.mulf %26, %72 : vector<8x256xf32>
    %cst_12 = arith.constant 0.172495499 : f32
    %74 = vector.broadcast %cst_12 : f32 to vector<8x256xf32>
    %75 = arith.mulf %29, %74 : vector<8x256xf32>
    %76 = arith.addf %73, %75 : vector<8x256xf32>
    %cst_13 = arith.constant 0.0504642054 : f32
    %77 = vector.broadcast %cst_13 : f32 to vector<8x256xf32>
    %78 = arith.mulf %32, %77 : vector<8x256xf32>
    %79 = arith.addf %76, %78 : vector<8x256xf32>
    %cst_14 = arith.constant -0.571003735 : f32
    %80 = vector.broadcast %cst_14 : f32 to vector<8x256xf32>
    %81 = arith.mulf %35, %80 : vector<8x256xf32>
    %82 = arith.addf %79, %81 : vector<8x256xf32>
    %cst_15 = arith.constant -0.104262456 : f32
    %83 = vector.broadcast %cst_15 : f32 to vector<8x256xf32>
    %84 = arith.mulf %38, %83 : vector<8x256xf32>
    %85 = arith.addf %82, %84 : vector<8x256xf32>
    %cst_16 = arith.constant -0.0597485974 : f32
    %86 = vector.broadcast %cst_16 : f32 to vector<8x256xf32>
    %87 = arith.mulf %41, %86 : vector<8x256xf32>
    %88 = arith.addf %85, %87 : vector<8x256xf32>
    %cst_17 = arith.constant -0.0510297976 : f32
    %89 = vector.broadcast %cst_17 : f32 to vector<8x256xf32>
    %90 = arith.mulf %44, %89 : vector<8x256xf32>
    %91 = arith.addf %88, %90 : vector<8x256xf32>
    %cst_18 = arith.constant 0.0239925701 : f32
    %92 = vector.broadcast %cst_18 : f32 to vector<8x256xf32>
    %93 = arith.mulf %47, %92 : vector<8x256xf32>
    %94 = arith.addf %91, %93 : vector<8x256xf32>
    %cst_19 = arith.constant 0.180194035 : f32
    %95 = vector.broadcast %cst_19 : f32 to vector<8x256xf32>
    %96 = arith.mulf %50, %95 : vector<8x256xf32>
    %97 = arith.addf %94, %96 : vector<8x256xf32>
    %cst_20 = arith.constant -1.012340e-01 : f32
    %98 = vector.broadcast %cst_20 : f32 to vector<8x256xf32>
    %99 = arith.mulf %53, %98 : vector<8x256xf32>
    %100 = arith.addf %97, %99 : vector<8x256xf32>
    %cst_21 = arith.constant -0.162604913 : f32
    %101 = vector.broadcast %cst_21 : f32 to vector<8x256xf32>
    %102 = arith.mulf %56, %101 : vector<8x256xf32>
    %103 = arith.addf %100, %102 : vector<8x256xf32>
    %cst_22 = arith.constant 0.467128783 : f32
    %104 = vector.broadcast %cst_22 : f32 to vector<8x256xf32>
    %105 = arith.mulf %59, %104 : vector<8x256xf32>
    %106 = arith.addf %103, %105 : vector<8x256xf32>
    %cst_23 = arith.constant -0.344456255 : f32
    %107 = vector.broadcast %cst_23 : f32 to vector<8x256xf32>
    %108 = arith.mulf %62, %107 : vector<8x256xf32>
    %109 = arith.addf %106, %108 : vector<8x256xf32>
    %cst_24 = arith.constant 0.149534777 : f32
    %110 = vector.broadcast %cst_24 : f32 to vector<8x256xf32>
    %111 = arith.mulf %65, %110 : vector<8x256xf32>
    %112 = arith.addf %109, %111 : vector<8x256xf32>
    %cst_25 = arith.constant 0.158470884 : f32
    %113 = vector.broadcast %cst_25 : f32 to vector<8x256xf32>
    %114 = arith.mulf %68, %113 : vector<8x256xf32>
    %115 = arith.addf %112, %114 : vector<8x256xf32>
    %cst_26 = arith.constant -0.41103974 : f32
    %116 = vector.broadcast %cst_26 : f32 to vector<8x256xf32>
    %117 = arith.mulf %71, %116 : vector<8x256xf32>
    %118 = arith.addf %115, %117 : vector<8x256xf32>
    %119 = arith.mulf %118, %118 : vector<8x256xf32>
    %cst_27 = arith.constant -0.0399584882 : f32
    %120 = vector.broadcast %cst_27 : f32 to vector<8x256xf32>
    %121 = arith.mulf %26, %120 : vector<8x256xf32>
    %cst_28 = arith.constant -0.121184073 : f32
    %122 = vector.broadcast %cst_28 : f32 to vector<8x256xf32>
    %123 = arith.mulf %29, %122 : vector<8x256xf32>
    %124 = arith.addf %121, %123 : vector<8x256xf32>
    %cst_29 = arith.constant 0.174322203 : f32
    %125 = vector.broadcast %cst_29 : f32 to vector<8x256xf32>
    %126 = arith.mulf %32, %125 : vector<8x256xf32>
    %127 = arith.addf %124, %126 : vector<8x256xf32>
    %cst_30 = arith.constant 0.489934593 : f32
    %128 = vector.broadcast %cst_30 : f32 to vector<8x256xf32>
    %129 = arith.mulf %35, %128 : vector<8x256xf32>
    %130 = arith.addf %127, %129 : vector<8x256xf32>
    %cst_31 = arith.constant -0.0757107213 : f32
    %131 = vector.broadcast %cst_31 : f32 to vector<8x256xf32>
    %132 = arith.mulf %38, %131 : vector<8x256xf32>
    %133 = arith.addf %130, %132 : vector<8x256xf32>
    %cst_32 = arith.constant -0.204023853 : f32
    %134 = vector.broadcast %cst_32 : f32 to vector<8x256xf32>
    %135 = arith.mulf %41, %134 : vector<8x256xf32>
    %136 = arith.addf %133, %135 : vector<8x256xf32>
    %cst_33 = arith.constant -0.189067394 : f32
    %137 = vector.broadcast %cst_33 : f32 to vector<8x256xf32>
    %138 = arith.mulf %44, %137 : vector<8x256xf32>
    %139 = arith.addf %136, %138 : vector<8x256xf32>
    %cst_34 = arith.constant 0.0646554529 : f32
    %140 = vector.broadcast %cst_34 : f32 to vector<8x256xf32>
    %141 = arith.mulf %47, %140 : vector<8x256xf32>
    %142 = arith.addf %139, %141 : vector<8x256xf32>
    %cst_35 = arith.constant -0.35822919 : f32
    %143 = vector.broadcast %cst_35 : f32 to vector<8x256xf32>
    %144 = arith.mulf %50, %143 : vector<8x256xf32>
    %145 = arith.addf %142, %144 : vector<8x256xf32>
    %cst_36 = arith.constant -0.109231882 : f32
    %146 = vector.broadcast %cst_36 : f32 to vector<8x256xf32>
    %147 = arith.mulf %53, %146 : vector<8x256xf32>
    %148 = arith.addf %145, %147 : vector<8x256xf32>
    %cst_37 = arith.constant -0.0830756873 : f32
    %149 = vector.broadcast %cst_37 : f32 to vector<8x256xf32>
    %150 = arith.mulf %56, %149 : vector<8x256xf32>
    %151 = arith.addf %148, %150 : vector<8x256xf32>
    %cst_38 = arith.constant 0.296273798 : f32
    %152 = vector.broadcast %cst_38 : f32 to vector<8x256xf32>
    %153 = arith.mulf %59, %152 : vector<8x256xf32>
    %154 = arith.addf %151, %153 : vector<8x256xf32>
    %cst_39 = arith.constant 0.016040504 : f32
    %155 = vector.broadcast %cst_39 : f32 to vector<8x256xf32>
    %156 = arith.mulf %62, %155 : vector<8x256xf32>
    %157 = arith.addf %154, %156 : vector<8x256xf32>
    %cst_40 = arith.constant 0.442136914 : f32
    %158 = vector.broadcast %cst_40 : f32 to vector<8x256xf32>
    %159 = arith.mulf %65, %158 : vector<8x256xf32>
    %160 = arith.addf %157, %159 : vector<8x256xf32>
    %cst_41 = arith.constant 0.435488433 : f32
    %161 = vector.broadcast %cst_41 : f32 to vector<8x256xf32>
    %162 = arith.mulf %68, %161 : vector<8x256xf32>
    %163 = arith.addf %160, %162 : vector<8x256xf32>
    %cst_42 = arith.constant -0.0753455833 : f32
    %164 = vector.broadcast %cst_42 : f32 to vector<8x256xf32>
    %165 = arith.mulf %71, %164 : vector<8x256xf32>
    %166 = arith.addf %163, %165 : vector<8x256xf32>
    %167 = arith.mulf %166, %166 : vector<8x256xf32>
    %168 = arith.addf %119, %167 : vector<8x256xf32>
    %169 = arith.addf %119, %167 : vector<8x256xf32>
    %170 = arith.addf %119, %167 : vector<8x256xf32>
    %171 = arith.subf %119, %167 : vector<8x256xf32>
    %cst_43 = arith.constant -0.167107284 : f32
    %172 = vector.broadcast %cst_43 : f32 to vector<8x256xf32>
    %173 = arith.mulf %26, %172 : vector<8x256xf32>
    %cst_44 = arith.constant -0.186718926 : f32
    %174 = vector.broadcast %cst_44 : f32 to vector<8x256xf32>
    %175 = arith.mulf %29, %174 : vector<8x256xf32>
    %176 = arith.addf %173, %175 : vector<8x256xf32>
    %cst_45 = arith.constant -0.031144673 : f32
    %177 = vector.broadcast %cst_45 : f32 to vector<8x256xf32>
    %178 = arith.mulf %32, %177 : vector<8x256xf32>
    %179 = arith.addf %176, %178 : vector<8x256xf32>
    %cst_46 = arith.constant 0.183600023 : f32
    %180 = vector.broadcast %cst_46 : f32 to vector<8x256xf32>
    %181 = arith.mulf %35, %180 : vector<8x256xf32>
    %182 = arith.addf %179, %181 : vector<8x256xf32>
    %cst_47 = arith.constant -0.406194031 : f32
    %183 = vector.broadcast %cst_47 : f32 to vector<8x256xf32>
    %184 = arith.mulf %38, %183 : vector<8x256xf32>
    %185 = arith.addf %182, %184 : vector<8x256xf32>
    %cst_48 = arith.constant 0.0700667798 : f32
    %186 = vector.broadcast %cst_48 : f32 to vector<8x256xf32>
    %187 = arith.mulf %41, %186 : vector<8x256xf32>
    %188 = arith.addf %185, %187 : vector<8x256xf32>
    %cst_49 = arith.constant 0.325906903 : f32
    %189 = vector.broadcast %cst_49 : f32 to vector<8x256xf32>
    %190 = arith.mulf %44, %189 : vector<8x256xf32>
    %191 = arith.addf %188, %190 : vector<8x256xf32>
    %cst_50 = arith.constant -0.175640821 : f32
    %192 = vector.broadcast %cst_50 : f32 to vector<8x256xf32>
    %193 = arith.mulf %47, %192 : vector<8x256xf32>
    %194 = arith.addf %191, %193 : vector<8x256xf32>
    %cst_51 = arith.constant 0.14113827 : f32
    %195 = vector.broadcast %cst_51 : f32 to vector<8x256xf32>
    %196 = arith.mulf %50, %195 : vector<8x256xf32>
    %197 = arith.addf %194, %196 : vector<8x256xf32>
    %cst_52 = arith.constant 0.507086813 : f32
    %198 = vector.broadcast %cst_52 : f32 to vector<8x256xf32>
    %199 = arith.mulf %53, %198 : vector<8x256xf32>
    %200 = arith.addf %197, %199 : vector<8x256xf32>
    %cst_53 = arith.constant 0.168037966 : f32
    %201 = vector.broadcast %cst_53 : f32 to vector<8x256xf32>
    %202 = arith.mulf %56, %201 : vector<8x256xf32>
    %203 = arith.addf %200, %202 : vector<8x256xf32>
    %cst_54 = arith.constant 0.445163101 : f32
    %204 = vector.broadcast %cst_54 : f32 to vector<8x256xf32>
    %205 = arith.mulf %59, %204 : vector<8x256xf32>
    %206 = arith.addf %203, %205 : vector<8x256xf32>
    %cst_55 = arith.constant 0.178177088 : f32
    %207 = vector.broadcast %cst_55 : f32 to vector<8x256xf32>
    %208 = arith.mulf %62, %207 : vector<8x256xf32>
    %209 = arith.addf %206, %208 : vector<8x256xf32>
    %cst_56 = arith.constant 0.022893697 : f32
    %210 = vector.broadcast %cst_56 : f32 to vector<8x256xf32>
    %211 = arith.mulf %65, %210 : vector<8x256xf32>
    %212 = arith.addf %209, %211 : vector<8x256xf32>
    %cst_57 = arith.constant -0.210477576 : f32
    %213 = vector.broadcast %cst_57 : f32 to vector<8x256xf32>
    %214 = arith.mulf %68, %213 : vector<8x256xf32>
    %215 = arith.addf %212, %214 : vector<8x256xf32>
    %cst_58 = arith.constant -0.124612443 : f32
    %216 = vector.broadcast %cst_58 : f32 to vector<8x256xf32>
    %217 = arith.mulf %71, %216 : vector<8x256xf32>
    %218 = arith.addf %215, %217 : vector<8x256xf32>
    %219 = arith.mulf %218, %218 : vector<8x256xf32>
    %220 = arith.addf %168, %219 : vector<8x256xf32>
    %221 = arith.addf %169, %219 : vector<8x256xf32>
    %222 = arith.subf %170, %219 : vector<8x256xf32>
    %223 = arith.addf %171, %219 : vector<8x256xf32>
    %cst_59 = arith.constant -0.00670045521 : f32
    %224 = vector.broadcast %cst_59 : f32 to vector<8x256xf32>
    %225 = arith.mulf %26, %224 : vector<8x256xf32>
    %cst_60 = arith.constant 0.201064974 : f32
    %226 = vector.broadcast %cst_60 : f32 to vector<8x256xf32>
    %227 = arith.mulf %29, %226 : vector<8x256xf32>
    %228 = arith.addf %225, %227 : vector<8x256xf32>
    %cst_61 = arith.constant 0.0479776561 : f32
    %229 = vector.broadcast %cst_61 : f32 to vector<8x256xf32>
    %230 = arith.mulf %32, %229 : vector<8x256xf32>
    %231 = arith.addf %228, %230 : vector<8x256xf32>
    %cst_62 = arith.constant -0.215431795 : f32
    %232 = vector.broadcast %cst_62 : f32 to vector<8x256xf32>
    %233 = arith.mulf %35, %232 : vector<8x256xf32>
    %234 = arith.addf %231, %233 : vector<8x256xf32>
    %cst_63 = arith.constant 0.26223591 : f32
    %235 = vector.broadcast %cst_63 : f32 to vector<8x256xf32>
    %236 = arith.mulf %38, %235 : vector<8x256xf32>
    %237 = arith.addf %234, %236 : vector<8x256xf32>
    %cst_64 = arith.constant -0.22375755 : f32
    %238 = vector.broadcast %cst_64 : f32 to vector<8x256xf32>
    %239 = arith.mulf %41, %238 : vector<8x256xf32>
    %240 = arith.addf %237, %239 : vector<8x256xf32>
    %cst_65 = arith.constant -0.234978229 : f32
    %241 = vector.broadcast %cst_65 : f32 to vector<8x256xf32>
    %242 = arith.mulf %44, %241 : vector<8x256xf32>
    %243 = arith.addf %240, %242 : vector<8x256xf32>
    %cst_66 = arith.constant -0.265112638 : f32
    %244 = vector.broadcast %cst_66 : f32 to vector<8x256xf32>
    %245 = arith.mulf %47, %244 : vector<8x256xf32>
    %246 = arith.addf %243, %245 : vector<8x256xf32>
    %cst_67 = arith.constant 0.126238555 : f32
    %247 = vector.broadcast %cst_67 : f32 to vector<8x256xf32>
    %248 = arith.mulf %50, %247 : vector<8x256xf32>
    %249 = arith.addf %246, %248 : vector<8x256xf32>
    %cst_68 = arith.constant 0.156466469 : f32
    %250 = vector.broadcast %cst_68 : f32 to vector<8x256xf32>
    %251 = arith.mulf %53, %250 : vector<8x256xf32>
    %252 = arith.addf %249, %251 : vector<8x256xf32>
    %cst_69 = arith.constant 0.0335220657 : f32
    %253 = vector.broadcast %cst_69 : f32 to vector<8x256xf32>
    %254 = arith.mulf %56, %253 : vector<8x256xf32>
    %255 = arith.addf %252, %254 : vector<8x256xf32>
    %cst_70 = arith.constant -0.076278381 : f32
    %256 = vector.broadcast %cst_70 : f32 to vector<8x256xf32>
    %257 = arith.mulf %59, %256 : vector<8x256xf32>
    %258 = arith.addf %255, %257 : vector<8x256xf32>
    %cst_71 = arith.constant 0.554554939 : f32
    %259 = vector.broadcast %cst_71 : f32 to vector<8x256xf32>
    %260 = arith.mulf %62, %259 : vector<8x256xf32>
    %261 = arith.addf %258, %260 : vector<8x256xf32>
    %cst_72 = arith.constant 0.517227113 : f32
    %262 = vector.broadcast %cst_72 : f32 to vector<8x256xf32>
    %263 = arith.mulf %65, %262 : vector<8x256xf32>
    %264 = arith.addf %261, %263 : vector<8x256xf32>
    %cst_73 = arith.constant -0.199085742 : f32
    %265 = vector.broadcast %cst_73 : f32 to vector<8x256xf32>
    %266 = arith.mulf %68, %265 : vector<8x256xf32>
    %267 = arith.addf %264, %266 : vector<8x256xf32>
    %cst_74 = arith.constant -0.0665615276 : f32
    %268 = vector.broadcast %cst_74 : f32 to vector<8x256xf32>
    %269 = arith.mulf %71, %268 : vector<8x256xf32>
    %270 = arith.addf %267, %269 : vector<8x256xf32>
    %271 = arith.mulf %270, %270 : vector<8x256xf32>
    %272 = arith.addf %220, %271 : vector<8x256xf32>
    %273 = arith.addf %221, %271 : vector<8x256xf32>
    %274 = arith.subf %222, %271 : vector<8x256xf32>
    %275 = arith.subf %223, %271 : vector<8x256xf32>
    %cst_75 = arith.constant 0.220333084 : f32
    %276 = vector.broadcast %cst_75 : f32 to vector<8x256xf32>
    %277 = arith.mulf %26, %276 : vector<8x256xf32>
    %cst_76 = arith.constant 0.00124394533 : f32
    %278 = vector.broadcast %cst_76 : f32 to vector<8x256xf32>
    %279 = arith.mulf %29, %278 : vector<8x256xf32>
    %280 = arith.addf %277, %279 : vector<8x256xf32>
    %cst_77 = arith.constant 0.130184233 : f32
    %281 = vector.broadcast %cst_77 : f32 to vector<8x256xf32>
    %282 = arith.mulf %32, %281 : vector<8x256xf32>
    %283 = arith.addf %280, %282 : vector<8x256xf32>
    %cst_78 = arith.constant 0.0401836336 : f32
    %284 = vector.broadcast %cst_78 : f32 to vector<8x256xf32>
    %285 = arith.mulf %35, %284 : vector<8x256xf32>
    %286 = arith.addf %283, %285 : vector<8x256xf32>
    %cst_79 = arith.constant -0.145986557 : f32
    %287 = vector.broadcast %cst_79 : f32 to vector<8x256xf32>
    %288 = arith.mulf %38, %287 : vector<8x256xf32>
    %289 = arith.addf %286, %288 : vector<8x256xf32>
    %cst_80 = arith.constant 0.508628845 : f32
    %290 = vector.broadcast %cst_80 : f32 to vector<8x256xf32>
    %291 = arith.mulf %41, %290 : vector<8x256xf32>
    %292 = arith.addf %289, %291 : vector<8x256xf32>
    %cst_81 = arith.constant -0.0833874344 : f32
    %293 = vector.broadcast %cst_81 : f32 to vector<8x256xf32>
    %294 = arith.mulf %44, %293 : vector<8x256xf32>
    %295 = arith.addf %292, %294 : vector<8x256xf32>
    %cst_82 = arith.constant -0.303423524 : f32
    %296 = vector.broadcast %cst_82 : f32 to vector<8x256xf32>
    %297 = arith.mulf %47, %296 : vector<8x256xf32>
    %298 = arith.addf %295, %297 : vector<8x256xf32>
    %cst_83 = arith.constant -0.138040766 : f32
    %299 = vector.broadcast %cst_83 : f32 to vector<8x256xf32>
    %300 = arith.mulf %50, %299 : vector<8x256xf32>
    %301 = arith.addf %298, %300 : vector<8x256xf32>
    %cst_84 = arith.constant 0.108177118 : f32
    %302 = vector.broadcast %cst_84 : f32 to vector<8x256xf32>
    %303 = arith.mulf %53, %302 : vector<8x256xf32>
    %304 = arith.addf %301, %303 : vector<8x256xf32>
    %cst_85 = arith.constant -0.536741555 : f32
    %305 = vector.broadcast %cst_85 : f32 to vector<8x256xf32>
    %306 = arith.mulf %56, %305 : vector<8x256xf32>
    %307 = arith.addf %304, %306 : vector<8x256xf32>
    %cst_86 = arith.constant -0.192649499 : f32
    %308 = vector.broadcast %cst_86 : f32 to vector<8x256xf32>
    %309 = arith.mulf %59, %308 : vector<8x256xf32>
    %310 = arith.addf %307, %309 : vector<8x256xf32>
    %cst_87 = arith.constant 0.204772279 : f32
    %311 = vector.broadcast %cst_87 : f32 to vector<8x256xf32>
    %312 = arith.mulf %62, %311 : vector<8x256xf32>
    %313 = arith.addf %310, %312 : vector<8x256xf32>
    %cst_88 = arith.constant -0.103755064 : f32
    %314 = vector.broadcast %cst_88 : f32 to vector<8x256xf32>
    %315 = arith.mulf %65, %314 : vector<8x256xf32>
    %316 = arith.addf %313, %315 : vector<8x256xf32>
    %cst_89 = arith.constant 0.122632734 : f32
    %317 = vector.broadcast %cst_89 : f32 to vector<8x256xf32>
    %318 = arith.mulf %68, %317 : vector<8x256xf32>
    %319 = arith.addf %316, %318 : vector<8x256xf32>
    %cst_90 = arith.constant -0.360771298 : f32
    %320 = vector.broadcast %cst_90 : f32 to vector<8x256xf32>
    %321 = arith.mulf %71, %320 : vector<8x256xf32>
    %322 = arith.addf %319, %321 : vector<8x256xf32>
    %323 = arith.mulf %322, %322 : vector<8x256xf32>
    %324 = arith.addf %272, %323 : vector<8x256xf32>
    %325 = arith.subf %273, %323 : vector<8x256xf32>
    %326 = arith.addf %274, %323 : vector<8x256xf32>
    %327 = arith.addf %275, %323 : vector<8x256xf32>
    %cst_91 = arith.constant 0.13798064 : f32
    %328 = vector.broadcast %cst_91 : f32 to vector<8x256xf32>
    %329 = arith.mulf %26, %328 : vector<8x256xf32>
    %cst_92 = arith.constant 0.472634107 : f32
    %330 = vector.broadcast %cst_92 : f32 to vector<8x256xf32>
    %331 = arith.mulf %29, %330 : vector<8x256xf32>
    %332 = arith.addf %329, %331 : vector<8x256xf32>
    %cst_93 = arith.constant 0.0316336527 : f32
    %333 = vector.broadcast %cst_93 : f32 to vector<8x256xf32>
    %334 = arith.mulf %32, %333 : vector<8x256xf32>
    %335 = arith.addf %332, %334 : vector<8x256xf32>
    %cst_94 = arith.constant 0.196029827 : f32
    %336 = vector.broadcast %cst_94 : f32 to vector<8x256xf32>
    %337 = arith.mulf %35, %336 : vector<8x256xf32>
    %338 = arith.addf %335, %337 : vector<8x256xf32>
    %cst_95 = arith.constant -0.479052424 : f32
    %339 = vector.broadcast %cst_95 : f32 to vector<8x256xf32>
    %340 = arith.mulf %38, %339 : vector<8x256xf32>
    %341 = arith.addf %338, %340 : vector<8x256xf32>
    %cst_96 = arith.constant 0.0263226293 : f32
    %342 = vector.broadcast %cst_96 : f32 to vector<8x256xf32>
    %343 = arith.mulf %41, %342 : vector<8x256xf32>
    %344 = arith.addf %341, %343 : vector<8x256xf32>
    %cst_97 = arith.constant 0.075644359 : f32
    %345 = vector.broadcast %cst_97 : f32 to vector<8x256xf32>
    %346 = arith.mulf %44, %345 : vector<8x256xf32>
    %347 = arith.addf %344, %346 : vector<8x256xf32>
    %cst_98 = arith.constant 0.286163747 : f32
    %348 = vector.broadcast %cst_98 : f32 to vector<8x256xf32>
    %349 = arith.mulf %47, %348 : vector<8x256xf32>
    %350 = arith.addf %347, %349 : vector<8x256xf32>
    %cst_99 = arith.constant 0.26006335 : f32
    %351 = vector.broadcast %cst_99 : f32 to vector<8x256xf32>
    %352 = arith.mulf %50, %351 : vector<8x256xf32>
    %353 = arith.addf %350, %352 : vector<8x256xf32>
    %cst_100 = arith.constant 0.0926092937 : f32
    %354 = vector.broadcast %cst_100 : f32 to vector<8x256xf32>
    %355 = arith.mulf %53, %354 : vector<8x256xf32>
    %356 = arith.addf %353, %355 : vector<8x256xf32>
    %cst_101 = arith.constant -0.0807190686 : f32
    %357 = vector.broadcast %cst_101 : f32 to vector<8x256xf32>
    %358 = arith.mulf %56, %357 : vector<8x256xf32>
    %359 = arith.addf %356, %358 : vector<8x256xf32>
    %cst_102 = arith.constant -0.335837543 : f32
    %360 = vector.broadcast %cst_102 : f32 to vector<8x256xf32>
    %361 = arith.mulf %59, %360 : vector<8x256xf32>
    %362 = arith.addf %359, %361 : vector<8x256xf32>
    %cst_103 = arith.constant -0.205288962 : f32
    %363 = vector.broadcast %cst_103 : f32 to vector<8x256xf32>
    %364 = arith.mulf %62, %363 : vector<8x256xf32>
    %365 = arith.addf %362, %364 : vector<8x256xf32>
    %cst_104 = arith.constant 0.387497246 : f32
    %366 = vector.broadcast %cst_104 : f32 to vector<8x256xf32>
    %367 = arith.mulf %65, %366 : vector<8x256xf32>
    %368 = arith.addf %365, %367 : vector<8x256xf32>
    %cst_105 = arith.constant -0.0949568971 : f32
    %369 = vector.broadcast %cst_105 : f32 to vector<8x256xf32>
    %370 = arith.mulf %68, %369 : vector<8x256xf32>
    %371 = arith.addf %368, %370 : vector<8x256xf32>
    %cst_106 = arith.constant 0.0593951046 : f32
    %372 = vector.broadcast %cst_106 : f32 to vector<8x256xf32>
    %373 = arith.mulf %71, %372 : vector<8x256xf32>
    %374 = arith.addf %371, %373 : vector<8x256xf32>
    %375 = arith.mulf %374, %374 : vector<8x256xf32>
    %376 = arith.addf %324, %375 : vector<8x256xf32>
    %377 = arith.subf %325, %375 : vector<8x256xf32>
    %378 = arith.addf %326, %375 : vector<8x256xf32>
    %379 = arith.subf %327, %375 : vector<8x256xf32>
    %cst_107 = arith.constant -0.578328788 : f32
    %380 = vector.broadcast %cst_107 : f32 to vector<8x256xf32>
    %381 = arith.mulf %26, %380 : vector<8x256xf32>
    %cst_108 = arith.constant 0.339556694 : f32
    %382 = vector.broadcast %cst_108 : f32 to vector<8x256xf32>
    %383 = arith.mulf %29, %382 : vector<8x256xf32>
    %384 = arith.addf %381, %383 : vector<8x256xf32>
    %cst_109 = arith.constant -0.382609546 : f32
    %385 = vector.broadcast %cst_109 : f32 to vector<8x256xf32>
    %386 = arith.mulf %32, %385 : vector<8x256xf32>
    %387 = arith.addf %384, %386 : vector<8x256xf32>
    %cst_110 = arith.constant 0.149437219 : f32
    %388 = vector.broadcast %cst_110 : f32 to vector<8x256xf32>
    %389 = arith.mulf %35, %388 : vector<8x256xf32>
    %390 = arith.addf %387, %389 : vector<8x256xf32>
    %cst_111 = arith.constant 0.0111268945 : f32
    %391 = vector.broadcast %cst_111 : f32 to vector<8x256xf32>
    %392 = arith.mulf %38, %391 : vector<8x256xf32>
    %393 = arith.addf %390, %392 : vector<8x256xf32>
    %cst_112 = arith.constant -0.164060012 : f32
    %394 = vector.broadcast %cst_112 : f32 to vector<8x256xf32>
    %395 = arith.mulf %41, %394 : vector<8x256xf32>
    %396 = arith.addf %393, %395 : vector<8x256xf32>
    %cst_113 = arith.constant 0.090498425 : f32
    %397 = vector.broadcast %cst_113 : f32 to vector<8x256xf32>
    %398 = arith.mulf %44, %397 : vector<8x256xf32>
    %399 = arith.addf %396, %398 : vector<8x256xf32>
    %cst_114 = arith.constant -0.38056466 : f32
    %400 = vector.broadcast %cst_114 : f32 to vector<8x256xf32>
    %401 = arith.mulf %47, %400 : vector<8x256xf32>
    %402 = arith.addf %399, %401 : vector<8x256xf32>
    %cst_115 = arith.constant 0.110885993 : f32
    %403 = vector.broadcast %cst_115 : f32 to vector<8x256xf32>
    %404 = arith.mulf %50, %403 : vector<8x256xf32>
    %405 = arith.addf %402, %404 : vector<8x256xf32>
    %cst_116 = arith.constant 0.0122239916 : f32
    %406 = vector.broadcast %cst_116 : f32 to vector<8x256xf32>
    %407 = arith.mulf %53, %406 : vector<8x256xf32>
    %408 = arith.addf %405, %407 : vector<8x256xf32>
    %cst_117 = arith.constant -0.15019083 : f32
    %409 = vector.broadcast %cst_117 : f32 to vector<8x256xf32>
    %410 = arith.mulf %56, %409 : vector<8x256xf32>
    %411 = arith.addf %408, %410 : vector<8x256xf32>
    %cst_118 = arith.constant -0.148727357 : f32
    %412 = vector.broadcast %cst_118 : f32 to vector<8x256xf32>
    %413 = arith.mulf %59, %412 : vector<8x256xf32>
    %414 = arith.addf %411, %413 : vector<8x256xf32>
    %cst_119 = arith.constant -0.0420265682 : f32
    %415 = vector.broadcast %cst_119 : f32 to vector<8x256xf32>
    %416 = arith.mulf %62, %415 : vector<8x256xf32>
    %417 = arith.addf %414, %416 : vector<8x256xf32>
    %cst_120 = arith.constant -1.361540e-01 : f32
    %418 = vector.broadcast %cst_120 : f32 to vector<8x256xf32>
    %419 = arith.mulf %65, %418 : vector<8x256xf32>
    %420 = arith.addf %417, %419 : vector<8x256xf32>
    %cst_121 = arith.constant 0.352006257 : f32
    %421 = vector.broadcast %cst_121 : f32 to vector<8x256xf32>
    %422 = arith.mulf %68, %421 : vector<8x256xf32>
    %423 = arith.addf %420, %422 : vector<8x256xf32>
    %cst_122 = arith.constant -0.0110369409 : f32
    %424 = vector.broadcast %cst_122 : f32 to vector<8x256xf32>
    %425 = arith.mulf %71, %424 : vector<8x256xf32>
    %426 = arith.addf %423, %425 : vector<8x256xf32>
    %427 = arith.mulf %426, %426 : vector<8x256xf32>
    %428 = arith.addf %376, %427 : vector<8x256xf32>
    %429 = arith.subf %377, %427 : vector<8x256xf32>
    %430 = arith.subf %378, %427 : vector<8x256xf32>
    %431 = arith.addf %379, %427 : vector<8x256xf32>
    %cst_123 = arith.constant 0.196156144 : f32
    %432 = vector.broadcast %cst_123 : f32 to vector<8x256xf32>
    %433 = arith.mulf %26, %432 : vector<8x256xf32>
    %cst_124 = arith.constant -0.0738667324 : f32
    %434 = vector.broadcast %cst_124 : f32 to vector<8x256xf32>
    %435 = arith.mulf %29, %434 : vector<8x256xf32>
    %436 = arith.addf %433, %435 : vector<8x256xf32>
    %cst_125 = arith.constant -0.217847377 : f32
    %437 = vector.broadcast %cst_125 : f32 to vector<8x256xf32>
    %438 = arith.mulf %32, %437 : vector<8x256xf32>
    %439 = arith.addf %436, %438 : vector<8x256xf32>
    %cst_126 = arith.constant -0.0929477736 : f32
    %440 = vector.broadcast %cst_126 : f32 to vector<8x256xf32>
    %441 = arith.mulf %35, %440 : vector<8x256xf32>
    %442 = arith.addf %439, %441 : vector<8x256xf32>
    %cst_127 = arith.constant -0.171049297 : f32
    %443 = vector.broadcast %cst_127 : f32 to vector<8x256xf32>
    %444 = arith.mulf %38, %443 : vector<8x256xf32>
    %445 = arith.addf %442, %444 : vector<8x256xf32>
    %cst_128 = arith.constant -0.23058401 : f32
    %446 = vector.broadcast %cst_128 : f32 to vector<8x256xf32>
    %447 = arith.mulf %41, %446 : vector<8x256xf32>
    %448 = arith.addf %445, %447 : vector<8x256xf32>
    %cst_129 = arith.constant 0.185168505 : f32
    %449 = vector.broadcast %cst_129 : f32 to vector<8x256xf32>
    %450 = arith.mulf %44, %449 : vector<8x256xf32>
    %451 = arith.addf %448, %450 : vector<8x256xf32>
    %cst_130 = arith.constant -0.0775674731 : f32
    %452 = vector.broadcast %cst_130 : f32 to vector<8x256xf32>
    %453 = arith.mulf %47, %452 : vector<8x256xf32>
    %454 = arith.addf %451, %453 : vector<8x256xf32>
    %cst_131 = arith.constant -0.309670389 : f32
    %455 = vector.broadcast %cst_131 : f32 to vector<8x256xf32>
    %456 = arith.mulf %50, %455 : vector<8x256xf32>
    %457 = arith.addf %454, %456 : vector<8x256xf32>
    %cst_132 = arith.constant -0.0422571339 : f32
    %458 = vector.broadcast %cst_132 : f32 to vector<8x256xf32>
    %459 = arith.mulf %53, %458 : vector<8x256xf32>
    %460 = arith.addf %457, %459 : vector<8x256xf32>
    %cst_133 = arith.constant 0.463381499 : f32
    %461 = vector.broadcast %cst_133 : f32 to vector<8x256xf32>
    %462 = arith.mulf %56, %461 : vector<8x256xf32>
    %463 = arith.addf %460, %462 : vector<8x256xf32>
    %cst_134 = arith.constant -0.361829877 : f32
    %464 = vector.broadcast %cst_134 : f32 to vector<8x256xf32>
    %465 = arith.mulf %59, %464 : vector<8x256xf32>
    %466 = arith.addf %463, %465 : vector<8x256xf32>
    %cst_135 = arith.constant -0.00592870498 : f32
    %467 = vector.broadcast %cst_135 : f32 to vector<8x256xf32>
    %468 = arith.mulf %62, %467 : vector<8x256xf32>
    %469 = arith.addf %466, %468 : vector<8x256xf32>
    %cst_136 = arith.constant 0.018754255 : f32
    %470 = vector.broadcast %cst_136 : f32 to vector<8x256xf32>
    %471 = arith.mulf %65, %470 : vector<8x256xf32>
    %472 = arith.addf %469, %471 : vector<8x256xf32>
    %cst_137 = arith.constant 0.0952102169 : f32
    %473 = vector.broadcast %cst_137 : f32 to vector<8x256xf32>
    %474 = arith.mulf %68, %473 : vector<8x256xf32>
    %475 = arith.addf %472, %474 : vector<8x256xf32>
    %cst_138 = arith.constant -0.569615841 : f32
    %476 = vector.broadcast %cst_138 : f32 to vector<8x256xf32>
    %477 = arith.mulf %71, %476 : vector<8x256xf32>
    %478 = arith.addf %475, %477 : vector<8x256xf32>
    %479 = arith.mulf %478, %478 : vector<8x256xf32>
    %480 = arith.addf %428, %479 : vector<8x256xf32>
    %481 = arith.subf %429, %479 : vector<8x256xf32>
    %482 = arith.subf %430, %479 : vector<8x256xf32>
    %483 = arith.subf %431, %479 : vector<8x256xf32>
    %cst_139 = arith.constant -0.138138071 : f32
    %484 = vector.broadcast %cst_139 : f32 to vector<8x256xf32>
    %485 = arith.mulf %26, %484 : vector<8x256xf32>
    %cst_140 = arith.constant -0.0429536477 : f32
    %486 = vector.broadcast %cst_140 : f32 to vector<8x256xf32>
    %487 = arith.mulf %29, %486 : vector<8x256xf32>
    %488 = arith.addf %485, %487 : vector<8x256xf32>
    %cst_141 = arith.constant 0.0685878694 : f32
    %489 = vector.broadcast %cst_141 : f32 to vector<8x256xf32>
    %490 = arith.mulf %32, %489 : vector<8x256xf32>
    %491 = arith.addf %488, %490 : vector<8x256xf32>
    %cst_142 = arith.constant -0.261954367 : f32
    %492 = vector.broadcast %cst_142 : f32 to vector<8x256xf32>
    %493 = arith.mulf %35, %492 : vector<8x256xf32>
    %494 = arith.addf %491, %493 : vector<8x256xf32>
    %cst_143 = arith.constant -0.403163135 : f32
    %495 = vector.broadcast %cst_143 : f32 to vector<8x256xf32>
    %496 = arith.mulf %38, %495 : vector<8x256xf32>
    %497 = arith.addf %494, %496 : vector<8x256xf32>
    %cst_144 = arith.constant -3.220370e-01 : f32
    %498 = vector.broadcast %cst_144 : f32 to vector<8x256xf32>
    %499 = arith.mulf %41, %498 : vector<8x256xf32>
    %500 = arith.addf %497, %499 : vector<8x256xf32>
    %cst_145 = arith.constant -0.203766927 : f32
    %501 = vector.broadcast %cst_145 : f32 to vector<8x256xf32>
    %502 = arith.mulf %44, %501 : vector<8x256xf32>
    %503 = arith.addf %500, %502 : vector<8x256xf32>
    %cst_146 = arith.constant -0.218189865 : f32
    %504 = vector.broadcast %cst_146 : f32 to vector<8x256xf32>
    %505 = arith.mulf %47, %504 : vector<8x256xf32>
    %506 = arith.addf %503, %505 : vector<8x256xf32>
    %cst_147 = arith.constant -0.520297289 : f32
    %507 = vector.broadcast %cst_147 : f32 to vector<8x256xf32>
    %508 = arith.mulf %50, %507 : vector<8x256xf32>
    %509 = arith.addf %506, %508 : vector<8x256xf32>
    %cst_148 = arith.constant 0.100700743 : f32
    %510 = vector.broadcast %cst_148 : f32 to vector<8x256xf32>
    %511 = arith.mulf %53, %510 : vector<8x256xf32>
    %512 = arith.addf %509, %511 : vector<8x256xf32>
    %cst_149 = arith.constant -0.23017849 : f32
    %513 = vector.broadcast %cst_149 : f32 to vector<8x256xf32>
    %514 = arith.mulf %56, %513 : vector<8x256xf32>
    %515 = arith.addf %512, %514 : vector<8x256xf32>
    %cst_150 = arith.constant -0.0800800099 : f32
    %516 = vector.broadcast %cst_150 : f32 to vector<8x256xf32>
    %517 = arith.mulf %59, %516 : vector<8x256xf32>
    %518 = arith.addf %515, %517 : vector<8x256xf32>
    %cst_151 = arith.constant -0.167670429 : f32
    %519 = vector.broadcast %cst_151 : f32 to vector<8x256xf32>
    %520 = arith.mulf %62, %519 : vector<8x256xf32>
    %521 = arith.addf %518, %520 : vector<8x256xf32>
    %cst_152 = arith.constant -0.0493751578 : f32
    %522 = vector.broadcast %cst_152 : f32 to vector<8x256xf32>
    %523 = arith.mulf %65, %522 : vector<8x256xf32>
    %524 = arith.addf %521, %523 : vector<8x256xf32>
    %cst_153 = arith.constant -0.322763562 : f32
    %525 = vector.broadcast %cst_153 : f32 to vector<8x256xf32>
    %526 = arith.mulf %68, %525 : vector<8x256xf32>
    %527 = arith.addf %524, %526 : vector<8x256xf32>
    %cst_154 = arith.constant 0.274590462 : f32
    %528 = vector.broadcast %cst_154 : f32 to vector<8x256xf32>
    %529 = arith.mulf %71, %528 : vector<8x256xf32>
    %530 = arith.addf %527, %529 : vector<8x256xf32>
    %531 = arith.mulf %530, %530 : vector<8x256xf32>
    %532 = arith.subf %480, %531 : vector<8x256xf32>
    %533 = arith.addf %481, %531 : vector<8x256xf32>
    %534 = arith.addf %482, %531 : vector<8x256xf32>
    %535 = arith.addf %483, %531 : vector<8x256xf32>
    %cst_155 = arith.constant 0.435886741 : f32
    %536 = vector.broadcast %cst_155 : f32 to vector<8x256xf32>
    %537 = arith.mulf %26, %536 : vector<8x256xf32>
    %cst_156 = arith.constant -0.0100020645 : f32
    %538 = vector.broadcast %cst_156 : f32 to vector<8x256xf32>
    %539 = arith.mulf %29, %538 : vector<8x256xf32>
    %540 = arith.addf %537, %539 : vector<8x256xf32>
    %cst_157 = arith.constant -0.429416239 : f32
    %541 = vector.broadcast %cst_157 : f32 to vector<8x256xf32>
    %542 = arith.mulf %32, %541 : vector<8x256xf32>
    %543 = arith.addf %540, %542 : vector<8x256xf32>
    %cst_158 = arith.constant 0.0126360366 : f32
    %544 = vector.broadcast %cst_158 : f32 to vector<8x256xf32>
    %545 = arith.mulf %35, %544 : vector<8x256xf32>
    %546 = arith.addf %543, %545 : vector<8x256xf32>
    %cst_159 = arith.constant 0.212858722 : f32
    %547 = vector.broadcast %cst_159 : f32 to vector<8x256xf32>
    %548 = arith.mulf %38, %547 : vector<8x256xf32>
    %549 = arith.addf %546, %548 : vector<8x256xf32>
    %cst_160 = arith.constant -0.224732012 : f32
    %550 = vector.broadcast %cst_160 : f32 to vector<8x256xf32>
    %551 = arith.mulf %41, %550 : vector<8x256xf32>
    %552 = arith.addf %549, %551 : vector<8x256xf32>
    %cst_161 = arith.constant 0.515816271 : f32
    %553 = vector.broadcast %cst_161 : f32 to vector<8x256xf32>
    %554 = arith.mulf %44, %553 : vector<8x256xf32>
    %555 = arith.addf %552, %554 : vector<8x256xf32>
    %cst_162 = arith.constant -0.0466700308 : f32
    %556 = vector.broadcast %cst_162 : f32 to vector<8x256xf32>
    %557 = arith.mulf %47, %556 : vector<8x256xf32>
    %558 = arith.addf %555, %557 : vector<8x256xf32>
    %cst_163 = arith.constant -0.11770881 : f32
    %559 = vector.broadcast %cst_163 : f32 to vector<8x256xf32>
    %560 = arith.mulf %50, %559 : vector<8x256xf32>
    %561 = arith.addf %558, %560 : vector<8x256xf32>
    %cst_164 = arith.constant 0.0178147461 : f32
    %562 = vector.broadcast %cst_164 : f32 to vector<8x256xf32>
    %563 = arith.mulf %53, %562 : vector<8x256xf32>
    %564 = arith.addf %561, %563 : vector<8x256xf32>
    %cst_165 = arith.constant -0.418272048 : f32
    %565 = vector.broadcast %cst_165 : f32 to vector<8x256xf32>
    %566 = arith.mulf %56, %565 : vector<8x256xf32>
    %567 = arith.addf %564, %566 : vector<8x256xf32>
    %cst_166 = arith.constant 0.149221659 : f32
    %568 = vector.broadcast %cst_166 : f32 to vector<8x256xf32>
    %569 = arith.mulf %59, %568 : vector<8x256xf32>
    %570 = arith.addf %567, %569 : vector<8x256xf32>
    %cst_167 = arith.constant -0.0319796167 : f32
    %571 = vector.broadcast %cst_167 : f32 to vector<8x256xf32>
    %572 = arith.mulf %62, %571 : vector<8x256xf32>
    %573 = arith.addf %570, %572 : vector<8x256xf32>
    %cst_168 = arith.constant 0.162798181 : f32
    %574 = vector.broadcast %cst_168 : f32 to vector<8x256xf32>
    %575 = arith.mulf %65, %574 : vector<8x256xf32>
    %576 = arith.addf %573, %575 : vector<8x256xf32>
    %cst_169 = arith.constant -0.0563239679 : f32
    %577 = vector.broadcast %cst_169 : f32 to vector<8x256xf32>
    %578 = arith.mulf %68, %577 : vector<8x256xf32>
    %579 = arith.addf %576, %578 : vector<8x256xf32>
    %cst_170 = arith.constant 1.385540e-01 : f32
    %580 = vector.broadcast %cst_170 : f32 to vector<8x256xf32>
    %581 = arith.mulf %71, %580 : vector<8x256xf32>
    %582 = arith.addf %579, %581 : vector<8x256xf32>
    %583 = arith.mulf %582, %582 : vector<8x256xf32>
    %584 = arith.subf %532, %583 : vector<8x256xf32>
    %585 = arith.addf %533, %583 : vector<8x256xf32>
    %586 = arith.addf %534, %583 : vector<8x256xf32>
    %587 = arith.subf %535, %583 : vector<8x256xf32>
    %cst_171 = arith.constant -0.20767276 : f32
    %588 = vector.broadcast %cst_171 : f32 to vector<8x256xf32>
    %589 = arith.mulf %26, %588 : vector<8x256xf32>
    %cst_172 = arith.constant 0.193288922 : f32
    %590 = vector.broadcast %cst_172 : f32 to vector<8x256xf32>
    %591 = arith.mulf %29, %590 : vector<8x256xf32>
    %592 = arith.addf %589, %591 : vector<8x256xf32>
    %cst_173 = arith.constant 0.278502703 : f32
    %593 = vector.broadcast %cst_173 : f32 to vector<8x256xf32>
    %594 = arith.mulf %32, %593 : vector<8x256xf32>
    %595 = arith.addf %592, %594 : vector<8x256xf32>
    %cst_174 = arith.constant 0.11051745 : f32
    %596 = vector.broadcast %cst_174 : f32 to vector<8x256xf32>
    %597 = arith.mulf %35, %596 : vector<8x256xf32>
    %598 = arith.addf %595, %597 : vector<8x256xf32>
    %cst_175 = arith.constant 0.493115485 : f32
    %599 = vector.broadcast %cst_175 : f32 to vector<8x256xf32>
    %600 = arith.mulf %38, %599 : vector<8x256xf32>
    %601 = arith.addf %598, %600 : vector<8x256xf32>
    %cst_176 = arith.constant 0.170256212 : f32
    %602 = vector.broadcast %cst_176 : f32 to vector<8x256xf32>
    %603 = arith.mulf %41, %602 : vector<8x256xf32>
    %604 = arith.addf %601, %603 : vector<8x256xf32>
    %cst_177 = arith.constant 0.200624809 : f32
    %605 = vector.broadcast %cst_177 : f32 to vector<8x256xf32>
    %606 = arith.mulf %44, %605 : vector<8x256xf32>
    %607 = arith.addf %604, %606 : vector<8x256xf32>
    %cst_178 = arith.constant -0.0353657454 : f32
    %608 = vector.broadcast %cst_178 : f32 to vector<8x256xf32>
    %609 = arith.mulf %47, %608 : vector<8x256xf32>
    %610 = arith.addf %607, %609 : vector<8x256xf32>
    %cst_179 = arith.constant -0.302831262 : f32
    %611 = vector.broadcast %cst_179 : f32 to vector<8x256xf32>
    %612 = arith.mulf %50, %611 : vector<8x256xf32>
    %613 = arith.addf %610, %612 : vector<8x256xf32>
    %cst_180 = arith.constant 0.351041198 : f32
    %614 = vector.broadcast %cst_180 : f32 to vector<8x256xf32>
    %615 = arith.mulf %53, %614 : vector<8x256xf32>
    %616 = arith.addf %613, %615 : vector<8x256xf32>
    %cst_181 = arith.constant 0.0492809452 : f32
    %617 = vector.broadcast %cst_181 : f32 to vector<8x256xf32>
    %618 = arith.mulf %56, %617 : vector<8x256xf32>
    %619 = arith.addf %616, %618 : vector<8x256xf32>
    %cst_182 = arith.constant -0.0684895143 : f32
    %620 = vector.broadcast %cst_182 : f32 to vector<8x256xf32>
    %621 = arith.mulf %59, %620 : vector<8x256xf32>
    %622 = arith.addf %619, %621 : vector<8x256xf32>
    %cst_183 = arith.constant -0.437543303 : f32
    %623 = vector.broadcast %cst_183 : f32 to vector<8x256xf32>
    %624 = arith.mulf %62, %623 : vector<8x256xf32>
    %625 = arith.addf %622, %624 : vector<8x256xf32>
    %cst_184 = arith.constant 0.15559499 : f32
    %626 = vector.broadcast %cst_184 : f32 to vector<8x256xf32>
    %627 = arith.mulf %65, %626 : vector<8x256xf32>
    %628 = arith.addf %625, %627 : vector<8x256xf32>
    %cst_185 = arith.constant -0.220087871 : f32
    %629 = vector.broadcast %cst_185 : f32 to vector<8x256xf32>
    %630 = arith.mulf %68, %629 : vector<8x256xf32>
    %631 = arith.addf %628, %630 : vector<8x256xf32>
    %cst_186 = arith.constant -0.173013628 : f32
    %632 = vector.broadcast %cst_186 : f32 to vector<8x256xf32>
    %633 = arith.mulf %71, %632 : vector<8x256xf32>
    %634 = arith.addf %631, %633 : vector<8x256xf32>
    %635 = arith.mulf %634, %634 : vector<8x256xf32>
    %636 = arith.subf %584, %635 : vector<8x256xf32>
    %637 = arith.addf %585, %635 : vector<8x256xf32>
    %638 = arith.subf %586, %635 : vector<8x256xf32>
    %639 = arith.addf %587, %635 : vector<8x256xf32>
    %cst_187 = arith.constant -0.173349872 : f32
    %640 = vector.broadcast %cst_187 : f32 to vector<8x256xf32>
    %641 = arith.mulf %26, %640 : vector<8x256xf32>
    %cst_188 = arith.constant -0.223172456 : f32
    %642 = vector.broadcast %cst_188 : f32 to vector<8x256xf32>
    %643 = arith.mulf %29, %642 : vector<8x256xf32>
    %644 = arith.addf %641, %643 : vector<8x256xf32>
    %cst_189 = arith.constant 0.0183842033 : f32
    %645 = vector.broadcast %cst_189 : f32 to vector<8x256xf32>
    %646 = arith.mulf %32, %645 : vector<8x256xf32>
    %647 = arith.addf %644, %646 : vector<8x256xf32>
    %cst_190 = arith.constant -0.0353486091 : f32
    %648 = vector.broadcast %cst_190 : f32 to vector<8x256xf32>
    %649 = arith.mulf %35, %648 : vector<8x256xf32>
    %650 = arith.addf %647, %649 : vector<8x256xf32>
    %cst_191 = arith.constant -0.0983907058 : f32
    %651 = vector.broadcast %cst_191 : f32 to vector<8x256xf32>
    %652 = arith.mulf %38, %651 : vector<8x256xf32>
    %653 = arith.addf %650, %652 : vector<8x256xf32>
    %cst_192 = arith.constant 0.345350564 : f32
    %654 = vector.broadcast %cst_192 : f32 to vector<8x256xf32>
    %655 = arith.mulf %41, %654 : vector<8x256xf32>
    %656 = arith.addf %653, %655 : vector<8x256xf32>
    %cst_193 = arith.constant 0.257054746 : f32
    %657 = vector.broadcast %cst_193 : f32 to vector<8x256xf32>
    %658 = arith.mulf %44, %657 : vector<8x256xf32>
    %659 = arith.addf %656, %658 : vector<8x256xf32>
    %cst_194 = arith.constant -0.390452117 : f32
    %660 = vector.broadcast %cst_194 : f32 to vector<8x256xf32>
    %661 = arith.mulf %47, %660 : vector<8x256xf32>
    %662 = arith.addf %659, %661 : vector<8x256xf32>
    %cst_195 = arith.constant 0.0349098109 : f32
    %663 = vector.broadcast %cst_195 : f32 to vector<8x256xf32>
    %664 = arith.mulf %50, %663 : vector<8x256xf32>
    %665 = arith.addf %662, %664 : vector<8x256xf32>
    %cst_196 = arith.constant -0.571689248 : f32
    %666 = vector.broadcast %cst_196 : f32 to vector<8x256xf32>
    %667 = arith.mulf %53, %666 : vector<8x256xf32>
    %668 = arith.addf %665, %667 : vector<8x256xf32>
    %cst_197 = arith.constant 0.11030852 : f32
    %669 = vector.broadcast %cst_197 : f32 to vector<8x256xf32>
    %670 = arith.mulf %56, %669 : vector<8x256xf32>
    %671 = arith.addf %668, %670 : vector<8x256xf32>
    %cst_198 = arith.constant -0.0528582148 : f32
    %672 = vector.broadcast %cst_198 : f32 to vector<8x256xf32>
    %673 = arith.mulf %59, %672 : vector<8x256xf32>
    %674 = arith.addf %671, %673 : vector<8x256xf32>
    %cst_199 = arith.constant -0.118270658 : f32
    %675 = vector.broadcast %cst_199 : f32 to vector<8x256xf32>
    %676 = arith.mulf %62, %675 : vector<8x256xf32>
    %677 = arith.addf %674, %676 : vector<8x256xf32>
    %cst_200 = arith.constant 0.408285886 : f32
    %678 = vector.broadcast %cst_200 : f32 to vector<8x256xf32>
    %679 = arith.mulf %65, %678 : vector<8x256xf32>
    %680 = arith.addf %677, %679 : vector<8x256xf32>
    %cst_201 = arith.constant -0.177337155 : f32
    %681 = vector.broadcast %cst_201 : f32 to vector<8x256xf32>
    %682 = arith.mulf %68, %681 : vector<8x256xf32>
    %683 = arith.addf %680, %682 : vector<8x256xf32>
    %cst_202 = arith.constant 0.126236275 : f32
    %684 = vector.broadcast %cst_202 : f32 to vector<8x256xf32>
    %685 = arith.mulf %71, %684 : vector<8x256xf32>
    %686 = arith.addf %683, %685 : vector<8x256xf32>
    %687 = arith.mulf %686, %686 : vector<8x256xf32>
    %688 = arith.subf %636, %687 : vector<8x256xf32>
    %689 = arith.addf %637, %687 : vector<8x256xf32>
    %690 = arith.subf %638, %687 : vector<8x256xf32>
    %691 = arith.subf %639, %687 : vector<8x256xf32>
    %cst_203 = arith.constant -0.225243539 : f32
    %692 = vector.broadcast %cst_203 : f32 to vector<8x256xf32>
    %693 = arith.mulf %26, %692 : vector<8x256xf32>
    %cst_204 = arith.constant -0.16976355 : f32
    %694 = vector.broadcast %cst_204 : f32 to vector<8x256xf32>
    %695 = arith.mulf %29, %694 : vector<8x256xf32>
    %696 = arith.addf %693, %695 : vector<8x256xf32>
    %cst_205 = arith.constant -0.559376717 : f32
    %697 = vector.broadcast %cst_205 : f32 to vector<8x256xf32>
    %698 = arith.mulf %32, %697 : vector<8x256xf32>
    %699 = arith.addf %696, %698 : vector<8x256xf32>
    %cst_206 = arith.constant 1.776150e-01 : f32
    %700 = vector.broadcast %cst_206 : f32 to vector<8x256xf32>
    %701 = arith.mulf %35, %700 : vector<8x256xf32>
    %702 = arith.addf %699, %701 : vector<8x256xf32>
    %cst_207 = arith.constant 0.0541897863 : f32
    %703 = vector.broadcast %cst_207 : f32 to vector<8x256xf32>
    %704 = arith.mulf %38, %703 : vector<8x256xf32>
    %705 = arith.addf %702, %704 : vector<8x256xf32>
    %cst_208 = arith.constant 0.134851351 : f32
    %706 = vector.broadcast %cst_208 : f32 to vector<8x256xf32>
    %707 = arith.mulf %41, %706 : vector<8x256xf32>
    %708 = arith.addf %705, %707 : vector<8x256xf32>
    %cst_209 = arith.constant -0.369362205 : f32
    %709 = vector.broadcast %cst_209 : f32 to vector<8x256xf32>
    %710 = arith.mulf %44, %709 : vector<8x256xf32>
    %711 = arith.addf %708, %710 : vector<8x256xf32>
    %cst_210 = arith.constant 0.297949225 : f32
    %712 = vector.broadcast %cst_210 : f32 to vector<8x256xf32>
    %713 = arith.mulf %47, %712 : vector<8x256xf32>
    %714 = arith.addf %711, %713 : vector<8x256xf32>
    %cst_211 = arith.constant -0.0295818169 : f32
    %715 = vector.broadcast %cst_211 : f32 to vector<8x256xf32>
    %716 = arith.mulf %50, %715 : vector<8x256xf32>
    %717 = arith.addf %714, %716 : vector<8x256xf32>
    %cst_212 = arith.constant -0.0792644396 : f32
    %718 = vector.broadcast %cst_212 : f32 to vector<8x256xf32>
    %719 = arith.mulf %53, %718 : vector<8x256xf32>
    %720 = arith.addf %717, %719 : vector<8x256xf32>
    %cst_213 = arith.constant -0.166538432 : f32
    %721 = vector.broadcast %cst_213 : f32 to vector<8x256xf32>
    %722 = arith.mulf %56, %721 : vector<8x256xf32>
    %723 = arith.addf %720, %722 : vector<8x256xf32>
    %cst_214 = arith.constant 0.0362430513 : f32
    %724 = vector.broadcast %cst_214 : f32 to vector<8x256xf32>
    %725 = arith.mulf %59, %724 : vector<8x256xf32>
    %726 = arith.addf %723, %725 : vector<8x256xf32>
    %cst_215 = arith.constant -0.0520031415 : f32
    %727 = vector.broadcast %cst_215 : f32 to vector<8x256xf32>
    %728 = arith.mulf %62, %727 : vector<8x256xf32>
    %729 = arith.addf %726, %728 : vector<8x256xf32>
    %cst_216 = arith.constant 0.102257408 : f32
    %730 = vector.broadcast %cst_216 : f32 to vector<8x256xf32>
    %731 = arith.mulf %65, %730 : vector<8x256xf32>
    %732 = arith.addf %729, %731 : vector<8x256xf32>
    %cst_217 = arith.constant -0.431446314 : f32
    %733 = vector.broadcast %cst_217 : f32 to vector<8x256xf32>
    %734 = arith.mulf %68, %733 : vector<8x256xf32>
    %735 = arith.addf %732, %734 : vector<8x256xf32>
    %cst_218 = arith.constant -0.30685392 : f32
    %736 = vector.broadcast %cst_218 : f32 to vector<8x256xf32>
    %737 = arith.mulf %71, %736 : vector<8x256xf32>
    %738 = arith.addf %735, %737 : vector<8x256xf32>
    %739 = arith.mulf %738, %738 : vector<8x256xf32>
    %740 = arith.subf %688, %739 : vector<8x256xf32>
    %741 = arith.subf %689, %739 : vector<8x256xf32>
    %742 = arith.addf %690, %739 : vector<8x256xf32>
    %743 = arith.addf %691, %739 : vector<8x256xf32>
    %cst_219 = arith.constant 0.112108201 : f32
    %744 = vector.broadcast %cst_219 : f32 to vector<8x256xf32>
    %745 = arith.mulf %26, %744 : vector<8x256xf32>
    %cst_220 = arith.constant 0.0602122247 : f32
    %746 = vector.broadcast %cst_220 : f32 to vector<8x256xf32>
    %747 = arith.mulf %29, %746 : vector<8x256xf32>
    %748 = arith.addf %745, %747 : vector<8x256xf32>
    %cst_221 = arith.constant 0.319696158 : f32
    %749 = vector.broadcast %cst_221 : f32 to vector<8x256xf32>
    %750 = arith.mulf %32, %749 : vector<8x256xf32>
    %751 = arith.addf %748, %750 : vector<8x256xf32>
    %cst_222 = arith.constant 0.37718755 : f32
    %752 = vector.broadcast %cst_222 : f32 to vector<8x256xf32>
    %753 = arith.mulf %35, %752 : vector<8x256xf32>
    %754 = arith.addf %751, %753 : vector<8x256xf32>
    %cst_223 = arith.constant 0.0366793349 : f32
    %755 = vector.broadcast %cst_223 : f32 to vector<8x256xf32>
    %756 = arith.mulf %38, %755 : vector<8x256xf32>
    %757 = arith.addf %754, %756 : vector<8x256xf32>
    %cst_224 = arith.constant -0.425367773 : f32
    %758 = vector.broadcast %cst_224 : f32 to vector<8x256xf32>
    %759 = arith.mulf %41, %758 : vector<8x256xf32>
    %760 = arith.addf %757, %759 : vector<8x256xf32>
    %cst_225 = arith.constant 0.00349062565 : f32
    %761 = vector.broadcast %cst_225 : f32 to vector<8x256xf32>
    %762 = arith.mulf %44, %761 : vector<8x256xf32>
    %763 = arith.addf %760, %762 : vector<8x256xf32>
    %cst_226 = arith.constant -0.233160883 : f32
    %764 = vector.broadcast %cst_226 : f32 to vector<8x256xf32>
    %765 = arith.mulf %47, %764 : vector<8x256xf32>
    %766 = arith.addf %763, %765 : vector<8x256xf32>
    %cst_227 = arith.constant 0.269986063 : f32
    %767 = vector.broadcast %cst_227 : f32 to vector<8x256xf32>
    %768 = arith.mulf %50, %767 : vector<8x256xf32>
    %769 = arith.addf %766, %768 : vector<8x256xf32>
    %cst_228 = arith.constant -0.312567562 : f32
    %770 = vector.broadcast %cst_228 : f32 to vector<8x256xf32>
    %771 = arith.mulf %53, %770 : vector<8x256xf32>
    %772 = arith.addf %769, %771 : vector<8x256xf32>
    %cst_229 = arith.constant -0.142687708 : f32
    %773 = vector.broadcast %cst_229 : f32 to vector<8x256xf32>
    %774 = arith.mulf %56, %773 : vector<8x256xf32>
    %775 = arith.addf %772, %774 : vector<8x256xf32>
    %cst_230 = arith.constant 0.0483680628 : f32
    %776 = vector.broadcast %cst_230 : f32 to vector<8x256xf32>
    %777 = arith.mulf %59, %776 : vector<8x256xf32>
    %778 = arith.addf %775, %777 : vector<8x256xf32>
    %cst_231 = arith.constant -8.014910e-02 : f32
    %779 = vector.broadcast %cst_231 : f32 to vector<8x256xf32>
    %780 = arith.mulf %62, %779 : vector<8x256xf32>
    %781 = arith.addf %778, %780 : vector<8x256xf32>
    %cst_232 = arith.constant -0.267412156 : f32
    %782 = vector.broadcast %cst_232 : f32 to vector<8x256xf32>
    %783 = arith.mulf %65, %782 : vector<8x256xf32>
    %784 = arith.addf %781, %783 : vector<8x256xf32>
    %cst_233 = arith.constant -3.759700e-01 : f32
    %785 = vector.broadcast %cst_233 : f32 to vector<8x256xf32>
    %786 = arith.mulf %68, %785 : vector<8x256xf32>
    %787 = arith.addf %784, %786 : vector<8x256xf32>
    %cst_234 = arith.constant -0.300156772 : f32
    %788 = vector.broadcast %cst_234 : f32 to vector<8x256xf32>
    %789 = arith.mulf %71, %788 : vector<8x256xf32>
    %790 = arith.addf %787, %789 : vector<8x256xf32>
    %791 = arith.mulf %790, %790 : vector<8x256xf32>
    %792 = arith.subf %740, %791 : vector<8x256xf32>
    %793 = arith.subf %741, %791 : vector<8x256xf32>
    %794 = arith.addf %742, %791 : vector<8x256xf32>
    %795 = arith.subf %743, %791 : vector<8x256xf32>
    %cst_235 = arith.constant 0.153797477 : f32
    %796 = vector.broadcast %cst_235 : f32 to vector<8x256xf32>
    %797 = arith.mulf %26, %796 : vector<8x256xf32>
    %cst_236 = arith.constant 0.640547096 : f32
    %798 = vector.broadcast %cst_236 : f32 to vector<8x256xf32>
    %799 = arith.mulf %29, %798 : vector<8x256xf32>
    %800 = arith.addf %797, %799 : vector<8x256xf32>
    %cst_237 = arith.constant -0.132052183 : f32
    %801 = vector.broadcast %cst_237 : f32 to vector<8x256xf32>
    %802 = arith.mulf %32, %801 : vector<8x256xf32>
    %803 = arith.addf %800, %802 : vector<8x256xf32>
    %cst_238 = arith.constant 0.0950947627 : f32
    %804 = vector.broadcast %cst_238 : f32 to vector<8x256xf32>
    %805 = arith.mulf %35, %804 : vector<8x256xf32>
    %806 = arith.addf %803, %805 : vector<8x256xf32>
    %cst_239 = arith.constant -0.0501978956 : f32
    %807 = vector.broadcast %cst_239 : f32 to vector<8x256xf32>
    %808 = arith.mulf %38, %807 : vector<8x256xf32>
    %809 = arith.addf %806, %808 : vector<8x256xf32>
    %cst_240 = arith.constant 0.234103322 : f32
    %810 = vector.broadcast %cst_240 : f32 to vector<8x256xf32>
    %811 = arith.mulf %41, %810 : vector<8x256xf32>
    %812 = arith.addf %809, %811 : vector<8x256xf32>
    %cst_241 = arith.constant -0.055021897 : f32
    %813 = vector.broadcast %cst_241 : f32 to vector<8x256xf32>
    %814 = arith.mulf %44, %813 : vector<8x256xf32>
    %815 = arith.addf %812, %814 : vector<8x256xf32>
    %cst_242 = arith.constant -0.0674732178 : f32
    %816 = vector.broadcast %cst_242 : f32 to vector<8x256xf32>
    %817 = arith.mulf %47, %816 : vector<8x256xf32>
    %818 = arith.addf %815, %817 : vector<8x256xf32>
    %cst_243 = arith.constant -0.347890913 : f32
    %819 = vector.broadcast %cst_243 : f32 to vector<8x256xf32>
    %820 = arith.mulf %50, %819 : vector<8x256xf32>
    %821 = arith.addf %818, %820 : vector<8x256xf32>
    %cst_244 = arith.constant -0.241189271 : f32
    %822 = vector.broadcast %cst_244 : f32 to vector<8x256xf32>
    %823 = arith.mulf %53, %822 : vector<8x256xf32>
    %824 = arith.addf %821, %823 : vector<8x256xf32>
    %cst_245 = arith.constant 0.253941208 : f32
    %825 = vector.broadcast %cst_245 : f32 to vector<8x256xf32>
    %826 = arith.mulf %56, %825 : vector<8x256xf32>
    %827 = arith.addf %824, %826 : vector<8x256xf32>
    %cst_246 = arith.constant 0.379402786 : f32
    %828 = vector.broadcast %cst_246 : f32 to vector<8x256xf32>
    %829 = arith.mulf %59, %828 : vector<8x256xf32>
    %830 = arith.addf %827, %829 : vector<8x256xf32>
    %cst_247 = arith.constant 0.175712317 : f32
    %831 = vector.broadcast %cst_247 : f32 to vector<8x256xf32>
    %832 = arith.mulf %62, %831 : vector<8x256xf32>
    %833 = arith.addf %830, %832 : vector<8x256xf32>
    %cst_248 = arith.constant -0.171150431 : f32
    %834 = vector.broadcast %cst_248 : f32 to vector<8x256xf32>
    %835 = arith.mulf %65, %834 : vector<8x256xf32>
    %836 = arith.addf %833, %835 : vector<8x256xf32>
    %cst_249 = arith.constant -0.154072389 : f32
    %837 = vector.broadcast %cst_249 : f32 to vector<8x256xf32>
    %838 = arith.mulf %68, %837 : vector<8x256xf32>
    %839 = arith.addf %836, %838 : vector<8x256xf32>
    %cst_250 = arith.constant 0.0558760241 : f32
    %840 = vector.broadcast %cst_250 : f32 to vector<8x256xf32>
    %841 = arith.mulf %71, %840 : vector<8x256xf32>
    %842 = arith.addf %839, %841 : vector<8x256xf32>
    %843 = arith.mulf %842, %842 : vector<8x256xf32>
    %844 = arith.subf %792, %843 : vector<8x256xf32>
    %845 = arith.subf %793, %843 : vector<8x256xf32>
    %846 = arith.subf %794, %843 : vector<8x256xf32>
    %847 = arith.addf %795, %843 : vector<8x256xf32>
    %cst_251 = arith.constant 0.398879468 : f32
    %848 = vector.broadcast %cst_251 : f32 to vector<8x256xf32>
    %849 = arith.mulf %26, %848 : vector<8x256xf32>
    %cst_252 = arith.constant -0.0653579086 : f32
    %850 = vector.broadcast %cst_252 : f32 to vector<8x256xf32>
    %851 = arith.mulf %29, %850 : vector<8x256xf32>
    %852 = arith.addf %849, %851 : vector<8x256xf32>
    %cst_253 = arith.constant -0.229013264 : f32
    %853 = vector.broadcast %cst_253 : f32 to vector<8x256xf32>
    %854 = arith.mulf %32, %853 : vector<8x256xf32>
    %855 = arith.addf %852, %854 : vector<8x256xf32>
    %cst_254 = arith.constant 0.132973403 : f32
    %856 = vector.broadcast %cst_254 : f32 to vector<8x256xf32>
    %857 = arith.mulf %35, %856 : vector<8x256xf32>
    %858 = arith.addf %855, %857 : vector<8x256xf32>
    %cst_255 = arith.constant 0.0442300551 : f32
    %859 = vector.broadcast %cst_255 : f32 to vector<8x256xf32>
    %860 = arith.mulf %38, %859 : vector<8x256xf32>
    %861 = arith.addf %858, %860 : vector<8x256xf32>
    %cst_256 = arith.constant 0.0628745481 : f32
    %862 = vector.broadcast %cst_256 : f32 to vector<8x256xf32>
    %863 = arith.mulf %41, %862 : vector<8x256xf32>
    %864 = arith.addf %861, %863 : vector<8x256xf32>
    %cst_257 = arith.constant -0.437816888 : f32
    %865 = vector.broadcast %cst_257 : f32 to vector<8x256xf32>
    %866 = arith.mulf %44, %865 : vector<8x256xf32>
    %867 = arith.addf %864, %866 : vector<8x256xf32>
    %cst_258 = arith.constant -0.467042893 : f32
    %868 = vector.broadcast %cst_258 : f32 to vector<8x256xf32>
    %869 = arith.mulf %47, %868 : vector<8x256xf32>
    %870 = arith.addf %867, %869 : vector<8x256xf32>
    %cst_259 = arith.constant 0.190211445 : f32
    %871 = vector.broadcast %cst_259 : f32 to vector<8x256xf32>
    %872 = arith.mulf %50, %871 : vector<8x256xf32>
    %873 = arith.addf %870, %872 : vector<8x256xf32>
    %cst_260 = arith.constant 0.226533219 : f32
    %874 = vector.broadcast %cst_260 : f32 to vector<8x256xf32>
    %875 = arith.mulf %53, %874 : vector<8x256xf32>
    %876 = arith.addf %873, %875 : vector<8x256xf32>
    %cst_261 = arith.constant 0.224275723 : f32
    %877 = vector.broadcast %cst_261 : f32 to vector<8x256xf32>
    %878 = arith.mulf %56, %877 : vector<8x256xf32>
    %879 = arith.addf %876, %878 : vector<8x256xf32>
    %cst_262 = arith.constant 0.057605274 : f32
    %880 = vector.broadcast %cst_262 : f32 to vector<8x256xf32>
    %881 = arith.mulf %59, %880 : vector<8x256xf32>
    %882 = arith.addf %879, %881 : vector<8x256xf32>
    %cst_263 = arith.constant -0.425871491 : f32
    %883 = vector.broadcast %cst_263 : f32 to vector<8x256xf32>
    %884 = arith.mulf %62, %883 : vector<8x256xf32>
    %885 = arith.addf %882, %884 : vector<8x256xf32>
    %cst_264 = arith.constant 0.0564873479 : f32
    %886 = vector.broadcast %cst_264 : f32 to vector<8x256xf32>
    %887 = arith.mulf %65, %886 : vector<8x256xf32>
    %888 = arith.addf %885, %887 : vector<8x256xf32>
    %cst_265 = arith.constant 0.0761471167 : f32
    %889 = vector.broadcast %cst_265 : f32 to vector<8x256xf32>
    %890 = arith.mulf %68, %889 : vector<8x256xf32>
    %891 = arith.addf %888, %890 : vector<8x256xf32>
    %cst_266 = arith.constant 0.138927817 : f32
    %892 = vector.broadcast %cst_266 : f32 to vector<8x256xf32>
    %893 = arith.mulf %71, %892 : vector<8x256xf32>
    %894 = arith.addf %891, %893 : vector<8x256xf32>
    %895 = arith.mulf %894, %894 : vector<8x256xf32>
    %896 = arith.subf %844, %895 : vector<8x256xf32>
    %897 = arith.subf %845, %895 : vector<8x256xf32>
    %898 = arith.subf %846, %895 : vector<8x256xf32>
    %899 = arith.subf %847, %895 : vector<8x256xf32>
    %c0_267 = arith.constant 0 : index
    %c0_268 = arith.constant 0 : index
    %c0_269 = arith.constant 0 : index
    %900 = vector.load %arg2[%c0_267, %c0_268, %c0_269] : memref<4x256x64xf32, #tpu.memory_space<vmem>>, vector<1x256x64xf32>
    %901 = vector.shape_cast %900 : vector<1x256x64xf32> to vector<256x64xf32>
    %cst_270 = arith.constant dense<0.000000e+00> : vector<8x64xf32>
    %902 = tpu.matmul %896, %901, %cst_270 {dimension_numbers = #tpu.dot_dimension_numbers<[1], [0], [0], [1], [0, 0, 1, 1], [], []>} : vector<8x256xf32>, vector<256x64xf32>, vector<8x64xf32> -> vector<8x64xf32>
    %c1_271 = arith.constant 1 : index
    %c0_272 = arith.constant 0 : index
    %c0_273 = arith.constant 0 : index
    %903 = vector.load %arg2[%c1_271, %c0_272, %c0_273] : memref<4x256x64xf32, #tpu.memory_space<vmem>>, vector<1x256x64xf32>
    %904 = vector.shape_cast %903 : vector<1x256x64xf32> to vector<256x64xf32>
    %cst_274 = arith.constant dense<0.000000e+00> : vector<8x64xf32>
    %905 = tpu.matmul %897, %904, %cst_274 {dimension_numbers = #tpu.dot_dimension_numbers<[1], [0], [0], [1], [0, 0, 1, 1], [], []>} : vector<8x256xf32>, vector<256x64xf32>, vector<8x64xf32> -> vector<8x64xf32>
    %906 = arith.addf %902, %905 : vector<8x64xf32>
    %c2_275 = arith.constant 2 : index
    %c0_276 = arith.constant 0 : index
    %c0_277 = arith.constant 0 : index
    %907 = vector.load %arg2[%c2_275, %c0_276, %c0_277] : memref<4x256x64xf32, #tpu.memory_space<vmem>>, vector<1x256x64xf32>
    %908 = vector.shape_cast %907 : vector<1x256x64xf32> to vector<256x64xf32>
    %cst_278 = arith.constant dense<0.000000e+00> : vector<8x64xf32>
    %909 = tpu.matmul %898, %908, %cst_278 {dimension_numbers = #tpu.dot_dimension_numbers<[1], [0], [0], [1], [0, 0, 1, 1], [], []>} : vector<8x256xf32>, vector<256x64xf32>, vector<8x64xf32> -> vector<8x64xf32>
    %910 = arith.addf %906, %909 : vector<8x64xf32>
    %c3_279 = arith.constant 3 : index
    %c0_280 = arith.constant 0 : index
    %c0_281 = arith.constant 0 : index
    %911 = vector.load %arg2[%c3_279, %c0_280, %c0_281] : memref<4x256x64xf32, #tpu.memory_space<vmem>>, vector<1x256x64xf32>
    %912 = vector.shape_cast %911 : vector<1x256x64xf32> to vector<256x64xf32>
    %cst_282 = arith.constant dense<0.000000e+00> : vector<8x64xf32>
    %913 = tpu.matmul %899, %912, %cst_282 {dimension_numbers = #tpu.dot_dimension_numbers<[1], [0], [0], [1], [0, 0, 1, 1], [], []>} : vector<8x256xf32>, vector<256x64xf32>, vector<8x64xf32> -> vector<8x64xf32>
    %914 = arith.addf %910, %913 : vector<8x64xf32>
    %c0_283 = arith.constant 0 : index
    %c0_284 = arith.constant 0 : index
    %915 = vector.load %arg3[%c0_283, %c0_284] : memref<1x64xf32, #tpu.memory_space<vmem>>, vector<1x64xf32>
    %916 = vector.broadcast %915 : vector<1x64xf32> to vector<8x64xf32>
    %917 = arith.addf %914, %916 : vector<8x64xf32>
    %cst_285 = arith.constant 0.000000e+00 : f32
    %918 = vector.broadcast %cst_285 : f32 to vector<8x64xf32>
    %919 = arith.maximumf %917, %918 : vector<8x64xf32>
    %c0_286 = arith.constant 0 : index
    %c0_287 = arith.constant 0 : index
    %920 = vector.load %arg4[%c0_286, %c0_287] : memref<64x32xf32, #tpu.memory_space<vmem>>, vector<64x32xf32>
    %cst_288 = arith.constant dense<0.000000e+00> : vector<8x32xf32>
    %921 = tpu.matmul %919, %920, %cst_288 {dimension_numbers = #tpu.dot_dimension_numbers<[1], [0], [0], [1], [0, 0, 1, 1], [], []>} : vector<8x64xf32>, vector<64x32xf32>, vector<8x32xf32> -> vector<8x32xf32>
    %c0_289 = arith.constant 0 : index
    %c0_290 = arith.constant 0 : index
    %922 = vector.load %arg5[%c0_289, %c0_290] : memref<1x32xf32, #tpu.memory_space<vmem>>, vector<1x32xf32>
    %923 = vector.broadcast %922 : vector<1x32xf32> to vector<8x32xf32>
    %924 = arith.addf %921, %923 : vector<8x32xf32>
    %cst_291 = arith.constant 0.000000e+00 : f32
    %925 = vector.broadcast %cst_291 : f32 to vector<8x32xf32>
    %926 = arith.maximumf %924, %925 : vector<8x32xf32>
    %c0_292 = arith.constant 0 : index
    %c0_293 = arith.constant 0 : index
    %927 = vector.load %arg6[%c0_292, %c0_293] : memref<32x16xf32, #tpu.memory_space<vmem>>, vector<32x16xf32>
    %cst_294 = arith.constant dense<0.000000e+00> : vector<8x16xf32>
    %928 = tpu.matmul %926, %927, %cst_294 {dimension_numbers = #tpu.dot_dimension_numbers<[1], [0], [0], [1], [0, 0, 1, 1], [], []>} : vector<8x32xf32>, vector<32x16xf32>, vector<8x16xf32> -> vector<8x16xf32>
    %c0_295 = arith.constant 0 : index
    %c0_296 = arith.constant 0 : index
    %929 = vector.load %arg7[%c0_295, %c0_296] : memref<1x16xf32, #tpu.memory_space<vmem>>, vector<1x16xf32>
    %930 = vector.broadcast %929 : vector<1x16xf32> to vector<8x16xf32>
    %931 = arith.addf %928, %930 : vector<8x16xf32>
    %cst_297 = arith.constant 0.000000e+00 : f32
    %932 = vector.broadcast %cst_297 : f32 to vector<8x16xf32>
    %933 = arith.maximumf %931, %932 : vector<8x16xf32>
    %c0_298 = arith.constant 0 : index
    %c0_299 = arith.constant 0 : index
    %934 = vector.load %arg8[%c0_298, %c0_299] : memref<16x128xf32, #tpu.memory_space<vmem>>, vector<16x128xf32>
    %cst_300 = arith.constant dense<0.000000e+00> : vector<8x128xf32>
    %935 = tpu.matmul %933, %934, %cst_300 {dimension_numbers = #tpu.dot_dimension_numbers<[1], [0], [0], [1], [0, 0, 1, 1], [], []>} : vector<8x16xf32>, vector<16x128xf32>, vector<8x128xf32> -> vector<8x128xf32>
    %c0_301 = arith.constant 0 : index
    %c0_302 = arith.constant 0 : index
    %936 = vector.load %arg9[%c0_301, %c0_302] : memref<1x128xf32, #tpu.memory_space<vmem>>, vector<1x128xf32>
    %937 = vector.broadcast %936 : vector<1x128xf32> to vector<8x128xf32>
    %938 = arith.addf %935, %937 : vector<8x128xf32>
    %cst_303 = arith.constant 0.000000e+00 : f32
    %939 = vector.broadcast %cst_303 : f32 to vector<8x128xf32>
    %940 = arith.maximumf %938, %939 : vector<8x128xf32>
    %c0_304 = arith.constant 0 : index
    %c0_305 = arith.constant 0 : index
    %941 = vector.load %arg10[%c0_304, %c0_305] : memref<8x128xf32, #tpu.memory_space<vmem>>, vector<8x128xf32>
    tpu.vector_store %arg10[%c0_304, %c0_305], %940 {strides = array<i32>} : memref<8x128xf32, #tpu.memory_space<vmem>>, vector<8x128xf32>,
    return
  }
  func.func @transform_0(%arg0: i32) -> (i32, i32, i32) {
    %c0_i32 = arith.constant 0 : i32
    %c0_i32_0 = arith.constant 0 : i32
    %c0_i32_1 = arith.constant 0 : i32
    return %c0_i32, %arg0, %c0_i32_0 : i32, i32, i32
  }
  func.func @transform_1(%arg0: i32) -> (i32, i32, i32) {
    %c0_i32 = arith.constant 0 : i32
    %c0_i32_0 = arith.constant 0 : i32
    %c0_i32_1 = arith.constant 0 : i32
    %c0_i32_2 = arith.constant 0 : i32
    return %c0_i32, %c0_i32_0, %c0_i32_1 : i32, i32, i32
  }
  func.func @transform_2(%arg0: i32) -> (i32, i32) {
    %c0_i32 = arith.constant 0 : i32
    %c0_i32_0 = arith.constant 0 : i32
    %c0_i32_1 = arith.constant 0 : i32
    return %c0_i32, %c0_i32_0 : i32, i32
  }
  func.func @transform_3(%arg0: i32) -> (i32, i32) {
    %c0_i32 = arith.constant 0 : i32
    %c0_i32_0 = arith.constant 0 : i32
    %c0_i32_1 = arith.constant 0 : i32
    return %c0_i32, %c0_i32_0 : i32, i32
  }
  func.func @transform_4(%arg0: i32) -> (i32, i32) {
    %c0_i32 = arith.constant 0 : i32
    %c0_i32_0 = arith.constant 0 : i32
    %c0_i32_1 = arith.constant 0 : i32
    return %c0_i32, %c0_i32_0 : i32, i32
  }
  func.func @transform_5(%arg0: i32) -> (i32, i32) {
    %c0_i32 = arith.constant 0 : i32
    %c0_i32_0 = arith.constant 0 : i32
    %c0_i32_1 = arith.constant 0 : i32
    return %c0_i32, %c0_i32_0 : i32, i32
  }
  func.func @transform_6(%arg0: i32) -> (i32, i32) {
    %c0_i32 = arith.constant 0 : i32
    %c0_i32_0 = arith.constant 0 : i32
    %c0_i32_1 = arith.constant 0 : i32
    return %c0_i32, %c0_i32_0 : i32, i32
  }
  func.func @transform_7(%arg0: i32) -> (i32, i32) {
    %c0_i32 = arith.constant 0 : i32
    %c0_i32_0 = arith.constant 0 : i32
    %c0_i32_1 = arith.constant 0 : i32
    return %c0_i32, %c0_i32_0 : i32, i32
  }
  func.func @transform_8(%arg0: i32) -> (i32, i32) {
    %c0_i32 = arith.constant 0 : i32
    %c0_i32_0 = arith.constant 0 : i32
    %c0_i32_1 = arith.constant 0 : i32
    return %c0_i32, %c0_i32_0 : i32, i32
  }
  func.func @transform_9(%arg0: i32) -> (i32, i32) {
    %c0_i32 = arith.constant 0 : i32
    %c0_i32_0 = arith.constant 0 : i32
    return %arg0, %c0_i32 : i32, i32
  }
}

</mosaic_0001>

<bundles_post_ra>
// kernel: net_forward.1
= control target key start
LH: loop header
LB: loop body
LE: loop exit
PB: predicated region body
PF: predicated region fallthrough
CT: control target
= control target key end

     0   :  { %s6368_s1 = inlined_call_operand.vmem [shape: f32[4,256,64], index: 1, kind: input, shape index: {}]   ;;  %s6369_s0 = inlined_call_operand.vmem [shape: f32[4,8,256], index: 0, kind: input, shape index: {}]   ;;  %s6370_s3 = inlined_call_operand.vmem [shape: f32[64,32], index: 3, kind: input, shape index: {}]   ;;  %s6371_s5 = inlined_call_operand.vmem [shape: f32[32,16], index: 5, kind: input, shape index: {}]   ;;  %s6372_s2 = inlined_call_operand.vmem [shape: f32[1,64], index: 2, kind: input, shape index: {}]   ;;  %s6373_s4 = inlined_call_operand.vmem [shape: f32[1,32], index: 4, kind: input, shape index: {}]   ;;  %s6374_s7 = inlined_call_operand.vmem [shape: f32[16,128], index: 7, kind: input, shape index: {}]   ;;  %s6375_s6 = inlined_call_operand.vmem [shape: f32[1,16], index: 6, kind: input, shape index: {}]   ;;  %s6376_s8 = inlined_call_operand.vmem [shape: f32[1,128], index: 8, kind: input, shape index: {}]   ;;  %s6377_s9 = inlined_call_operand.vmem [shape: f32[8,128], index: 9, kind: output, shape index: {}]  }
   0x1   :  { %v3672_v0 = vld [vmem:[%s6368_s1 + $0x180] sm:$0xff]  ;;  %v3673_v1 = vld [vmem:[%s6368_s1 + $0x188] sm:$0xff]  ;;  %v3674_v11 = vld [vmem:[%s6368_s1 + $0x190] sm:$0xff] }
   0x2   :  { %v3656_v2 = vld [vmem:[%s6368_s1 + $0x100] sm:$0xff]  ;;  %v3953_v3 = vpack.c.bf16 %v3673_v1, %v3672_v0  ;;  %v3657_v4 = vld [vmem:[%s6368_s1 + $0x108] sm:$0xff]  ;;  %v3675_v13 = vld [vmem:[%s6368_s1 + $0x198] sm:$0xff] }
   0x3   :  { %v2915_v5 = vld [vmem:[%s6368_s1 + $0x80] sm:$0xff]  ;;  %v2916_v6 = vld [vmem:[%s6368_s1 + $0x88] sm:$0xff]  ;;  %v3955_v7 = vpack.c.bf16 %v3657_v4, %v3656_v2  ;;  %v3658_v14 = vld [vmem:[%s6368_s1 + $0x110] sm:$0xff]  ;;  %v3957_v16 = vpack.c.bf16 %v3675_v13, %v3674_v11 }
   0x4   :  { %v3985_v8 = vpack.c.bf16 %v2916_v6, %v2915_v5  ;;  %v2899_v9 = vld [vmem:[%s6368_s1] sm:$0xff]  ;;  %v2900_v10 = vld [vmem:[%s6368_s1 + $0x8] sm:$0xff]  ;;  %3954 = vmatprep.subr.bf16.mxu0 %v3953_v3  ;;  %v3659_v15 = vld [vmem:[%s6368_s1 + $0x118] sm:$0xff] }
   0x5   :  { %v3987_v12 = vpack.c.bf16 %v2900_v10, %v2899_v9  ;;  %3956 = vmatpush3.bf16.msra.mxu0 %v3955_v7  ;;  %v3959_v17 = vpack.c.bf16 %v3659_v15, %v3658_v14  ;;  %v2917_v18 = vld [vmem:[%s6368_s1 + $0x90] sm:$0xff]  ;;  %v2918_v19 = vld [vmem:[%s6368_s1 + $0x98] sm:$0xff]  ;;  %v3676_v23 = vld [vmem:[%s6368_s1 + $0x1a0] sm:$0xff] }
   0x6   :  { %3986 = vmatprep.subr.bf16.mxu1 %v3985_v8  ;;  %v2901_v20 = vld [vmem:[%s6368_s1 + $0x10] sm:$0xff]  ;;  %v3989_v21 = vpack.c.bf16 %v2918_v19, %v2917_v18  ;;  %v2902_v22 = vld [vmem:[%s6368_s1 + $0x18] sm:$0xff]  ;;  %v3677_v24 = vld [vmem:[%s6368_s1 + $0x1a8] sm:$0xff]  ;;  %3958 = vmatprep.subr.bf16.mxu0 %v3957_v16 }
   0x7   :  { %3988 = vmatpush3.bf16.msra.mxu1 %v3987_v12  ;;  %v3991_v25 = vpack.c.bf16 %v2902_v22, %v2901_v20  ;;  %v3961_v26 = vpack.c.bf16 %v3677_v24, %v3676_v23  ;;  %v3660_v27 = vld [vmem:[%s6368_s1 + $0x120] sm:$0xff]  ;;  %v3661_v28 = vld [vmem:[%s6368_s1 + $0x128] sm:$0xff]  ;;  %v3678_v35 = vld [vmem:[%s6368_s1 + $0x1b0] sm:$0xff] }
   0x8   :  { %v2919_v29 = vld [vmem:[%s6368_s1 + $0xa0] sm:$0xff]  ;;  %3990 = vmatprep.subr.bf16.mxu1 %v3989_v21  ;;  %v2920_v30 = vld [vmem:[%s6368_s1 + $0xa8] sm:$0xff]  ;;  %v3963_v33 = vpack.c.bf16 %v3661_v28, %v3660_v27  ;;  %v3679_v36 = vld [vmem:[%s6368_s1 + $0x1b8] sm:$0xff] }
   0x9   :  { %v2903_v31 = vld [vmem:[%s6368_s1 + $0x20] sm:$0xff]  ;;  %v2904_v32 = vld [vmem:[%s6368_s1 + $0x28] sm:$0xff]  ;;  %3960 = vmatpush3.bf16.msra.mxu0 %v3959_v17  ;;  %v3993_v34 = vpack.c.bf16 %v2920_v30, %v2919_v29  ;;  %v3662_v37 = vld [vmem:[%s6368_s1 + $0x130] sm:$0xff]  ;;  %v3965_v39 = vpack.c.bf16 %v3679_v36, %v3678_v35 }
   0xa   :  { %3962 = vmatprep.subr.bf16.mxu0 %v3961_v26  ;;  %v3995_v38 = vpack.c.bf16 %v2904_v32, %v2903_v31  ;;  %v3663_v40 = vld [vmem:[%s6368_s1 + $0x138] sm:$0xff]  ;;  %v2921_v41 = vld [vmem:[%s6368_s1 + $0xb0] sm:$0xff]  ;;  %v3680_v46 = vld [vmem:[%s6368_s1 + $0x1c0] sm:$0xff] }
   0xb   :  { %3992 = vmatpush3.bf16.msra.mxu1 %v3991_v25  ;;  %v2922_v42 = vld [vmem:[%s6368_s1 + $0xb8] sm:$0xff]  ;;  %v2905_v44 = vld [vmem:[%s6368_s1 + $0x30] sm:$0xff]  ;;  %v3681_v47 = vld [vmem:[%s6368_s1 + $0x1c8] sm:$0xff]  ;;  %v3967_v48 = vpack.c.bf16 %v3663_v40, %v3662_v37 }
   0xc   :  { %3994 = vmatprep.subr.bf16.mxu1 %v3993_v34  ;;  %v3997_v43 = vpack.c.bf16 %v2922_v42, %v2921_v41  ;;  %v2906_v45 = vld [vmem:[%s6368_s1 + $0x38] sm:$0xff]  ;;  %v2923_v49 = vld [vmem:[%s6368_s1 + $0xc0] sm:$0xff]  ;;  %v2924_v50 = vld [vmem:[%s6368_s1 + $0xc8] sm:$0xff]  ;;  %v3969_v52 = vpack.c.bf16 %v3681_v47, %v3680_v46 }
   0xd   :  { %3964 = vmatpush3.bf16.msra.mxu0 %v3963_v33  ;;  %v3999_v51 = vpack.c.bf16 %v2906_v45, %v2905_v44  ;;  %v3664_v53 = vld [vmem:[%s6368_s1 + $0x140] sm:$0xff]  ;;  %v3665_v54 = vld [vmem:[%s6368_s1 + $0x148] sm:$0xff]  ;;  %v4001_v56 = vpack.c.bf16 %v2924_v50, %v2923_v49  ;;  %v3682_v58 = vld [vmem:[%s6368_s1 + $0x1d0] sm:$0xff] }
   0xe   :  { %3966 = vmatprep.subr.bf16.mxu0 %v3965_v39  ;;  %v2907_v55 = vld [vmem:[%s6368_s1 + $0x40] sm:$0xff]  ;;  %v2908_v57 = vld [vmem:[%s6368_s1 + $0x48] sm:$0xff]  ;;  %v3683_v59 = vld [vmem:[%s6368_s1 + $0x1d8] sm:$0xff]  ;;  %v3971_v62 = vpack.c.bf16 %v3665_v54, %v3664_v53 }
   0xf   :  { %3996 = vmatpush3.bf16.msra.mxu1 %v3995_v38  ;;  %v2925_v60 = vld [vmem:[%s6368_s1 + $0xd0] sm:$0xff]  ;;  %v2926_v61 = vld [vmem:[%s6368_s1 + $0xd8] sm:$0xff]  ;;  %v4003_v63 = vpack.c.bf16 %v2908_v57, %v2907_v55  ;;  %v3973_v0 = vpack.c.bf16 %v3683_v59, %v3682_v58  ;;  %v3684_v6 = vld [vmem:[%s6368_s1 + $0x1e0] sm:$0xff] }
  0x10   :  { %3998 = vmatprep.subr.bf16.mxu1 %v3997_v43  ;;  %v3666_v1 = vld [vmem:[%s6368_s1 + $0x150] sm:$0xff]  ;;  %v3667_v2 = vld [vmem:[%s6368_s1 + $0x158] sm:$0xff]  ;;  %v4005_v4 = vpack.c.bf16 %v2926_v61, %v2925_v60  ;;  %v3685_v7 = vld [vmem:[%s6368_s1 + $0x1e8] sm:$0xff] }
  0x11   :  { %3968 = vmatpush3.bf16.msra.mxu0 %v3967_v48  ;;  %v2909_v3 = vld [vmem:[%s6368_s1 + $0x50] sm:$0xff]  ;;  %v2910_v5 = vld [vmem:[%s6368_s1 + $0x58] sm:$0xff]  ;;  %v2927_v8 = vld [vmem:[%s6368_s1 + $0xe0] sm:$0xff]  ;;  %v3975_v10 = vpack.c.bf16 %v3667_v2, %v3666_v1  ;;  %v3977_v15 = vpack.c.bf16 %v3685_v7, %v3684_v6  ;;  %v6388_v2 = vmov 2475754826  }
  0x12   :  { %3970 = vmatprep.subr.bf16.mxu0 %v3969_v52  ;;  %v2928_v9 = vld [vmem:[%s6368_s1 + $0xe8] sm:$0xff]  ;;  %v3668_v11 = vld [vmem:[%s6368_s1 + $0x160] sm:$0xff]  ;;  %v4007_v14 = vpack.c.bf16 %v2910_v5, %v2909_v3  ;;  %v3603_v18 = vld [vmem:[%s6369_s0 + $0x18] sm:$0xff]  ;;  %v6384_v6 = vmov 2102212464  }
  0x13   :  { %4000 = vmatpush3.bf16.msra.mxu1 %v3999_v51  ;;  %v3669_v12 = vld [vmem:[%s6368_s1 + $0x168] sm:$0xff]  ;;  %v2911_v13 = vld [vmem:[%s6368_s1 + $0x60] sm:$0xff]  ;;  %v4009_v19 = vpack.c.bf16 %v2928_v9, %v2927_v8  ;;  %v3686_v20 = vld [vmem:[%s6368_s1 + $0x1f0] sm:$0xff]  ;;  %v4416_v23 = vmul.f32 0.5, %v3603_v18  ;;  %v6382_v8 = vmov 920167782  }
  0x14   :  { %4002 = vmatprep.subr.bf16.mxu1 %v4001_v56  ;;  %v2912_v16 = vld [vmem:[%s6368_s1 + $0x68] sm:$0xff]  ;;  %v3687_v21 = vld [vmem:[%s6368_s1 + $0x1f8] sm:$0xff]  ;;  %v2929_v25 = vld [vmem:[%s6368_s1 + $0xf0] sm:$0xff]  ;;  %v3979_v28 = vpack.c.bf16 %v3669_v12, %v3668_v11 }
  0x15   :  { %3972 = vmatpush3.bf16.msra.mxu0 %v3971_v62  ;;  %v33_v17 = vld [vmem:[%s6369_s0 + $0x8] sm:$0xff]  ;;  %v2930_v26 = vld [vmem:[%s6368_s1 + $0xf8] sm:$0xff]  ;;  %v4011_v31 = vpack.c.bf16 %v2912_v16, %v2911_v13  ;;  %v3981_v32 = vpack.c.bf16 %v3687_v21, %v3686_v20  ;;  %v3670_v33 = vld [vmem:[%s6368_s1 + $0x170] sm:$0xff]  ;;  %v558_v35 = vand.u32 2147483647, %v4416_v23  ;;  %v561_v36 = vand.u32 2139095040, %v4416_v23 }
  0x16   :  { %3974 = vmatprep.subr.bf16.mxu0 %v3973_v0  ;;  %v4414_v22 = vmul.f32 0.5, %v33_v17  ;;  %v3621_v24 = vld [vmem:[%s6369_s0 + $0x28] sm:$0xff]  ;;  %v3671_v34 = vld [vmem:[%s6368_s1 + $0x178] sm:$0xff]  ;;  %v4013_v37 = vpack.c.bf16 %v2930_v26, %v2929_v25  ;;  %v2913_v38 = vld [vmem:[%s6368_s1 + $0x70] sm:$0xff]  ;;  %v6390_v0 = vmov 683565275  }
  0x17   :  { %4004 = vmatpush3.bf16.msra.mxu1 %v4003_v63  ;;  %v4427_v27 = vmul.f32 0.5, %v3621_v24  ;;  %v2914_v39 = vld [vmem:[%s6368_s1 + $0x78] sm:$0xff]  ;;  %v562_v42 = vshrl.u32 %v561_v36, 23  ;;  %v565_v43 = vand.u32 8388607, %v558_v35  ;;  %v3983_v45 = vpack.c.bf16 %v3671_v34, %v3670_v33 }
  0x18   :  { %4006 = vmatprep.subr.bf16.mxu1 %v4005_v4  ;;  %v139_v29 = vand.u32 2147483647, %v4414_v22  ;;  %v142_v30 = vand.u32 2139095040, %v4414_v22  ;;  %v4015_v47 = vpack.c.bf16 %v2914_v39, %v2913_v38  ;;  %v6386_v4 = vmov 2131351028  }
  0x19   :  { %3976 = vmatpush3.bf16.msra.mxu0 %v3975_v10  ;;  %v980_v44 = vand.u32 2139095040, %v4427_v27  ;;  %v3608_v48 = vadd.s32 4294967169, %v562_v42  ;;  %v566_v52 = vor.u32 8388608, %v565_v43  ;;  %v6380_v16 = vmov 1326507024  }
  0x1a   :  { %3978 = vmatprep.subr.bf16.mxu0 %v3977_v15  ;;  %v143_v40 = vshrl.u32 %v142_v30, 23  ;;  %v146_v41 = vand.u32 8388607, %v139_v29 }
  0x1b   :  { %4008 = vmatpush3.bf16.msra.mxu1 %v4007_v14  ;;  %v981_v49 = vshrl.u32 %v980_v44, 23  ;;  %v568_v53 = vadd.s32 1, %v3608_v48  ;;  %v4452_v61 = vshll.u32 %v566_v52, 8 }
  0x1c   :  { %4010 = vmatprep.subr.bf16.mxu1 %v4009_v19  ;;  %v3590_v46 = vadd.s32 4294967169, %v143_v40  ;;  %v147_v51 = vor.u32 8388608, %v146_v41 }
  0x1d   :  { %3980 = vmatpush3.bf16.msra.mxu0 %v3979_v28  ;;  %v3626_v54 = vadd.s32 4294967169, %v981_v49  ;;  %vm569_vm1 = vcmp.gt.s32.totalorder %v568_v53, 0 }
  0x1e   :  { %3982 = vmatprep.subr.bf16.mxu0 %v3981_v32  ;;  %v149_v50 = vadd.s32 1, %v3590_v46  ;;  %v570_v58 = vsel %vm569_vm1, %v568_v53, 0  ;;  %v4450_v59 = vshll.u32 %v147_v51, 8 }
  0x1f   :  { %4012 = vmatpush3.bf16.msra.mxu1 %v4011_v31  ;;  %v572_v60 = vand.u32 31, %v570_v58  ;;  %v4454_v62 = vadd.s32 1, %v3626_v54  ;;  %v4461_v10 = vshrl.u32 %v570_v58, 5 }
  0x20   :  { %4014 = vmatprep.subr.bf16.mxu1 %v4013_v37  ;;  %vm150_vm0 = vcmp.gt.s32.totalorder %v149_v50, 0 }
  0x21   :  { %3984 = vmatpush3.bf16.msra.mxu0 %v3983_v45  ;;  %v151_v55 = vsel %vm150_vm0, %v149_v50, 0  ;;  %v573_v21 = vsub.s32 32, %v572_v60  ;;  %v575_v26 = vshll.u32 %v6390_v0, %v572_v60  ;;  %v578_v37 = vshll.u32 %v6388_v2, %v572_v60 }
  0x22   :  { %v152_v56 = vshrl.u32 %v151_v55, 5  ;;  %v153_v57 = vand.u32 31, %v151_v55  ;;  %vm988_vm6 = vcmp.gt.s32.totalorder %v4454_v62, 0  ;;  %v581_v52 = vshll.u32 %v6386_v4, %v572_v60 }
  0x23   :  { %4016 = vmatpush3.bf16.msra.mxu1 %v4015_v47  ;;  %v574_v40 = vshrl.u32 %v6390_v0, %v573_v21  ;;  %v576_v41 = vshrl.u32 %v6388_v2, %v573_v21  ;;  %v579_v45 = vshrl.u32 %v6386_v4, %v573_v21  ;;  %v582_v53 = vshrl.u32 %v6384_v6, %v573_v21 }
  0x24   :  { %v154_v63 = vsub.s32 32, %v153_v57  ;;  %v156_v1 = vshll.u32 %v6390_v0, %v153_v57  ;;  %v159_v3 = vshll.u32 %v6388_v2, %v153_v57  ;;  %v162_v5 = vshll.u32 %v6386_v4, %v153_v57 }
  0x25   :  { %v165_v7 = vshll.u32 %v6384_v6, %v153_v57  ;;  %v168_v9 = vshll.u32 %v6382_v8, %v153_v57  ;;  %vm171_vm2 = vcmp.lt.s32.totalorder %v152_v56, 1  ;;  %vm172_vm3 = vcmp.lt.s32.totalorder %v152_v56, 2 }
  0x26   :  { %v155_v11 = vshrl.u32 %v6390_v0, %v154_v63  ;;  %v157_v12 = vshrl.u32 %v6388_v2, %v154_v63  ;;  %v160_v13 = vshrl.u32 %v6386_v4, %v154_v63  ;;  %v163_v14 = vshrl.u32 %v6384_v6, %v154_v63 }
  0x27   :  { %v166_v15 = vshrl.u32 %v6382_v8, %v154_v63  ;;  %v169_v17 = vshrl.u32 %v6380_v16, %v154_v63  ;;  %vm174_vm4 = vcmp.lt.s32.totalorder %v152_v56, 4  ;;  %vm173_vm5 = vcmp.lt.s32.totalorder %v152_v56, 3 }
  0x28   :  { %v158_v18 = vor.u32 %v157_v12, %v156_v1  ;;  %v161_v19 = vor.u32 %v160_v13, %v159_v3  ;;  %v164_v20 = vor.u32 %v163_v14, %v162_v5  ;;  %v577_v50 = vor.u32 %v576_v41, %v575_v26 }
  0x29   :  { %v167_v24 = vor.u32 %v166_v15, %v165_v7  ;;  %v170_v25 = vor.u32 %v169_v17, %v168_v9  ;;  %v580_v51 = vor.u32 %v579_v45, %v578_v37  ;;  %v584_v54 = vshll.u32 %v6384_v6, %v572_v60 }
  0x2a   :  { %v175_v28 = vsel %vm171_vm2, %v155_v11, %v158_v18  ;;  %v176_v30 = vsel %vm174_vm4, %v164_v20, 2102212464  ;;  %v179_v31 = vsel %vm171_vm2, %v158_v18, %v161_v19  ;;  %v183_v32 = vsel %vm171_vm2, %v161_v19, %v164_v20 }
  0x2b   :  { %v177_v33 = vsel %vm173_vm5, %v161_v19, %v176_v30  ;;  %v180_v34 = vsel %vm174_vm4, %v167_v24, 920167782  ;;  %v184_v36 = vsel %vm174_vm4, %v170_v25, 1326507024  ;;  %v585_v55 = vshrl.u32 %v6382_v8, %v573_v21 }
  0x2c   :  { %v181_v38 = vsel %vm173_vm5, %v164_v20, %v180_v34  ;;  %v185_v39 = vsel %vm173_vm5, %v167_v24, %v184_v36  ;;  %v178_v42 = vsel %vm172_vm3, %v175_v28, %v177_v33  ;;  %v587_v56 = vshll.u32 %v6382_v8, %v572_v60 }
  0x2d   :  { %v182_v43 = vsel %vm172_vm3, %v179_v31, %v181_v38  ;;  %v186_v44 = vsel %vm172_vm3, %v183_v32, %v185_v39  ;;  %v588_v57 = vshrl.u32 %v6380_v16, %v573_v21  ;;  %v194_v58 = vmul.u32 %v4450_v59, %v178_v42 }
  0x2e   :  { %v4482_v46 = vmul.u32.u64.low %v4450_v59, %v186_v44  ;;  %v4483_v47 = vmul.u32.u64.high %v4450_v59, %v186_v44, %v4482_v46  ;;  %v4486_v48 = vmul.u32.u64.low %v4450_v59, %v182_v43  ;;  %v4487_v49 = vmul.u32.u64.high %v4450_v59, %v182_v43, %v4486_v48 }
  0x2f   :  { %v583_v63 = vor.u32 %v582_v53, %v581_v52  ;;  %vm590_vm7 = vcmp.lt.s32.totalorder %v4461_v10, 1  ;;  %vm591_vm8 = vcmp.lt.s32.totalorder %v4461_v10, 2  ;;  %v586_v3 = vor.u32 %v585_v55, %v584_v54 }
  0x30   :  { %vm196_vm9 = vc.u32 %v4483_v47, %v4486_v48  ;;  %v197_v1 = vadd.s32 1, %v4487_v49  ;;  %vm592_vm10 = vcmp.lt.s32.totalorder %v4461_v10, 3  ;;  %v589_v5 = vor.u32 %v588_v57, %v587_v56 }
  0x31   :  { %vm593_vm11 = vcmp.lt.s32.totalorder %v4461_v10, 4  ;;  %v594_v60 = vsel %vm590_vm7, %v574_v40, %v577_v50  ;;  %v598_v7 = vsel %vm590_vm7, %v577_v50, %v580_v51  ;;  %v602_v12 = vsel %vm590_vm7, %v580_v51, %v583_v63 }
  0x32   :  { %v198_v59 = vsel %vm196_vm9, %v197_v1, %v4487_v49  ;;  %v595_v9 = vsel %vm593_vm11, %v583_v63, 2102212464  ;;  %v599_v11 = vsel %vm593_vm11, %v586_v3, 920167782  ;;  %v603_v17 = vsel %vm593_vm11, %v589_v5, 1326507024 }
  0x33   :  { %v199_v13 = vadd.s32 %v198_v59, %v194_v58  ;;  %v596_v14 = vsel %vm592_vm10, %v580_v51, %v595_v9  ;;  %v600_v15 = vsel %vm592_vm10, %v583_v63, %v599_v11  ;;  %v604_v20 = vsel %vm592_vm10, %v586_v3, %v603_v17 }
  0x34   :  { %v597_v18 = vsel %vm591_vm8, %v594_v60, %v596_v14  ;;  %v601_v19 = vsel %vm591_vm8, %v598_v7, %v600_v15  ;;  %v989_v21 = vsel %vm988_vm6, %v4454_v62, 0  ;;  %v605_v25 = vsel %vm591_vm8, %v602_v12, %v604_v20  ;;  %v3639_v62 = vld [vmem:[%s6369_s0 + $0x38] sm:$0xff] }
  0x35   :  { %v200_v24 = vadd.s32 536870912, %v199_v13  ;;  %v4515_v26 = vmul.u32.u64.low %v4452_v61, %v601_v19  ;;  %v4516_v28 = vmul.u32.u64.high %v4452_v61, %v601_v19, %v4515_v26  ;;  %v991_v33 = vand.u32 31, %v989_v21 }
  0x36   :  { %v4520_v30 = vmul.u32.u64.low %v4452_v61, %v605_v25  ;;  %v4521_v31 = vmul.u32.u64.high %v4452_v61, %v605_v25, %v4520_v30  ;;  %v613_v34 = vmul.u32 %v4452_v61, %v597_v18  ;;  %v4533_v37 = vmul.f32 0.5, %v3639_v62 }
  0x37   :  { %v4523_v32 = vshrl.u32 %v200_v24, 30  ;;  %v616_v36 = vadd.s32 1, %v4516_v28  ;;  %v992_v39 = vsub.s32 32, %v991_v33  ;;  %v977_v43 = vand.u32 2147483647, %v4427_v27 }
  0x38   :  { %vm615_vm12 = vc.u32 %v4521_v31, %v4515_v26  ;;  %v990_v44 = vshrl.u32 %v989_v21, 5  ;;  %v1399_v61 = vand.u32 2139095040, %v4533_v37  ;;  %v994_v45 = vshll.u32 %v6390_v0, %v991_v33 }
  0x39   :  { %v202_v10 = vshll.u32 %v4523_v32, 30  ;;  %v617_v38 = vsel %vm615_vm12, %v616_v36, %v4516_v28  ;;  %v995_v46 = vshrl.u32 %v6388_v2, %v992_v39  ;;  %v997_v49 = vshll.u32 %v6388_v2, %v991_v33 }
  0x3a   :  { %v618_v40 = vadd.s32 %v617_v38, %v613_v34  ;;  %v998_v50 = vshrl.u32 %v6386_v4, %v992_v39  ;;  %v1000_v52 = vshll.u32 %v6386_v4, %v991_v33  ;;  %v1001_v53 = vshrl.u32 %v6384_v6, %v992_v39 }
  0x3b   :  { %v4536_v41 = vsub.s32 %v199_v13, %v202_v10  ;;  %v1003_v54 = vshll.u32 %v6384_v6, %v991_v33  ;;  %v1004_v56 = vshrl.u32 %v6382_v8, %v992_v39  ;;  %v984_v58 = vand.u32 8388607, %v977_v43 }
  0x3c   :  { %v619_v42 = vadd.s32 536870912, %v618_v40  ;;  %vm1012_vm13 = vcmp.lt.s32.totalorder %v990_v44, 4  ;;  %v1006_v1 = vshll.u32 %v6382_v8, %v991_v33  ;;  %v1007_v3 = vshrl.u32 %v6380_v16, %v992_v39 }
  0x3d   :  { %v205_v55 = vsub.s32 0, %v4536_v41  ;;  %v1005_v63 = vor.u32 %v1004_v56, %v1003_v54  ;;  %v1400_v5 = vshrl.u32 %v1399_v61, 23  ;;  %v996_v7 = vor.u32 %v995_v46, %v994_v45 }
  0x3e   :  { %v4544_v51 = vshrl.u32 %v619_v42, 30  ;;  %v999_v59 = vor.u32 %v998_v50, %v997_v49  ;;  %v1002_v9 = vor.u32 %v1001_v53, %v1000_v52  ;;  %vm1009_vm14 = vcmp.lt.s32.totalorder %v990_v44, 1 }
  0x3f   :  { %v3591_v11 = vmin.u32 %v205_v55, %v4536_v41  ;;  %vm1011_vm15 = vcmp.lt.s32.totalorder %v990_v44, 3  ;;  %v1018_v12 = vsel %vm1012_vm13, %v1005_v63, 920167782  ;;  %v985_v14 = vor.u32 8388608, %v984_v58 }
  0x40   :  { %v621_v57 = vshll.u32 %v4544_v51, 30  ;;  %v993_v15 = vshrl.u32 %v6390_v0, %v992_v39  ;;  %v1008_v17 = vor.u32 %v1007_v3, %v1006_v1  ;;  %v1014_v18 = vsel %vm1012_vm13, %v1002_v9, 2102212464 }
  0x41   :  { %vm1010_vm0 = vcmp.lt.s32.totalorder %v990_v44, 2  ;;  %v1017_v19 = vsel %vm1009_vm14, %v996_v7, %v999_v59  ;;  %v1019_v20 = vsel %vm1011_vm15, %v1002_v9, %v1018_v12  ;;  %v207_v21 = vclz %v3591_v11 }
  0x42   :  { %v4556_v60 = vsub.s32 %v618_v40, %v621_v57  ;;  %v3644_v24 = vadd.s32 4294967169, %v1400_v5  ;;  %v1013_v28 = vsel %vm1009_vm14, %v993_v15, %v996_v7  ;;  %v1015_v30 = vsel %vm1011_vm15, %v999_v59, %v1014_v18 }
  0x43   :  { %v1025_v33 = vshll.u32 %v985_v14, 8  ;;  %v1020_v62 = vsel %vm1010_vm0, %v1017_v19, %v1019_v20  ;;  %v1021_v34 = vsel %vm1009_vm14, %v999_v59, %v1002_v9  ;;  %v1022_v10 = vsel %vm1012_vm13, %v1008_v17, 1326507024 }
  0x44   :  { %v624_v13 = vsub.s32 0, %v4556_v60  ;;  %v3592_v36 = vadd.s32 4294967294, %v207_v21  ;;  %v1016_v38 = vsel %vm1010_vm0, %v1013_v28, %v1015_v30  ;;  %v1023_v39 = vsel %vm1011_vm15, %v1005_v63, %v1022_v10 }
  0x45   :  { %v1406_v40 = vadd.s32 1, %v3644_v24  ;;  %v1024_v61 = vsel %vm1010_vm0, %v1021_v34, %v1023_v39  ;;  %v4574_v45 = vmul.u32.u64.low %v1025_v33, %v1020_v62  ;;  %v4575_v46 = vmul.u32.u64.high %v1025_v33, %v1020_v62, %v4574_v45 }
  0x46   :  { %v3609_v25 = vmin.u32 %v624_v13, %v4556_v60  ;;  %v4578_v49 = vmul.u32.u64.low %v1025_v33, %v1024_v61  ;;  %v4579_v50 = vmul.u32.u64.high %v1025_v33, %v1024_v61, %v4578_v49  ;;  %v1032_v52 = vmul.u32 %v1025_v33, %v1016_v38 }
  0x47   :  { %vm1407_vm1 = vcmp.gt.s32.totalorder %v1406_v40, 0  ;;  %vm3593_vm2 = vcmp.lt.s32.totalorder %v3592_v36, 0  ;;  %v1035_v55 = vadd.s32 1, %v4575_v46  ;;  %v1396_v57 = vand.u32 2147483647, %v4533_v37 }
  0x48   :  { %v626_v42 = vclz %v3609_v25  ;;  %v1408_v53 = vsel %vm1407_vm1, %v1406_v40, 0  ;;  %vm1034_vm3 = vc.u32 %v4579_v50, %v4574_v45  ;;  %v210_v58 = vsel %vm3593_vm2, 0, %v3592_v36 }
  0x49   :  { %v1410_v56 = vand.u32 31, %v1408_v53  ;;  %v1036_v44 = vsel %vm1034_vm3, %v1035_v55, %v4575_v46  ;;  %v195_v5 = vadd.s32 %v4486_v48, %v4483_v47  ;;  %v211_v7 = vsub.s32 32, %v210_v58 }
  0x4a   :  { %v3610_v54 = vadd.s32 4294967294, %v626_v42  ;;  %v1037_v63 = vadd.s32 %v1036_v44, %v1032_v52  ;;  %v215_v59 = vsub.s32 4294967266, %v210_v58  ;;  %v1403_v9 = vand.u32 8388607, %v1396_v57 }
  0x4b   :  { %v1411_v1 = vsub.s32 32, %v1410_v56  ;;  %v4592_v13 = vshrl.u32 %v1408_v53, 5  ;;  %v1422_v14 = vshll.u32 %v6384_v6, %v1410_v56  ;;  %v1413_v15 = vshll.u32 %v6390_v0, %v1410_v56 }
  0x4c   :  { %vm3611_vm4 = vcmp.lt.s32.totalorder %v3610_v54, 0  ;;  %v1038_v3 = vadd.s32 536870912, %v1037_v63  ;;  %v1416_v18 = vshll.u32 %v6388_v2, %v1410_v56  ;;  %v1419_v20 = vshll.u32 %v6386_v4, %v1410_v56 }
  0x4d   :  { %v629_v11 = vsel %vm3611_vm4, 0, %v3610_v54  ;;  %v1414_v17 = vshrl.u32 %v6388_v2, %v1411_v1  ;;  %v1423_v47 = vshrl.u32 %v6382_v8, %v1411_v1  ;;  %v1417_v19 = vshrl.u32 %v6386_v4, %v1411_v1 }
  0x4e   :  { %v4590_v12 = vshrl.u32 %v1038_v3, 30  ;;  %v1420_v21 = vshrl.u32 %v6384_v6, %v1411_v1  ;;  %v216_v24 = vadd.s32 127, %v215_v59  ;;  %v634_v28 = vsub.s32 4294967266, %v629_v11 }
  0x4f   :  { %v1424_v25 = vor.u32 %v1423_v47, %v1422_v14  ;;  %v1404_v33 = vor.u32 8388608, %v1403_v9  ;;  %vm1431_vm5 = vcmp.lt.s32.totalorder %v4592_v13, 4  ;;  %v212_v62 = vshll.u32 %v4536_v41, %v210_v58 }
  0x50   :  { %v1040_v48 = vshll.u32 %v4590_v12, 30  ;;  %v213_v34 = vshrl.u32 %v195_v5, %v211_v7  ;;  %v1425_v10 = vshll.u32 %v6382_v8, %v1410_v56  ;;  %v1426_v36 = vshrl.u32 %v6380_v16, %v1411_v1 }
  0x51   :  { %v1415_v39 = vor.u32 %v1414_v17, %v1413_v15  ;;  %v1418_v40 = vor.u32 %v1417_v19, %v1416_v18  ;;  %v1421_v42 = vor.u32 %v1420_v21, %v1419_v20  ;;  %v217_v61 = vshll.u32 %v216_v24, 23 }
  0x52   :  { %v4603_v30 = vsub.s32 %v1037_v63, %v1040_v48  ;;  %vm1428_vm6 = vcmp.lt.s32.totalorder %v4592_v13, 1  ;;  %vm1430_vm7 = vcmp.lt.s32.totalorder %v4592_v13, 3  ;;  %v1437_v46 = vsel %vm1431_vm5, %v1424_v25, 920167782 }
  0x53   :  { %v614_v41 = vadd.s32 %v4515_v26, %v4521_v31  ;;  %v630_v49 = vsub.s32 32, %v629_v11  ;;  %v635_v52 = vadd.s32 127, %v634_v28  ;;  %v214_v54 = vor.u32 %v213_v34, %v212_v62 }
  0x54   :  { %v1043_v38 = vsub.s32 0, %v4603_v30  ;;  %v1412_v55 = vshrl.u32 %v6390_v0, %v1411_v1  ;;  %v1427_v56 = vor.u32 %v1426_v36, %v1425_v10  ;;  %vm1429_vm8 = vcmp.lt.s32.totalorder %v4592_v13, 2 }
  0x55   :  { %v1436_v58 = vsel %vm1428_vm6, %v1415_v39, %v1418_v40  ;;  %v1438_v63 = vsel %vm1430_vm7, %v1421_v42, %v1437_v46  ;;  %v218_v3 = vor.u32 4788187, %v217_v61  ;;  %v631_v26 = vshll.u32 %v4556_v60, %v629_v11 }
  0x56   :  { %v3627_v53 = vmin.u32 %v1043_v38, %v4603_v30  ;;  %v1433_v31 = vsel %vm1431_vm5, %v1421_v42, 2102212464  ;;  %v1444_v5 = vshll.u32 %v1404_v33, 8  ;;  %v632_v7 = vshrl.u32 %v614_v41, %v630_v49 }
  0x57   :  { %v636_v59 = vshll.u32 %v635_v52, 23  ;;  %v1440_v9 = vsel %vm1428_vm6, %v1418_v40, %v1421_v42  ;;  %v221_v14 = vcvt.s32.f32 %v214_v54  ;;  %v1033_v15 = vadd.s32 %v4574_v45, %v4579_v50  ;;  %v32_v45 = vld [vmem:[%s6369_s0] sm:$0xff] }
  0x58   :  { %v1045_v44 = vclz %v3627_v53  ;;  %v1439_v17 = vsel %vm1429_vm8, %v1436_v58, %v1438_v63  ;;  %v1441_v60 = vsel %vm1431_vm5, %v1427_v56, 1326507024  ;;  %v1432_v11 = vsel %vm1428_vm6, %v1412_v55, %v1415_v39 }
  0x59   :  { %v1434_v18 = vsel %vm1430_vm7, %v1418_v40, %v1433_v31  ;;  %v1442_v47 = vsel %vm1430_vm7, %v1424_v25, %v1441_v60  ;;  %v4645_v19 = vmul.u32.u64.low %v1444_v5, %v1439_v17  ;;  %v4646_v20 = vmul.u32.u64.high %v1444_v5, %v1439_v17, %v4645_v19 }
  0x5a   :  { %v3628_v1 = vadd.s32 4294967294, %v1045_v44  ;;  %v1443_v48 = vsel %vm1429_vm8, %v1440_v9, %v1442_v47  ;;  %v633_v21 = vor.u32 %v632_v7, %v631_v26  ;;  %v637_v24 = vor.u32 4788187, %v636_v59 }
  0x5b   :  { %v1435_v62 = vsel %vm1429_vm8, %v1432_v11, %v1434_v18  ;;  %v4651_v25 = vmul.u32.u64.low %v1444_v5, %v1443_v48  ;;  %v4652_v34 = vmul.u32.u64.high %v1444_v5, %v1443_v48, %v4651_v25  ;;  %v4654_v10 = vmul.f32 0.5, %v32_v45 }
  0x5c   :  { %vm3629_vm9 = vcmp.lt.s32.totalorder %v3628_v1, 0  ;;  %v219_v36 = vand.u32 2147483647, %v218_v3  ;;  %v1454_v42 = vadd.s32 1, %v4646_v20  ;;  %v1451_v46 = vmul.u32 %v1444_v5, %v1435_v62 }
  0x5d   :  { %v1048_v50 = vsel %vm3629_vm9, 0, %v3628_v1  ;;  %6431 = vst [vmem:[#allocation2_spill] sm:$0xff] %v4654_v10  ;;  %v638_v41 = vand.u32 2147483647, %v637_v24  ;;  %v640_v49 = vcvt.s32.f32 %v633_v21  ;;  %vm1453_vm10 = vc.u32 %v4652_v34, %v4645_v19 }
  0x5e   :  { %v1049_v28 = vsub.s32 32, %v1048_v50  ;;  %v1053_v33 = vsub.s32 4294967266, %v1048_v50  ;;  %v1050_v38 = vshll.u32 %v4603_v30, %v1048_v50  ;;  %v39_v13 = vand.u32 2139095040, %v4654_v10 }
  0x5f   :  { %v222_v52 = vmul.f32 %v221_v14, %v219_v36  ;;  %v1455_v55 = vsel %vm1453_vm10, %v1454_v42, %v4646_v20  ;;  %v225_v30 = vsub.s32 4, %v4523_v32  ;;  %v641_v44 = vmul.f32 %v640_v49, %v638_v41 }
  0x60   :  { %v1051_v39 = vshrl.u32 %v1033_v15, %v1049_v28  ;;  %v1054_v40 = vadd.s32 127, %v1053_v33  ;;  %v1456_v56 = vadd.s32 %v1455_v55, %v1451_v46  ;;  %v644_v58 = vsub.s32 4, %v4544_v51 }
  0x61   :  { %v40_v63 = vshrl.u32 %v39_v13, 23  ;;  %v223_v3 = vxor.u32 2147483648, %v222_v52  ;;  %vm141_vm11 = vcmp.lt.s32.totalorder %v4414_v22, 0  ;;  %vm140_vm12 = vcmp.le.f32.partialorder %v139_v29, 0.7853982 }
  0x62   :  { %v1055_v61 = vshll.u32 %v1054_v40, 23  ;;  %v1052_v53 = vor.u32 %v1051_v39, %v1050_v38  ;;  %v1457_v5 = vadd.s32 536870912, %v1456_v56  ;;  %v226_v59 = vsel %vm141_vm11, %v225_v30, %v4523_v32 }
  0x63   :  { %v3586_v7 = vadd.s32 4294967169, %v40_v63  ;;  %vm560_vm13 = vcmp.lt.s32.totalorder %v4416_v23, 0  ;;  %v642_v9 = vxor.u32 2147483648, %v641_v44  ;;  %v224_v15 = vsel %vm141_vm11, %v223_v3, %v222_v52 }
  0x64   :  { %v1056_v54 = vor.u32 4788187, %v1055_v61  ;;  %v1059_v31 = vcvt.s32.f32 %v1052_v53  ;;  %v4666_v1 = vshrl.u32 %v1457_v5, 30  ;;  %v645_v17 = vsel %vm560_vm13, %v644_v58, %v4544_v51 }
  0x65   :  { %v46_v14 = vadd.s32 1, %v3586_v7  ;;  %v228_v18 = vsel %vm140_vm12, 0, %v226_v59  ;;  %vm4675_vm14 = vcmp.le.f32.partialorder %v558_v35, 0.7853982  ;;  %v1063_v29 = vsub.s32 4, %v4590_v12 }
  0x66   :  { %v1057_v26 = vand.u32 2147483647, %v1056_v54  ;;  %v1459_v11 = vshll.u32 %v4666_v1, 30  ;;  %v439_v47 = vadd.s32 3, %v228_v18  ;;  %v227_v48 = vsel %vm140_vm12, %v4414_v22, %v224_v15 }
  0x67   :  { %vm47_vm15 = vcmp.gt.s32.totalorder %v46_v14, 0  ;;  %v643_v51 = vsel %vm560_vm13, %v642_v9, %v641_v44  ;;  %v647_v20 = vsel %vm4675_vm14, 0, %v645_v17  ;;  %vm979_vm0 = vcmp.lt.s32.totalorder %v4427_v27, 0 }
  0x68   :  { %v1060_v60 = vmul.f32 %v1059_v31, %v1057_v26  ;;  %v4680_v45 = vsub.s32 %v1456_v56, %v1459_v11  ;;  %v48_v50 = vsel %vm47_vm15, %v46_v14, 0  ;;  %v858_v24 = vadd.s32 3, %v647_v20 }
  0x69   :  { %v50_v21 = vand.u32 31, %v48_v50  ;;  %4143 = vcosq.f32 %v227_v48  ;;  %v646_v62 = vsel %vm4675_vm14, %v4416_v23, %v643_v51  ;;  %v1064_v25 = vsel %vm979_vm0, %v1063_v29, %v4590_v12 }
  0x6a   :  { %v1061_v28 = vxor.u32 2147483648, %v1060_v60  ;;  %v1462_v35 = vsub.s32 0, %v4680_v45  ;;  %4145 = vsinq.f32 %v227_v48  ;;  %v4694_v38 = vand.u32 3, %v228_v18 }
  0x6b   :  { %v4687_v33 = vsub.s32 32, %v50_v21  ;;  %v4696_v39 = vand.u32 3, %v439_v47  ;;  %vm978_vm1 = vcmp.le.f32.partialorder %v977_v43, 0.7853982  ;;  %v4700_v40 = vand.u32 3, %v647_v20 }
  0x6c   :  { %v3645_v36 = vmin.u32 %v1462_v35, %v4680_v45  ;;  %v4702_v42 = vand.u32 3, %v858_v24  ;;  %v1062_v61 = vsel %vm979_vm0, %v1061_v28, %v1060_v60  ;;  %4147 = vcosq.f32 %v646_v62 }
  0x6d   :  { %v1066_v41 = vsel %vm978_vm1, 0, %v1064_v25  ;;  %v62_v12 = vshll.u32 %v6384_v6, %v50_v21  ;;  %v63_v49 = vshrl.u32 %v6382_v8, %v4687_v33  ;;  %4149 = vsinq.f32 %v646_v62 }
  0x6e   :  { %v1464_v46 = vclz %v3645_v36  ;;  %v1452_v13 = vadd.s32 %v4645_v19, %v4652_v34  ;;  %v6379_v43 = vand.u32 2147483647, %v4654_v10  ;;  %v1065_v53 = vsel %vm978_vm1, %v4427_v27, %v1062_v61 }
  0x6f   :  { %v4711_v54 = vshrl.u32 %v48_v50, 5  ;;  %v53_v55 = vshll.u32 %v6390_v0, %v50_v21  ;;  %v56_v30 = vshll.u32 %v6388_v2, %v50_v21  ;;  %vm237_vm2 = vcmp.eq.s32.totalorder %v4694_v38, 2 }
  0x70   :  { %v3646_v52 = vadd.s32 4294967294, %v1464_v46  ;;  %v54_v56 = vshrl.u32 %v6388_v2, %v4687_v33  ;;  %v57_v19 = vshrl.u32 %v6386_v4, %v4687_v33  ;;  %v59_v34 = vshll.u32 %v6386_v4, %v50_v21  ;;  %v3602_v46 = vld [vmem:[%s6369_s0 + $0x10] sm:$0xff] }
  0x71   :  { %vm234_vm4 = vcmp.eq.s32.totalorder %v4694_v38, 0  ;;  %v60_v58 = vshrl.u32 %v6384_v6, %v4687_v33  ;;  %v64_v63 = vor.u32 %v63_v49, %v62_v12  ;;  %v65_v3 = vshll.u32 %v6382_v8, %v50_v21 }
  0x72   :  { %vm3647_vm3 = vcmp.lt.s32.totalorder %v3646_v52, 0  ;;  %vm445_vm5 = vcmp.eq.s32.totalorder %v4696_v39, 2  ;;  %v66_v7 = vshrl.u32 %v6380_v16, %v4687_v33  ;;  %vm442_vm6 = vcmp.eq.s32.totalorder %v4696_v39, 0 }
  0x73   :  { %v1467_v44 = vsel %vm3647_vm3, 0, %v3646_v52  ;;  %4151 = vcosq.f32 %v1065_v53  ;;  %v1277_v59 = vadd.s32 3, %v1066_v41  ;;  %v43_v9 = vand.u32 8388607, %v6379_v43  ;;  %v4144_v14 = vpop.eup %4143 }
  0x74   :  { %v1468_v26 = vsub.s32 32, %v1467_v44  ;;  %v1469_v31 = vshll.u32 %v4680_v45, %v1467_v44  ;;  %v1472_v5 = vsub.s32 4294967266, %v1467_v44  ;;  %vm71_vm7 = vcmp.lt.s32.totalorder %v4711_v54, 4  ;;  %v4146_v11 = vpop.eup %4145 }
  0x75   :  { %vm233_vm8 = vcmp.lt.s32.totalorder %v4694_v38, 2  ;;  %4153 = vsinq.f32 %v1065_v53  ;;  %v4734_v60 = vor.u32 %v54_v56, %v53_v55  ;;  %vm1398_vm9 = vcmp.lt.s32.totalorder %v4533_v37, 0 }
  0x76   :  { %v1470_v15 = vshrl.u32 %v1452_v13, %v1468_v26  ;;  %v1473_v17 = vadd.s32 127, %v1472_v5  ;;  %v4737_v18 = vor.u32 %v57_v19, %v56_v30  ;;  %v4739_v32 = vor.u32 %v60_v58, %v59_v34  ;;  %v4751_v51 = vpop.eup %4147 }
  0x77   :  { %vm68_vm10 = vcmp.lt.s32.totalorder %v4711_v54, 1  ;;  %vm70_vm11 = vcmp.lt.s32.totalorder %v4711_v54, 3  ;;  %vm4745_vm12 = vcmp.le.f32.partialorder %v1396_v57, 0.7853982  ;;  %v67_v50 = vor.u32 %v66_v7, %v65_v3  ;;  %v4150_v57 = vpop.eup %4149 }
  0x78   :  { %v1471_v29 = vor.u32 %v1470_v15, %v1469_v31  ;;  %v1474_v45 = vshll.u32 %v1473_v17, 23  ;;  %v77_v48 = vsel %vm71_vm7, %v64_v63, 920167782  ;;  %v238_v20 = vxor.u32 2147483648, %v4144_v14 }
  0x79   :  { %vm653_vm13 = vcmp.eq.s32.totalorder %v4700_v40, 0  ;;  %vm656_vm14 = vcmp.eq.s32.totalorder %v4700_v40, 2  ;;  %v4755_v21 = vand.u32 3, %v1066_v41  ;;  %v44_v24 = vor.u32 8388608, %v43_v9 }
  0x7a   :  { %v235_v28 = vxor.u32 2147483648, %v4146_v11  ;;  %v1475_v35 = vor.u32 4788187, %v1474_v45  ;;  %v1478_v62 = vcvt.s32.f32 %v1471_v29  ;;  %v4759_v25 = vand.u32 3, %v1277_v59 }
  0x7b   :  { %vm69_vm1 = vcmp.lt.s32.totalorder %v4711_v54, 2  ;;  %v76_v36 = vsel %vm68_vm10, %v4734_v60, %v4737_v18  ;;  %v78_v61 = vsel %vm70_vm11, %v4739_v32, %v77_v48  ;;  %v1482_v12 = vsub.s32 4, %v4666_v1 }
  0x7c   :  { %v1476_v41 = vand.u32 2147483647, %v1475_v35  ;;  %v80_v49 = vsel %vm68_vm10, %v4737_v18, %v4739_v32  ;;  %v81_v13 = vsel %vm71_vm7, %v67_v50, 1326507024  ;;  %v239_v52 = vsel %vm237_vm2, %v238_v20, %v4146_v11 }
  0x7d   :  { %vm1072_vm3 = vcmp.eq.s32.totalorder %v4755_v21, 0  ;;  %v82_v53 = vsel %vm70_vm11, %v64_v63, %v81_v13  ;;  %v4788_v55 = vshll.u32 %v44_v24, 8  ;;  %v236_v30 = vsel %vm234_vm4, %v4144_v14, %v235_v28  ;;  %v4152_v44 = vpop.eup %4151 }
  0x7e   :  { %vm860_vm15 = vcmp.lt.s32.totalorder %v4702_v42, 2  ;;  %v1479_v56 = vmul.f32 %v1478_v62, %v1476_v41  ;;  %v79_v19 = vsel %vm69_vm1, %v76_v36, %v78_v61  ;;  %v4795_v34 = vmul.f32 0.5, %v3602_v46 }
  0x7f   :  { %v447_v58 = vsel %vm445_vm5, %v238_v20, %v4146_v11  ;;  %vm650_vm2 = vweird.f32 %v4416_v23  ;;  %v657_v63 = vxor.u32 2147483648, %v4751_v51  ;;  %vm1280_vm0 = vcmp.eq.s32.totalorder %v4759_v25, 0  ;;  %v4154_v26 = vpop.eup %4153 }
  0x80   :  { %6436 = vst [vmem:[#allocation3_spill] sm:$0xff] %v4795_v34  ;;  %v83_v3 = vsel %vm69_vm1, %v80_v49, %v82_v53  ;;  %v444_v31 = vsel %vm442_vm6, %v4144_v14, %v235_v28  ;;  %v654_v5 = vxor.u32 2147483648, %v4150_v57  ;;  %vm1071_vm4 = vcmp.lt.s32.totalorder %v4755_v21, 2 }
  0x81   :  { %v1480_v7 = vxor.u32 2147483648, %v1479_v56  ;;  %v1483_v59 = vsel %vm1398_vm9, %v1482_v12, %v4666_v1  ;;  %v240_v9 = vsel %vm233_vm8, %v236_v30, %v239_v52  ;;  %v52_v15 = vshrl.u32 %v6390_v0, %v4687_v33 }
  0x82   :  { %v4815_v17 = vmul.u32.u64.low %v4788_v55, %v79_v19  ;;  %v4816_v11 = vmul.u32.u64.high %v4788_v55, %v79_v19, %v4815_v17  ;;  %v4822_v29 = vmul.u32.u64.low %v4788_v55, %v83_v3  ;;  %v4823_v45 = vmul.u32.u64.high %v4788_v55, %v83_v3, %v4822_v29 }
  0x83   :  { %v1481_v14 = vsel %vm1398_vm9, %v1480_v7, %v1479_v56  ;;  %v458_v1 = vand.u32 2139095040, %v4795_v34  ;;  %v658_v38 = vsel %vm656_vm14, %v657_v63, %v4150_v57  ;;  %v1485_v50 = vsel %vm4745_vm12, 0, %v1483_v59 }
  0x84   :  { %6437 = vst [vmem:[#allocation4_spill] sm:$0xff] %v4815_v17  ;;  %6438 = vst [vmem:[#allocation5_spill] sm:$0xff] %v4823_v45  ;;  %v1484_v33 = vsel %vm4745_vm12, %v4533_v37, %v1481_v14  ;;  %v73_v48 = vsel %vm71_vm7, %v4739_v32, 2102212464  ;;  %v655_v20 = vsel %vm653_vm13, %v4751_v51, %v654_v5  ;;  %v1073_v24 = vxor.u32 2147483648, %v4154_v26 }
  0x85   :  { %v1076_v28 = vxor.u32 2147483648, %v4152_v44  ;;  %4155 = vcosq.f32 %v1484_v33  ;;  %vm6439_vm5 = vcmp.eq.s32.totalorder %v4702_v42, 0  ;;  %vm6440_vm6 = vcmp.eq.s32.totalorder %v4702_v42, 2 }
  0x86   :  { %v863_v35 = vsel %vm6439_vm5, %v4751_v51, %v654_v5  ;;  %v866_v62 = vsel %vm6440_vm6, %v657_v63, %v4150_v57  ;;  %vm1283_vm8 = vcmp.eq.s32.totalorder %v4759_v25, 2  ;;  %4157 = vsinq.f32 %v1484_v33 }
  0x87   :  { %v1696_v47 = vadd.s32 3, %v1485_v50  ;;  %v72_v32 = vsel %vm68_vm10, %v52_v15, %v4734_v60  ;;  %v74_v36 = vsel %vm70_vm11, %v4737_v18, %v73_v48  ;;  %v459_v61 = vshrl.u32 %v458_v1, 23 }
  0x88   :  { %vm6441_vm7 = vweird.f32 %v4414_v22  ;;  %vm6442_vm9 = vcmp.lt.s32.totalorder %v4696_v39, 2  ;;  %vm6443_vm12 = vcmp.lt.s32.totalorder %v4700_v40, 2  ;;  %vm1279_vm13 = vcmp.lt.s32.totalorder %v4759_v25, 2 }
  0x89   :  { %v241_v46 = vsel %vm6441_vm7, nan, %v240_v9  ;;  %v448_v51 = vsel %vm6442_vm9, %v444_v31, %v447_v58  ;;  %v659_v57 = vsel %vm6443_vm12, %v655_v20, %v658_v38  ;;  %v1074_v41 = vsel %vm1072_vm3, %v4152_v44, %v1073_v24 }
  0x8a   :  { %vm6444_vm10 = vcmp.eq.s32.totalorder %v4755_v21, 2  ;;  %v1282_v18 = vsel %vm1280_vm0, %v4152_v44, %v1073_v24  ;;  %v1285_v12 = vsel %vm1283_vm8, %v1076_v28, %v4154_v26  ;;  %v867_v49 = vsel %vm860_vm15, %v863_v35, %v866_v62  ;;  %vm6445_vm0 = vmmov %vm6441_vm7 }
  0x8b   :  { %v1077_v60 = vsel %vm6444_vm10, %v1076_v28, %v4154_v26  ;;  %v1489_v39 = vand.u32 3, %v1485_v50  ;;  %v75_v40 = vsel %vm69_vm1, %v72_v32, %v74_v36  ;;  %v94_v13 = vadd.s32 1, %v4816_v11 }
  0x8c   :  { %v660_v52 = vsel %vm650_vm2, nan, %v659_v57  ;;  %v1697_v53 = vand.u32 3, %v1696_v47  ;;  %vm93_vm11 = vc.u32 %v4823_v45, %v4815_v17  ;;  %v3604_v30 = vadd.s32 4294967169, %v459_v61 }
  0x8d   :  { %vm1069_vm14 = vweird.f32 %v4427_v27  ;;  %v1078_v42 = vsel %vm1071_vm4, %v1074_v41, %v1077_v60  ;;  %v1286_v25 = vsel %vm1279_vm13, %v1282_v18, %v1285_v12  ;;  %v868_v54 = vsel %vm650_vm2, nan, %v867_v49 }
  0x8e   :  { %vm1488_vm15 = vweird.f32 %v4533_v37  ;;  %v91_v56 = vmul.u32 %v4788_v55, %v75_v40  ;;  %v449_v19 = vsel %vm6445_vm0, nan, %v448_v51  ;;  %vm1494_vm1 = vcmp.eq.s32.totalorder %v1489_v39, 2 }
  0x8f   :  { %v1708_v44 = vmul.f32 %v660_v52, %v241_v46  ;;  %v95_v58 = vsel %vm93_vm11, %v94_v13, %v4816_v11  ;;  %v4156_v63 = vpop.eup %4155  ;;  %v1079_v27 = vsel %vm1069_vm14, nan, %v1078_v42  ;;  %v1287_v3 = vsel %vm1069_vm14, nan, %v1286_v25 }
  0x90   :  { %vm1702_vm3 = vcmp.eq.s32.totalorder %v1697_v53, 2  ;;  %v465_v21 = vadd.s32 1, %v3604_v30  ;;  %v4158_v26 = vpop.eup %4157  ;;  %vm1491_vm4 = vcmp.eq.s32.totalorder %v1489_v39, 0  ;;  %v1495_v23 = vxor.u32 2147483648, %v4156_v63 }
  0x91   :  { %vm1699_vm2 = vcmp.eq.s32.totalorder %v1697_v53, 0  ;;  %v1722_v31 = vmul.f32 %v868_v54, %v241_v46  ;;  %vm1490_vm5 = vcmp.lt.s32.totalorder %v1489_v39, 2  ;;  %v1492_v5 = vxor.u32 2147483648, %v4158_v26 }
  0x92   :  { %vm1698_vm6 = vcmp.lt.s32.totalorder %v1697_v53, 2  ;;  %v4883_v55 = vadd.s32 %v95_v58, %v91_v56  ;;  %v1496_v22 = vsel %vm1494_vm1, %v1495_v23, %v4158_v26  ;;  %v1704_v7 = vsel %vm1702_vm3, %v1495_v23, %v4158_v26 }
  0x93   :  { %v1710_v59 = vmul.f32 %v1708_v44, %v1079_v27  ;;  %v1716_v9 = vmul.f32 %v1708_v44, %v1287_v3  ;;  %v1493_v15 = vsel %vm1491_vm4, %v4156_v63, %v1492_v5  ;;  %v1701_v11 = vsel %vm1699_vm2, %v4156_v63, %v1492_v5 }
  0x94   :  { %6446 = vst [vmem:[#allocation6_spill] sm:$0xff] %v4883_v55  ;;  %v6378_v14 = vand.u32 2147483647, %v4795_v34  ;;  %vm466_vm8 = vcmp.gt.s32.totalorder %v465_v21, 0  ;;  %v1497_v29 = vsel %vm1490_vm5, %v1493_v15, %v1496_v22  ;;  %v1705_v1 = vsel %vm1698_vm6, %v1701_v11, %v1704_v7 }
  0x95   :  { %v1736_v38 = vmul.f32 %v660_v52, %v449_v19  ;;  %v4889_v33 = vsel %vm1488_vm15, nan, %v1497_v29  ;;  %v4893_v50 = vsel %vm1488_vm15, nan, %v1705_v1  ;;  %v1724_v48 = vmul.f32 %v1722_v31, %v1079_v27 }
  0x96   :  { %v97_v20 = vadd.s32 536870912, %v4883_v55  ;;  %v4897_v24 = vmul.f32 %v1710_v59, %v4889_v33  ;;  %v4900_v28 = vmul.f32 %v1710_v59, %v4893_v50  ;;  %v4903_v35 = vmul.f32 %v1716_v9, %v4889_v33 }
  0x97   :  { %v467_v62 = vsel %vm466_vm8, %v465_v21, 0  ;;  %v1750_v47 = vmul.f32 %v868_v54, %v449_v19  ;;  %v4907_v32 = vand.u32 8388607, %v6378_v14  ;;  %v4910_v37 = vmul.f32 %v1716_v9, %v4893_v50 }
  0x98   :  { %v1730_v36 = vmul.f32 %v1722_v31, %v1287_v3  ;;  %v1738_v61 = vmul.f32 %v1736_v38, %v1079_v27  ;;  %v4912_v46 = vshrl.u32 %v97_v20, 30  ;;  %v469_v51 = vand.u32 31, %v467_v62 }
  0x99   :  { %6447 = vst [vmem:[#allocation7_spill] sm:$0xff] %v4907_v32  ;;  %v4915_v57 = vmul.f32 %v1724_v48, %v4889_v33  ;;  %v1764_v41 = vmul.f32 -0.039848488, %v4897_v24  ;;  %v1766_v60 = vmul.f32 0.1724955, %v4900_v28  ;;  %v1744_v12 = vmul.f32 %v1736_v38, %v1287_v3 }
  0x9a   :  { %6448 = vst [vmem:[#allocation8_spill] sm:$0xff] %v4912_v46  ;;  %v1770_v18 = vmul.f32 0.050464205, %v4903_v35  ;;  %v4920_v49 = vmul.f32 %v1750_v47, %v1079_v27  ;;  %v4922_v39 = vmul.f32 %v1750_v47, %v1287_v3  ;;  %v4926_v13 = vmul.f32 %v1724_v48, %v4893_v50 }
  0x9b   :  { %v1768_v52 = vadd.f32 %v1766_v60, %v1764_v41  ;;  %v1774_v53 = vmul.f32 -0.57100374, %v4910_v37  ;;  %v4929_v30 = vshrl.u32 %v467_v62, 5  ;;  %v470_v25 = vsub.s32 32, %v469_v51 }
  0x9c   :  { %v472_v54 = vshll.u32 %v6390_v0, %v469_v51  ;;  %v475_v56 = vshll.u32 %v6388_v2, %v469_v51  ;;  %v4935_v19 = vmul.f32 %v1730_v36, %v4889_v33  ;;  %v1778_v58 = vmul.f32 -0.10426246, %v4915_v57 }
  0x9d   :  { %v1772_v44 = vadd.f32 %v1770_v18, %v1768_v52  ;;  %v4939_v63 = vshll.u32 %v6386_v4, %v469_v51  ;;  %v1828_v27 = vmul.f32 -0.03995849, %v4897_v24  ;;  %v1830_v3 = vmul.f32 -0.12118407, %v4900_v28 }
  0x9e   :  { %v4944_v21 = vshll.u32 %v6384_v6, %v469_v51  ;;  %v4947_v26 = vshll.u32 %v6382_v8, %v469_v51  ;;  %v4950_v23 = vmul.f32 %v1730_v36, %v4893_v50  ;;  %v1782_v5 = vmul.f32 -0.059748597, %v4926_v13 }
  0x9f   :  { %v1776_v31 = vadd.f32 %v1774_v53, %v1772_v44  ;;  %v1834_v22 = vmul.f32 0.1743222, %v4903_v35  ;;  %v1832_v7 = vadd.f32 %v1830_v3, %v1828_v27  ;;  %v1838_v59 = vmul.f32 0.4899346, %v4910_v37 }
  0xa0   :  { %v4956_v9 = vshrl.u32 %v6390_v0, %v470_v25  ;;  %v473_v15 = vshrl.u32 %v6388_v2, %v470_v25  ;;  %v4960_v11 = vmul.f32 %v1738_v61, %v4889_v33  ;;  %v1786_v1 = vmul.f32 -0.051029798, %v4935_v19 }
  0xa1   :  { %v1780_v29 = vadd.f32 %v1778_v58, %v1776_v31  ;;  %v476_v38 = vshrl.u32 %v6386_v4, %v470_v25  ;;  %v1836_v48 = vadd.f32 %v1834_v22, %v1832_v7  ;;  %v1842_v20 = vmul.f32 -0.07571072, %v4915_v57 }
  0xa2   :  { %6449 = vst [vmem:[#allocation9_spill] sm:$0xff] %v4956_v9  ;;  %v4966_v62 = vshrl.u32 %v6384_v6, %v470_v25  ;;  %v4969_v47 = vshrl.u32 %v6382_v8, %v470_v25  ;;  %v4972_v36 = vmul.f32 %v1738_v61, %v4893_v50  ;;  %v1790_v41 = vmul.f32 0.02399257, %v4950_v23 }
  0xa3   :  { %v1784_v51 = vadd.f32 %v1782_v5, %v1780_v29  ;;  %v1896_v60 = vmul.f32 -0.16710728, %v4897_v24  ;;  %v1840_v18 = vadd.f32 %v1838_v59, %v1836_v48  ;;  %v1846_v52 = vmul.f32 -0.20402385, %v4926_v13 }
  0xa4   :  { %v1898_v53 = vmul.f32 -0.18671893, %v4900_v28  ;;  %v1902_v44 = vmul.f32 -0.031144673, %v4903_v35  ;;  %v1794_v27 = vmul.f32 0.18019404, %v4960_v11  ;;  %v4980_v3 = vor.u32 %v473_v15, %v472_v54 }
  0xa5   :  { %v1788_v58 = vadd.f32 %v1786_v1, %v1784_v51  ;;  %v4983_v61 = vshrl.u32 %v6380_v16, %v470_v25  ;;  %v1844_v31 = vadd.f32 %v1842_v20, %v1840_v18  ;;  %v1850_v5 = vmul.f32 -0.1890674, %v4935_v19 }
  0xa6   :  { %6450 = vst [vmem:[#allocation10_spill] sm:$0xff] %v4980_v3  ;;  %v1900_v22 = vadd.f32 %v1898_v53, %v1896_v60  ;;  %v1906_v7 = vmul.f32 0.18360002, %v4910_v37  ;;  %v4988_v59 = vmul.f32 %v1744_v12, %v4889_v33  ;;  %v4991_v29 = vmul.f32 %v1744_v12, %v4893_v50 }
  0xa7   :  { %6451 = vst [vmem:[#allocation11_spill] sm:$0xff] %v4983_v61  ;;  %v1792_v1 = vadd.f32 %v1790_v41, %v1788_v58  ;;  %v1798_v48 = vmul.f32 -0.101234, %v4972_v36  ;;  %v1848_v54 = vadd.f32 %v1846_v52, %v1844_v31  ;;  %v1854_v15 = vmul.f32 0.06465545, %v4950_v23 }
  0xa8   :  { %v1904_v25 = vadd.f32 %v1902_v44, %v1900_v22  ;;  %v1910_v20 = vmul.f32 -0.40619403, %v4915_v57  ;;  %v1858_v60 = vmul.f32 -0.3582292, %v4960_v11  ;;  %v1914_v18 = vmul.f32 0.07006678, %v4926_v13 }
  0xa9   :  { %v1796_v51 = vadd.f32 %v1794_v27, %v1792_v1  ;;  %v1966_v53 = vmul.f32 -0.006700455, %v4897_v24  ;;  %v1852_v14 = vadd.f32 %v1850_v5, %v1848_v54  ;;  %v1968_v12 = vmul.f32 0.20106497, %v4900_v28 }
  0xaa   :  { %v1908_v43 = vadd.f32 %v1906_v7, %v1904_v25  ;;  %v1972_v41 = vmul.f32 0.047977656, %v4903_v35  ;;  %v5003_v52 = vmul.f32 %v4920_v49, %v4889_v33  ;;  %v1862_v44 = vmul.f32 -0.10923188, %v4972_v36 }
  0xab   :  { %v1918_v58 = vmul.f32 0.3259069, %v4935_v19  ;;  %v5007_v27 = vor.u32 %v476_v38, %v475_v56  ;;  %v1856_v31 = vadd.f32 %v1854_v15, %v1852_v14  ;;  %v1970_v1 = vadd.f32 %v1968_v12, %v1966_v53 }
  0xac   :  { %v1912_v22 = vadd.f32 %v1910_v20, %v1908_v43  ;;  %v1976_v5 = vmul.f32 -0.2154318, %v4910_v37  ;;  %v1800_v7 = vadd.f32 %v1798_v48, %v1796_v51  ;;  %v1802_v54 = vmul.f32 -0.16260491, %v4988_v59 }
  0xad   :  { %6452 = vst [vmem:[#allocation12_spill] sm:$0xff] %v5007_v27  ;;  %v1806_v25 = vmul.f32 0.46712878, %v4991_v29  ;;  %v1922_v16 = vmul.f32 -0.17564082, %v4950_v23  ;;  %v1860_v8 = vadd.f32 %v1858_v60, %v1856_v31  ;;  %v1974_v4 = vadd.f32 %v1972_v41, %v1970_v1 }
  0xae   :  { %v1916_v6 = vadd.f32 %v1914_v18, %v1912_v22  ;;  %v1980_v2 = vmul.f32 0.2622359, %v4915_v57  ;;  %v5016_v56 = vmul.f32 %v4920_v49, %v4893_v50  ;;  %v1866_v43 = vmul.f32 -0.08307569, %v4988_v59 }
  0xaf   :  { %v1926_v14 = vmul.f32 0.14113827, %v4960_v11  ;;  %v1930_v38 = vmul.f32 0.5070868, %v4972_v36  ;;  %v1864_v48 = vadd.f32 %v1862_v44, %v1860_v8  ;;  %v1978_v20 = vadd.f32 %v1976_v5, %v1974_v4 }
  0xb0   :  { %v1920_v15 = vadd.f32 %v1918_v58, %v1916_v6  ;;  %v1984_v51 = vmul.f32 -0.22375755, %v4926_v13  ;;  %v5024_v60 = vmul.f32 %v4922_v39, %v4889_v33  ;;  %v1988_v18 = vmul.f32 -0.23497823, %v4935_v19 }
  0xb1   :  { %v2036_v49 = vmul.f32 0.22033308, %v4897_v24  ;;  %v2038_v53 = vmul.f32 0.0012439453, %v4900_v28  ;;  %v1804_v12 = vadd.f32 %v1802_v54, %v1800_v7  ;;  %v1982_v31 = vadd.f32 %v1980_v2, %v1978_v20 }
  0xb2   :  { %v1924_v41 = vadd.f32 %v1922_v16, %v1920_v15  ;;  %v2042_v22 = vmul.f32 0.13018423, %v4903_v35  ;;  %v5032_v4 = vmul.f32 %v4922_v39, %v4893_v50  ;;  %v1870_v6 = vmul.f32 0.2962738, %v4991_v29 }
  0xb3   :  { %v2040_v8 = vadd.f32 %v2038_v53, %v2036_v49  ;;  %v2046_v33 = vmul.f32 0.040183634, %v4910_v37  ;;  %v1868_v44 = vadd.f32 %v1866_v43, %v1864_v48  ;;  %v1986_v1 = vadd.f32 %v1984_v51, %v1982_v31 }
  0xb4   :  { %v1928_v58 = vadd.f32 %v1926_v14, %v1924_v41  ;;  %v1992_v5 = vmul.f32 -0.26511264, %v4950_v23  ;;  %v1810_v7 = vmul.f32 -0.34445626, %v5003_v52  ;;  %v1934_v2 = vmul.f32 0.16803797, %v4988_v59 }
  0xb5   :  { %v2044_v16 = vadd.f32 %v2042_v22, %v2040_v8  ;;  %v2050_v54 = vmul.f32 -0.14598656, %v4915_v57  ;;  %v1808_v15 = vadd.f32 %v1806_v25, %v1804_v12  ;;  %v1990_v39 = vadd.f32 %v1988_v18, %v1986_v1 }
  0xb6   :  { %v1932_v50 = vadd.f32 %v1930_v38, %v1928_v58  ;;  %v1996_v20 = vmul.f32 0.12623855, %v4960_v11  ;;  %v1814_v49 = vmul.f32 0.14953478, %v5016_v56  ;;  %v1818_v43 = vmul.f32 0.15847088, %v5024_v60 }
  0xb7   :  { %v2048_v14 = vadd.f32 %v2046_v33, %v2044_v16  ;;  %v2054_v48 = vmul.f32 0.50862885, %v4926_v13  ;;  %v1872_v51 = vadd.f32 %v1870_v6, %v1868_v44  ;;  %v1874_v53 = vmul.f32 0.016040504, %v5003_v52 }
  0xb8   :  { %v1994_v41 = vadd.f32 %v1992_v5, %v1990_v39  ;;  %v2000_v31 = vmul.f32 0.15646647, %v4972_v36  ;;  %v1822_v22 = vmul.f32 -0.41103974, %v5032_v4  ;;  %v1878_v25 = vmul.f32 0.4421369, %v5016_v56 }
  0xb9   :  { %v2052_v38 = vadd.f32 %v2050_v54, %v2048_v14  ;;  %v2058_v18 = vmul.f32 -0.083387434, %v4935_v19  ;;  %v1812_v12 = vadd.f32 %v1810_v7, %v1808_v15  ;;  %v1936_v8 = vadd.f32 %v1934_v2, %v1932_v50 }
  0xba   :  { %v1938_v58 = vmul.f32 0.4451631, %v4991_v29  ;;  %v1998_v33 = vadd.f32 %v1996_v20, %v1994_v41  ;;  %v2062_v6 = vmul.f32 -0.30342352, %v4950_v23  ;;  %v2108_v44 = vmul.f32 0.13798064, %v4897_v24 }
  0xbb   :  { %v2056_v1 = vadd.f32 %v2054_v48, %v2052_v38  ;;  %v2110_v5 = vmul.f32 0.4726341, %v4900_v28  ;;  %v1876_v16 = vadd.f32 %v1874_v53, %v1872_v51  ;;  %v2004_v0 = vmul.f32 0.033522066, %v4988_v59 }
  0xbc   :  { %v2002_v39 = vadd.f32 %v2000_v31, %v1998_v33  ;;  %v2114_v54 = vmul.f32 0.031633653, %v4903_v35  ;;  %v2066_v7 = vmul.f32 -0.13804077, %v4960_v11  ;;  %v2118_v15 = vmul.f32 0.19602983, %v4910_v37 }
  0xbd   :  { %v2060_v14 = vadd.f32 %v2058_v18, %v2056_v1  ;;  %v2112_v2 = vadd.f32 %v2110_v5, %v2108_v44  ;;  %v1816_v50 = vadd.f32 %v1814_v49, %v1812_v12  ;;  %v1882_v20 = vmul.f32 0.43548843, %v5024_v60 }
  0xbe   :  { %v1940_v48 = vadd.f32 %v1938_v58, %v1936_v8  ;;  %v1942_v41 = vmul.f32 0.17817709, %v5003_v52  ;;  %v1886_v38 = vmul.f32 -0.07534558, %v5032_v4  ;;  %v2122_v31 = vmul.f32 -0.47905242, %v4915_v57 }
  0xbf   :  { %v2064_v51 = vadd.f32 %v2062_v6, %v2060_v14  ;;  %v2116_v53 = vadd.f32 %v2114_v54, %v2112_v2  ;;  %v1880_v33 = vadd.f32 %v1878_v25, %v1876_v16  ;;  %v1946_v18 = vmul.f32 0.022893697, %v5016_v56 }
  0xc0   :  { %v2006_v1 = vadd.f32 %v2004_v0, %v2002_v39  ;;  %v2008_v44 = vmul.f32 -0.07627838, %v4991_v29  ;;  %v2070_v49 = vmul.f32 0.10817712, %v4972_v36  ;;  %v2126_v8 = vmul.f32 0.02632263, %v4926_v13 }
  0xc1   :  { %v2068_v5 = vadd.f32 %v2066_v7, %v2064_v51  ;;  %v2120_v12 = vadd.f32 %v2118_v15, %v2116_v53  ;;  %v1820_v58 = vadd.f32 %v1818_v43, %v1816_v50  ;;  %v1944_v42 = vadd.f32 %v1942_v41, %v1940_v48 }
  0xc2   :  { %v1950_v40 = vmul.f32 -0.21047758, %v5024_v60  ;;  %v1954_v6 = vmul.f32 -0.12461244, %v5032_v4  ;;  %v2012_v54 = vmul.f32 0.55455494, %v5003_v52  ;;  %v1884_v39 = vadd.f32 %v1882_v20, %v1880_v33 }
  0xc3   :  { %v2074_v25 = vmul.f32 -0.53674155, %v4988_v59  ;;  %v2124_v16 = vadd.f32 %v2122_v31, %v2120_v12  ;;  %v2130_v0 = vmul.f32 0.07564436, %v4935_v19  ;;  %v2010_v14 = vadd.f32 %v2008_v44, %v2006_v1 }
  0xc4   :  { %v2134_v7 = vmul.f32 0.28616375, %v4950_v23  ;;  %v2180_v2 = vmul.f32 -0.5783288, %v4897_v24  ;;  %v2072_v15 = vadd.f32 %v2070_v49, %v2068_v5  ;;  %v2182_v50 = vmul.f32 0.3395567, %v4900_v28 }
  0xc5   :  { %v2128_v43 = vadd.f32 %v2126_v8, %v2124_v16  ;;  %v2186_v48 = vmul.f32 -0.38260955, %v4903_v35  ;;  %v1824_v41 = vadd.f32 %v1822_v22, %v1820_v58  ;;  %v1948_v51 = vadd.f32 %v1946_v18, %v1944_v42 }
  0xc6   :  { %v2016_v53 = vmul.f32 0.5172271, %v5016_v56  ;;  %v2020_v31 = vmul.f32 -0.19908574, %v5024_v60  ;;  %v2138_v20 = vmul.f32 0.26006335, %v4960_v11  ;;  %v2184_v33 = vadd.f32 %v2182_v50, %v2180_v2 }
  0xc7   :  { %v2132_v12 = vadd.f32 %v2130_v0, %v2128_v43  ;;  %v2190_v1 = vmul.f32 0.14943722, %v4910_v37  ;;  %v1888_v44 = vadd.f32 %v1886_v38, %v1884_v39  ;;  %v2014_v34 = vadd.f32 %v2012_v54, %v2010_v14  ;;  %v3705_v14 = vld [vmem:[%s6368_s1 + $0x288] sm:$0xff] }
  0xc8   :  { %v2024_v5 = vmul.f32 -0.06656153, %v5032_v4  ;;  %v2078_v49 = vmul.f32 -0.1926495, %v4991_v29  ;;  %v2076_v8 = vadd.f32 %v2074_v25, %v2072_v15  ;;  %v2188_v22 = vadd.f32 %v2186_v48, %v2184_v33  ;;  %v3704_v25 = vld [vmem:[%s6368_s1 + $0x280] sm:$0xff] }
  0xc9   :  { %v2136_v16 = vadd.f32 %v2134_v7, %v2132_v12  ;;  %v2194_v42 = vmul.f32 0.0111268945, %v4915_v57  ;;  %v5081_v18 = vmul.f32 %v1824_v41, %v1824_v41  ;;  %v1952_v58 = vadd.f32 %v1950_v40, %v1948_v51 }
  0xca   :  { %v2082_v0 = vmul.f32 0.20477228, %v5003_v52  ;;  %v2086_v2 = vmul.f32 -0.103755064, %v5016_v56  ;;  %v2142_v38 = vmul.f32 0.092609294, %v4972_v36  ;;  %v2192_v54 = vadd.f32 %v2190_v1, %v2188_v22 }
  0xcb   :  { %6453 = vst [vmem:[#allocation13_spill] sm:$0xff] %v5081_v18  ;;  %v2140_v43 = vadd.f32 %v2138_v20, %v2136_v16  ;;  %v2198_v39 = vmul.f32 -0.16406001, %v4926_v13  ;;  %v5093_v7 = vmul.f32 %v1888_v44, %v1888_v44  ;;  %v2018_v40 = vadd.f32 %v2016_v53, %v2014_v34 }
  0xcc   :  { %v2146_v15 = vmul.f32 -0.08071907, %v4988_v59  ;;  %v2252_v50 = vmul.f32 0.19615614, %v4897_v24  ;;  %v2080_v48 = vadd.f32 %v2078_v49, %v2076_v8  ;;  %v2196_v41 = vadd.f32 %v2194_v42, %v2192_v54 }
  0xcd   :  { %6454 = vst [vmem:[#allocation14_spill] sm:$0xff] %v5093_v7  ;;  %v2202_v51 = vmul.f32 0.090498425, %v4935_v19  ;;  %v2254_v12 = vmul.f32 -0.07386673, %v4900_v28  ;;  %v1956_v20 = vadd.f32 %v1954_v6, %v1952_v58  ;;  %v4017_v16 = vpack.c.bf16 %v3705_v14, %v3704_v25 }
  0xce   :  { %v2206_v33 = vmul.f32 -0.38056466, %v4950_v23  ;;  %v2258_v1 = vmul.f32 -0.21784738, %v4903_v35  ;;  %v2144_v22 = vadd.f32 %v2142_v38, %v2140_v43  ;;  %v2200_v44 = vadd.f32 %v2198_v39, %v2196_v41 }
  0xcf   :  { %v2256_v10 = vadd.f32 %v2254_v12, %v2252_v50  ;;  %v2262_v34 = vmul.f32 -0.09294777, %v4910_v37  ;;  %v2022_v53 = vadd.f32 %v2020_v31, %v2018_v40  ;;  %v2090_v17 = vmul.f32 0.122632734, %v5024_v60  ;;  %4018 = vmatprep.subr.bf16.mxu0 %v4017_v16 }
  0xd0   :  { %v2094_v49 = vmul.f32 -0.3607713, %v5032_v4  ;;  %v2210_v8 = vmul.f32 0.11088599, %v4960_v11  ;;  %v2084_v42 = vadd.f32 %v2082_v0, %v2080_v48  ;;  %v2204_v6 = vadd.f32 %v2202_v51, %v2200_v44 }
  0xd1   :  { %v2260_v58 = vadd.f32 %v2258_v1, %v2256_v10  ;;  %v2266_v54 = vmul.f32 -0.1710493, %v4915_v57  ;;  %v5108_v43 = vadd.f32 %v5093_v7, %v5081_v18  ;;  %v5110_v38 = vmul.f32 %v1956_v20, %v1956_v20 }
  0xd2   :  { %v2150_v31 = vmul.f32 -0.33583754, %v4991_v29  ;;  %v2214_v39 = vmul.f32 0.012223992, %v4972_v36  ;;  %v2148_v25 = vadd.f32 %v2146_v15, %v2144_v22  ;;  %v2208_v14 = vadd.f32 %v2206_v33, %v2204_v6 }
  0xd3   :  { %6455 = vst [vmem:[#allocation15_spill] sm:$0xff] %v5108_v43  ;;  %6456 = vst [vmem:[#allocation16_spill] sm:$0xff] %v5110_v38  ;;  %v2264_v40 = vadd.f32 %v2262_v34, %v2260_v58  ;;  %v2270_v50 = vmul.f32 -0.23058401, %v4926_v13  ;;  %v2026_v0 = vadd.f32 %v2024_v5, %v2022_v53  ;;  %v2154_v10 = vmul.f32 -0.20528896, %v5003_v52 }
  0xd4   :  { %v2158_v48 = vmul.f32 0.38749725, %v5016_v56  ;;  %v2218_v41 = vmul.f32 -0.15019083, %v4988_v59  ;;  %v2088_v51 = vadd.f32 %v2086_v2, %v2084_v42  ;;  %v2212_v12 = vadd.f32 %v2210_v8, %v2208_v14 }
  0xd5   :  { %v2268_v20 = vadd.f32 %v2266_v54, %v2264_v40  ;;  %v2274_v1 = vmul.f32 0.1851685, %v4935_v19  ;;  %v1960_v16 = vadd.f32 %v5110_v38, %v5108_v43  ;;  %v2278_v15 = vmul.f32 -0.07756747, %v4950_v23 }
  0xd6   :  { %v2324_v33 = vmul.f32 -0.13813807, %v4897_v24  ;;  %v2326_v5 = vmul.f32 -0.042953648, %v4900_v28  ;;  %v2152_v22 = vadd.f32 %v2150_v31, %v2148_v25  ;;  %v2216_v44 = vadd.f32 %v2214_v39, %v2212_v12 }
  0xd7   :  { %v2272_v34 = vadd.f32 %v2270_v50, %v2268_v20  ;;  %v2330_v53 = vmul.f32 0.06858787, %v4903_v35  ;;  %v5125_v6 = vmul.f32 %v2026_v0, %v2026_v0  ;;  %v2222_v2 = vmul.f32 -0.14872736, %v4991_v29 }
  0xd8   :  { %v2328_v8 = vadd.f32 %v2326_v5, %v2324_v33  ;;  %v2334_v42 = vmul.f32 -0.26195437, %v4910_v37  ;;  %v2092_v58 = vadd.f32 %v2090_v17, %v2088_v51  ;;  %v2220_v54 = vadd.f32 %v2218_v41, %v2216_v44 }
  0xd9   :  { %6457 = vst [vmem:[#allocation17_spill] sm:$0xff] %v5125_v6  ;;  %v2276_v14 = vadd.f32 %v2274_v1, %v2272_v34  ;;  %v2282_v40 = vmul.f32 -0.3096704, %v4960_v11  ;;  %v2162_v18 = vmul.f32 -0.0949569, %v5024_v60  ;;  %v2156_v50 = vadd.f32 %v2154_v10, %v2152_v22 }
  0xda   :  { %v2166_v31 = vmul.f32 0.059395105, %v5032_v4  ;;  %v2332_v39 = vadd.f32 %v2330_v53, %v2328_v8  ;;  %v2338_v25 = vmul.f32 -0.40316314, %v4915_v57  ;;  %v2226_v0 = vmul.f32 -0.04202657, %v5003_v52 }
  0xdb   :  { %v2280_v12 = vadd.f32 %v2278_v15, %v2276_v14  ;;  %v2286_v20 = vmul.f32 -0.042257134, %v4972_v36  ;;  %v5136_v33 = vadd.f32 %v5125_v6, %v1960_v16  ;;  %v2230_v17 = vmul.f32 -0.136154, %v5016_v56 }
  0xdc   :  { %v2336_v41 = vadd.f32 %v2334_v42, %v2332_v39  ;;  %v2342_v51 = vmul.f32 -0.322037, %v4926_v13  ;;  %v2096_v1 = vadd.f32 %v2094_v49, %v2092_v58  ;;  %v2224_v5 = vadd.f32 %v2222_v2, %v2220_v54 }
  0xdd   :  { %v2284_v44 = vadd.f32 %v2282_v40, %v2280_v12  ;;  %v2290_v34 = vmul.f32 0.4633815, %v4988_v59  ;;  %v2346_v10 = vmul.f32 -0.20376693, %v4935_v19  ;;  %v2396_v15 = vmul.f32 0.43588674, %v4897_v24 }
  0xde   :  { %v2340_v53 = vadd.f32 %v2338_v25, %v2336_v41  ;;  %v2398_v22 = vmul.f32 -0.0100020645, %v4900_v28  ;;  %v2160_v8 = vadd.f32 %v2158_v48, %v2156_v50  ;;  %v2294_v14 = vmul.f32 -0.36182988, %v4991_v29 }
  0xdf   :  { %v2288_v16 = vadd.f32 %v2286_v20, %v2284_v44  ;;  %v2402_v42 = vmul.f32 -0.42941624, %v4903_v35  ;;  %v2350_v49 = vmul.f32 -0.21818987, %v4950_v23  ;;  %v2406_v58 = vmul.f32 0.012636037, %v4910_v37 }
  0xe0   :  { %v2344_v39 = vadd.f32 %v2342_v51, %v2340_v53  ;;  %v2400_v2 = vadd.f32 %v2398_v22, %v2396_v15  ;;  %v5148_v54 = vmul.f32 %v2096_v1, %v2096_v1  ;;  %v2228_v40 = vadd.f32 %v2226_v0, %v2224_v5 }
  0xe1   :  { %v2234_v25 = vmul.f32 0.35200626, %v5024_v60  ;;  %v2292_v12 = vadd.f32 %v2290_v34, %v2288_v16  ;;  %v2354_v48 = vmul.f32 -0.5202973, %v4960_v11  ;;  %v2410_v20 = vmul.f32 0.21285872, %v4915_v57 }
  0xe2   :  { %6458 = vst [vmem:[#allocation18_spill] sm:$0xff] %v5148_v54  ;;  %v2348_v41 = vadd.f32 %v2346_v10, %v2344_v39  ;;  %v2404_v50 = vadd.f32 %v2402_v42, %v2400_v2  ;;  %v2164_v44 = vadd.f32 %v2162_v18, %v2160_v8  ;;  %v2238_v51 = vmul.f32 -0.011036941, %v5032_v4 }
  0xe3   :  { %v2296_v53 = vadd.f32 %v2294_v14, %v2292_v12  ;;  %v2298_v15 = vmul.f32 -0.005928705, %v5003_v52  ;;  %v2358_v1 = vmul.f32 0.10070074, %v4972_v36  ;;  %v2414_v0 = vmul.f32 -0.22473201, %v4926_v13 }
  0xe4   :  { %v2352_v22 = vadd.f32 %v2350_v49, %v2348_v41  ;;  %v2408_v6 = vadd.f32 %v2406_v58, %v2404_v50  ;;  %v2102_v5 = vsub.f32 %v5136_v33, %v5148_v54  ;;  %v2232_v34 = vadd.f32 %v2230_v17, %v2228_v40 }
  0xe5   :  { %v2302_v10 = vmul.f32 0.018754255, %v5016_v56  ;;  %v2418_v16 = vmul.f32 0.5158163, %v4935_v19  ;;  %v2468_v14 = vmul.f32 -0.20767276, %v4897_v24  ;;  %v2168_v39 = vadd.f32 %v2166_v31, %v2164_v44 }
  0xe6   :  { %v2356_v18 = vadd.f32 %v2354_v48, %v2352_v22  ;;  %v2412_v8 = vadd.f32 %v2410_v20, %v2408_v6  ;;  %v2470_v42 = vmul.f32 0.19328892, %v4900_v28  ;;  %v2300_v49 = vadd.f32 %v2298_v15, %v2296_v53 }
  0xe7   :  { %v2362_v2 = vmul.f32 -0.23017849, %v4988_v59  ;;  %v2474_v58 = vmul.f32 0.2785027, %v4903_v35  ;;  %v2478_v17 = vmul.f32 0.11051745, %v4910_v37  ;;  %v2236_v40 = vadd.f32 %v2234_v25, %v2232_v34 }
  0xe8   :  { %v2360_v12 = vadd.f32 %v2358_v1, %v2356_v18  ;;  %v2416_v41 = vadd.f32 %v2414_v0, %v2412_v8  ;;  %v2472_v50 = vadd.f32 %v2470_v42, %v2468_v14  ;;  %v2306_v7 = vmul.f32 0.09521022, %v5024_v60 }
  0xe9   :  { %v2310_v6 = vmul.f32 -0.56961584, %v5032_v4  ;;  %v5170_v48 = vadd.f32 %v5148_v54, %v5136_v33  ;;  %v2422_v20 = vmul.f32 -0.04667003, %v4950_v23  ;;  %v2482_v53 = vmul.f32 0.49311548, %v4915_v57 }
  0xea   :  { %v2420_v31 = vadd.f32 %v2418_v16, %v2416_v41  ;;  %v2476_v44 = vadd.f32 %v2474_v58, %v2472_v50  ;;  %v5174_v15 = vmul.f32 %v2168_v39, %v2168_v39  ;;  %v2366_v22 = vmul.f32 -0.08008001, %v4991_v29 }
  0xeb   :  { %v2370_v25 = vmul.f32 -0.16767043, %v5003_v52  ;;  %v2374_v1 = vmul.f32 -0.049375158, %v5016_v56  ;;  %v2304_v0 = vadd.f32 %v2302_v10, %v2300_v49  ;;  %v2364_v34 = vadd.f32 %v2362_v2, %v2360_v12 }
  0xec   :  { %v2480_v18 = vadd.f32 %v2478_v17, %v2476_v44  ;;  %v2486_v33 = vmul.f32 0.17025621, %v4926_v13  ;;  %v2240_v8 = vadd.f32 %v2238_v51, %v2236_v40  ;;  %v2378_v16 = vmul.f32 -0.32276356, %v5024_v60 }
  0xed   :  { %v5182_v14 = vmul.f32 0.27459046, %v5032_v4  ;;  %v2426_v42 = vmul.f32 -0.11770881, %v4960_v11  ;;  %v2424_v39 = vadd.f32 %v2422_v20, %v2420_v31  ;;  %v2490_v41 = vmul.f32 0.20062481, %v4935_v19 }
  0xee   :  { %v2484_v58 = vadd.f32 %v2482_v53, %v2480_v18  ;;  %v2540_v50 = vmul.f32 -0.17334987, %v4897_v24  ;;  %v2174_v10 = vsub.f32 %v2102_v5, %v5174_v15  ;;  %v2430_v49 = vmul.f32 0.017814746, %v4972_v36 }
  0xef   :  { %v2542_v2 = vmul.f32 -0.22317246, %v4900_v28  ;;  %v2546_v51 = vmul.f32 0.018384203, %v4903_v35  ;;  %v2308_v12 = vadd.f32 %v2306_v7, %v2304_v0  ;;  %v2368_v17 = vadd.f32 %v2366_v22, %v2364_v34 }
  0xf0   :  { %v2488_v40 = vadd.f32 %v2486_v33, %v2484_v58  ;;  %v2494_v44 = vmul.f32 -0.035365745, %v4950_v23  ;;  %v5192_v54 = vmul.f32 %v2240_v8, %v2240_v8  ;;  %v2434_v31 = vmul.f32 -0.41827205, %v4988_v59 }
  0xf1   :  { %v2544_v20 = vadd.f32 %v2542_v2, %v2540_v50  ;;  %v2550_v53 = vmul.f32 -0.03534861, %v4910_v37  ;;  %v2428_v18 = vadd.f32 %v2426_v42, %v2424_v39  ;;  %v2438_v5 = vmul.f32 0.14922166, %v4991_v29 }
  0xf2   :  { %v2492_v43 = vadd.f32 %v2490_v41, %v2488_v40  ;;  %v2498_v38 = vmul.f32 -0.30283126, %v4960_v11  ;;  %v2442_v45 = vmul.f32 -0.031979617, %v5003_v52  ;;  %v5200_v7 = vmul.f32 0.16279818, %v5016_v56 }
  0xf3   :  { %v2548_v22 = vadd.f32 %v2546_v51, %v2544_v20  ;;  %v2554_v0 = vmul.f32 -0.098390706, %v4915_v57  ;;  %v2312_v34 = vadd.f32 %v2310_v6, %v2308_v12  ;;  %v2372_v33 = vadd.f32 %v2370_v25, %v2368_v17 }
  0xf4   :  { %v5204_v8 = vmul.f32 -0.056323968, %v5024_v60  ;;  %v2496_v58 = vadd.f32 %v2494_v44, %v2492_v43  ;;  %v2246_v42 = vsub.f32 %v2174_v10, %v5192_v54  ;;  %v5208_v39 = vmul.f32 0.138554, %v5032_v4 }
  0xf5   :  { %v2552_v41 = vadd.f32 %v2550_v53, %v2548_v22  ;;  %v2558_v50 = vmul.f32 0.34535056, %v4926_v13  ;;  %v2432_v2 = vadd.f32 %v2430_v49, %v2428_v18  ;;  %v2502_v51 = vmul.f32 0.3510412, %v4972_v36 }
  0xf6   :  { %v2500_v40 = vadd.f32 %v2498_v38, %v2496_v58  ;;  %v2612_v20 = vmul.f32 -0.22524354, %v4897_v24  ;;  %v2562_v25 = vmul.f32 0.25705475, %v4935_v19  ;;  %v2614_v12 = vmul.f32 -0.16976355, %v4900_v28 }
  0xf7   :  { %v2556_v6 = vadd.f32 %v2554_v0, %v2552_v41  ;;  %v2618_v43 = vmul.f32 -0.5593767, %v4903_v35  ;;  %v5216_v10 = vmul.f32 %v2312_v34, %v2312_v34  ;;  %v2376_v17 = vadd.f32 %v2374_v1, %v2372_v33 }
  0xf8   :  { %v2506_v44 = vmul.f32 0.049280945, %v4988_v59  ;;  %v2510_v53 = vmul.f32 -0.068489514, %v4991_v29  ;;  %v2566_v38 = vmul.f32 -0.39045212, %v4950_v23  ;;  %v2616_v18 = vadd.f32 %v2614_v12, %v2612_v20 }
  0xf9   :  { %6459 = vst [vmem:[#allocation19_spill] sm:$0xff] %v5216_v10  ;;  %v2560_v49 = vadd.f32 %v2558_v50, %v2556_v6  ;;  %v2622_v22 = vmul.f32 0.177615, %v4910_v37  ;;  %v2436_v0 = vadd.f32 %v2434_v31, %v2432_v2  ;;  %v2504_v58 = vadd.f32 %v2502_v51, %v2500_v40 }
  0xfa   :  { %v2514_v41 = vmul.f32 -0.4375433, %v5003_v52  ;;  %v5224_v55 = vmul.f32 0.15559499, %v5016_v56  ;;  %v2570_v1 = vmul.f32 0.03490981, %v4960_v11  ;;  %v2620_v33 = vadd.f32 %v2618_v43, %v2616_v18 }
  0xfb   :  { %v2564_v34 = vadd.f32 %v2562_v25, %v2560_v49  ;;  %v2626_v46 = vmul.f32 0.054189786, %v4915_v57  ;;  %v2318_v50 = vsub.f32 %v2246_v42, %v5216_v10  ;;  %v2380_v6 = vadd.f32 %v2378_v16, %v2376_v17 }
  0xfc   :  { %v5230_v20 = vmul.f32 -0.22008787, %v5024_v60  ;;  %v5233_v31 = vmul.f32 -0.17301363, %v5032_v4  ;;  %v2574_v40 = vmul.f32 -0.57168925, %v4972_v36  ;;  %v2624_v51 = vadd.f32 %v2622_v22, %v2620_v33 }
  0xfd   :  { %v2568_v2 = vadd.f32 %v2566_v38, %v2564_v34  ;;  %v2630_v25 = vmul.f32 0.13485135, %v4926_v13  ;;  %v2440_v12 = vadd.f32 %v2438_v5, %v2436_v0  ;;  %v2508_v49 = vadd.f32 %v2506_v44, %v2504_v58 }
  0xfe   :  { %v2634_v43 = vmul.f32 -0.3693622, %v4935_v19  ;;  %v2684_v18 = vmul.f32 0.1121082, %v4897_v24  ;;  %v2628_v16 = vadd.f32 %v2626_v46, %v2624_v51  ;;  %v2686_v17 = vmul.f32 0.060212225, %v4900_v28 }
  0xff   :  { %v2572_v42 = vadd.f32 %v2570_v1, %v2568_v2  ;;  %v2690_v32 = vmul.f32 0.31969616, %v4903_v35  ;;  %v2384_v27 = vadd.f32 %v5182_v14, %v2380_v6  ;;  %v2578_v38 = vmul.f32 0.11030852, %v4988_v59 }
 0x100   :  { %v2582_v22 = vmul.f32 -0.052858215, %v4991_v29  ;;  %v2638_v34 = vmul.f32 0.29794922, %v4950_v23  ;;  %v2632_v44 = vadd.f32 %v2630_v25, %v2628_v16  ;;  %v2688_v0 = vadd.f32 %v2686_v17, %v2684_v18 }
 0x101   :  { %v2576_v5 = vadd.f32 %v2574_v40, %v2572_v42  ;;  %v2694_v58 = vmul.f32 0.37718755, %v4910_v37  ;;  %v2444_v33 = vadd.f32 %v2442_v45, %v2440_v12  ;;  %v2512_v1 = vadd.f32 %v2510_v53, %v2508_v49 }
 0x102   :  { %v2586_v46 = vmul.f32 -0.11827066, %v5003_v52  ;;  %v2590_v2 = vmul.f32 0.4082859, %v5016_v56  ;;  %v2636_v51 = vadd.f32 %v2634_v43, %v2632_v44  ;;  %v2642_v14 = vmul.f32 -0.029581817, %v4960_v11 }
 0x103   :  { %v2692_v6 = vadd.f32 %v2690_v32, %v2688_v0  ;;  %v2698_v9 = vmul.f32 0.036679335, %v4915_v57  ;;  %v5250_v3 = vmul.f32 %v2384_v27, %v2384_v27  ;;  %v2580_v61 = vadd.f32 %v2578_v38, %v2576_v5 }
 0x104   :  { %v2594_v40 = vmul.f32 -0.17733715, %v5024_v60  ;;  %v5254_v25 = vmul.f32 0.12623627, %v5032_v4  ;;  %v2640_v45 = vadd.f32 %v2638_v34, %v2636_v51  ;;  %v2646_v53 = vmul.f32 -0.07926444, %v4972_v36 }
 0x105   :  { %6460 = vst [vmem:[#allocation20_spill] sm:$0xff] %v5250_v3  ;;  %v2696_v12 = vadd.f32 %v2694_v58, %v2692_v6  ;;  %v2702_v49 = vmul.f32 -0.42536777, %v4926_v13  ;;  %v2448_v43 = vadd.f32 %v5200_v7, %v2444_v33  ;;  %v2516_v18 = vadd.f32 %v2514_v41, %v2512_v1 }
 0x106   :  { %v2650_v32 = vmul.f32 -0.16653843, %v4988_v59  ;;  %v2756_v27 = vmul.f32 0.15379748, %v4897_v24  ;;  %v2644_v42 = vadd.f32 %v2642_v14, %v2640_v45  ;;  %v2706_v17 = vmul.f32 0.0034906256, %v4935_v19 }
 0x107   :  { %v2700_v16 = vadd.f32 %v2698_v9, %v2696_v12  ;;  %v2758_v38 = vmul.f32 0.6405471, %v4900_v28  ;;  %v2584_v5 = vadd.f32 %v2582_v22, %v2580_v61  ;;  %v2654_v34 = vmul.f32 0.03624305, %v4991_v29 }
 0x108   :  { %v2710_v44 = vmul.f32 -0.23316088, %v4950_v23  ;;  %v2762_v0 = vmul.f32 -0.13205218, %v4903_v35  ;;  %v2648_v58 = vadd.f32 %v2646_v53, %v2644_v42  ;;  %v2766_v33 = vmul.f32 0.09509476, %v4910_v37 }
 0x109   :  { %v2704_v7 = vadd.f32 %v2702_v49, %v2700_v16  ;;  %v2760_v41 = vadd.f32 %v2758_v38, %v2756_v27  ;;  %v2390_v1 = vadd.f32 %v5250_v3, %v2318_v50  ;;  %v2452_v9 = vadd.f32 %v5204_v8, %v2448_v43 }
 0x10a   :  { %v2520_v51 = vadd.f32 %v5224_v55, %v2516_v18  ;;  %v2714_v14 = vmul.f32 0.26998606, %v4960_v11  ;;  %v2652_v61 = vadd.f32 %v2650_v32, %v2648_v58  ;;  %v2770_v45 = vmul.f32 -0.050197896, %v4915_v57 }
 0x10b   :  { %v2708_v22 = vadd.f32 %v2706_v17, %v2704_v7  ;;  %v2764_v6 = vadd.f32 %v2762_v0, %v2760_v41  ;;  %v2588_v12 = vadd.f32 %v2586_v46, %v2584_v5  ;;  %v2658_v53 = vmul.f32 -0.05200314, %v5003_v52 }
 0x10c   :  { %v2718_v49 = vmul.f32 -0.31256756, %v4972_v36  ;;  %v2172_v27 = vadd.f32 %v5174_v15, %v5170_v48  ;;  %v2656_v50 = vadd.f32 %v2654_v34, %v2652_v61  ;;  %v2774_v55 = vmul.f32 0.23410332, %v4926_v13 }
 0x10d   :  { %v2712_v42 = vadd.f32 %v2710_v44, %v2708_v22  ;;  %v2768_v8 = vadd.f32 %v2766_v33, %v2764_v6  ;;  %v2456_v43 = vadd.f32 %v5208_v39, %v2452_v9  ;;  %v2524_v18 = vadd.f32 %v5230_v20, %v2520_v51 }
 0x10e   :  { %v2662_v32 = vmul.f32 0.10225741, %v5016_v56  ;;  %v2666_v46 = vmul.f32 -0.4314463, %v5024_v60  ;;  %v2722_v17 = vmul.f32 -0.14268771, %v4988_v59  ;;  %v2592_v48 = vadd.f32 %v2590_v2, %v2588_v12 }
 0x10f   :  { %v2716_v16 = vadd.f32 %v2714_v14, %v2712_v42  ;;  %v2772_v38 = vadd.f32 %v2770_v45, %v2768_v8  ;;  %v2778_v5 = vmul.f32 -0.055021897, %v4935_v19  ;;  %v2726_v34 = vmul.f32 0.048368063, %v4991_v29 }
 0x110   :  { %v2828_v44 = vmul.f32 0.39887947, %v4897_v24  ;;  %v2244_v0 = vadd.f32 %v5192_v54, %v2172_v27  ;;  %v2660_v39 = vadd.f32 %v2658_v53, %v2656_v50  ;;  %v2782_v7 = vmul.f32 -0.06747322, %v4950_v23 }
 0x111   :  { %v2720_v58 = vadd.f32 %v2718_v49, %v2716_v16  ;;  %v2776_v20 = vadd.f32 %v2774_v55, %v2772_v38  ;;  %v5287_v41 = vmul.f32 %v2456_v43, %v2456_v43  ;;  %v2528_v33 = vadd.f32 %v5233_v31, %v2524_v18 }
 0x112   :  { %v2830_v9 = vmul.f32 -0.06535791, %v4900_v28  ;;  %v2834_v51 = vmul.f32 -0.22901326, %v4903_v35  ;;  %v2730_v14 = vmul.f32 -0.0801491, %v5003_v52  ;;  %v2596_v22 = vadd.f32 %v2594_v40, %v2592_v48 }
 0x113   :  { %6461 = vst [vmem:[#allocation21_spill] sm:$0xff] %v5287_v41  ;;  %v2724_v2 = vadd.f32 %v2722_v17, %v2720_v58  ;;  %v2780_v61 = vadd.f32 %v2778_v5, %v2776_v20  ;;  %v2786_v24 = vmul.f32 -0.3478909, %v4960_v11  ;;  %v2838_v45 = vmul.f32 0.1329734, %v4910_v37 }
 0x114   :  { %v2832_v6 = vadd.f32 %v2830_v9, %v2828_v44  ;;  %v2316_v12 = vadd.f32 %v5216_v10, %v2244_v0  ;;  %v2664_v53 = vadd.f32 %v2662_v32, %v2660_v39  ;;  %v2790_v31 = vmul.f32 -0.24118927, %v4972_v36 }
 0x115   :  { %v2728_v49 = vadd.f32 %v2726_v34, %v2724_v2  ;;  %v2784_v27 = vadd.f32 %v2782_v7, %v2780_v61  ;;  %v2670_v28 = vmul.f32 -0.30685392, %v5032_v4  ;;  %v2734_v35 = vmul.f32 -0.26741216, %v5016_v56 }
 0x116   :  { %v2836_v50 = vadd.f32 %v2834_v51, %v2832_v6  ;;  %v2842_v42 = vmul.f32 0.044230055, %v4915_v57  ;;  %v2462_v8 = vadd.f32 %v5287_v41, %v2390_v1  ;;  %v2794_v37 = vmul.f32 0.2539412, %v4988_v59 }
 0x117   :  { %v2732_v40 = vadd.f32 %v2730_v14, %v2728_v49  ;;  %v2788_v55 = vadd.f32 %v2786_v24, %v2784_v27  ;;  %v5302_v43 = vmul.f32 %v2528_v33, %v2528_v33  ;;  %v2846_v32 = vmul.f32 0.06287455, %v4926_v13  ;;  %v6464_v24 = vld [vmem:[#allocation11_spill] sm:$0xff] }
 0x118   :  { %v2840_v18 = vadd.f32 %v2838_v45, %v2836_v50  ;;  %v2388_v16 = vsub.f32 %v2316_v12, %v5250_v3  ;;  %vm487_vm7 = vcmp.lt.s32.totalorder %v4929_v30, 1  ;;  %v2600_v17 = vadd.f32 %v5254_v25, %v2596_v22  ;;  %v6467_v50 = vld [vmem:[#allocation9_spill] sm:$0xff] }
 0x119   :  { %6462 = vst [vmem:[#allocation22_spill] sm:$0xff] %v5302_v43  ;;  %v2668_v38 = vadd.f32 %v2666_v46, %v2664_v53  ;;  %v2792_v5 = vadd.f32 %v2790_v31, %v2788_v55  ;;  %v2798_v57 = vmul.f32 0.3794028, %v4991_v29  ;;  %v2736_v1 = vadd.f32 %v2734_v35, %v2732_v40  ;;  %v6466_v35 = vld [vmem:[#allocation10_spill] sm:$0xff] }
 0x11a   :  { %v2738_v48 = vmul.f32 -0.37597, %v5024_v60  ;;  %v2844_v34 = vadd.f32 %v2842_v42, %v2840_v18  ;;  %v2850_v44 = vmul.f32 -0.4378169, %v4935_v19  ;;  %v2802_v39 = vmul.f32 0.17571232, %v5003_v52 }
 0x11b   :  { %v2796_v0 = vadd.f32 %v2794_v37, %v2792_v5  ;;  %v483_v13 = vor.u32 %v4969_v47, %v4944_v21  ;;  %vm490_vm9 = vcmp.lt.s32.totalorder %v4929_v30, 4  ;;  %v2534_v25 = vadd.f32 %v5302_v43, %v2462_v8  ;;  %v6468_v8 = vld [vmem:[#allocation12_spill] sm:$0xff] }
 0x11c   :  { %v2848_v46 = vadd.f32 %v2846_v32, %v2844_v34  ;;  %v2854_v58 = vmul.f32 -0.4670429, %v4950_v23  ;;  %v2460_v20 = vsub.f32 %v2388_v16, %v5287_v41  ;;  %vm488_vm12 = vcmp.lt.s32.totalorder %v4929_v30, 2  ;;  %v3620_v32 = vld [vmem:[%s6369_s0 + $0x20] sm:$0xff] }
 0x11d   :  { %v5319_v7 = vmul.f32 %v2600_v17, %v2600_v17  ;;  %v2672_v19 = vadd.f32 %v2670_v28, %v2668_v38  ;;  %v2800_v33 = vadd.f32 %v2798_v57, %v2796_v0  ;;  %v2806_v9 = vmul.f32 -0.17115043, %v5016_v56 }
 0x11e   :  { %v2740_v51 = vadd.f32 %v2738_v48, %v2736_v1  ;;  %v2742_v21 = vmul.f32 -0.30015677, %v5032_v4  ;;  %v2852_v47 = vadd.f32 %v2850_v44, %v2848_v46  ;;  %v2858_v2 = vmul.f32 0.19021145, %v4960_v11  ;;  %v6470_v48 = vld [vmem:[#allocation7_spill] sm:$0xff] }
 0x11f   :  { %6463 = vst [vmem:[#allocation23_spill] sm:$0xff] %v5319_v7  ;;  %v2804_v14 = vadd.f32 %v2802_v39, %v2800_v33  ;;  %v2810_v61 = vmul.f32 -0.15407239, %v5024_v60  ;;  %v480_v23 = vor.u32 %v4966_v62, %v4939_v63  ;;  %v486_v22 = vor.u32 %v6464_v24, %v4947_v26  ;;  %v6475_v24 = vld [vmem:[#allocation6_spill] sm:$0xff] }
 0x120   :  { %v2856_v6 = vadd.f32 %v2854_v58, %v2852_v47  ;;  %v2862_v45 = vmul.f32 0.22653322, %v4972_v36  ;;  %v2532_v12 = vsub.f32 %v2460_v20, %v5302_v43  ;;  %vm489_vm13 = vcmp.lt.s32.totalorder %v4929_v30, 3 }
 0x121   :  { %v2606_v53 = vadd.f32 %v5319_v7, %v2534_v25  ;;  %v5333_v49 = vmul.f32 %v2672_v19, %v2672_v19  ;;  %v2808_v11 = vadd.f32 %v2806_v9, %v2804_v14  ;;  %v496_v27 = vsel %vm490_vm9, %v483_v13, 920167782 }
 0x122   :  { %v2744_v31 = vadd.f32 %v2742_v21, %v2740_v51  ;;  %v2860_v63 = vadd.f32 %v2858_v2, %v2856_v6  ;;  %v2866_v62 = vmul.f32 0.22427572, %v4988_v59  ;;  %v492_v26 = vsel %vm490_vm9, %v480_v23, 2102212464 }
 0x123   :  { %6465 = vst [vmem:[#allocation11_spill] sm:$0xff] %v5333_v49  ;;  %v2812_v36 = vadd.f32 %v2810_v61, %v2808_v11  ;;  %v2814_v28 = vmul.f32 0.055876024, %v5032_v4  ;;  %v491_v42 = vsel %vm487_vm7, %v6467_v50, %v6466_v35  ;;  %v495_v40 = vsel %vm487_vm7, %v6466_v35, %v6468_v8  ;;  %v6473_v61 = vld [vmem:[#allocation8_spill] sm:$0xff] }
 0x124   :  { %v2864_v55 = vadd.f32 %v2862_v45, %v2860_v63  ;;  %v2870_v37 = vmul.f32 0.057605274, %v4991_v29  ;;  %v2604_v59 = vsub.f32 %v2532_v12, %v5319_v7  ;;  %v497_v18 = vsel %vm489_vm13, %v480_v23, %v496_v27 }
 0x125   :  { %v2678_v16 = vsub.f32 %v2606_v53, %v5333_v49  ;;  %v2874_v17 = vmul.f32 -0.4258715, %v5003_v52  ;;  %v493_v38 = vsel %vm489_vm13, %v6468_v8, %v492_v26  ;;  %v499_v29 = vsel %vm487_vm7, %v6468_v8, %v480_v23 }
 0x126   :  { %v5364_v5 = vmul.f32 %v2744_v31, %v2744_v31  ;;  %v2868_v57 = vadd.f32 %v2866_v62, %v2864_v55  ;;  %v500_v1 = vsel %vm490_vm9, %v486_v22, 1326507024  ;;  %v6471_v34 = vor.u32 8388608, %v6470_v48  ;;  %v3638_v31 = vld [vmem:[%s6369_s0 + $0x30] sm:$0xff] }
 0x127   :  { %v2816_v0 = vadd.f32 %v2814_v28, %v2812_v36  ;;  %v498_v52 = vsel %vm488_vm12, %v495_v40, %v497_v18  ;;  %v501_v39 = vsel %vm489_vm13, %v483_v13, %v500_v1  ;;  %v5374_v25 = vmul.f32 0.5, %v3620_v32 }
 0x128   :  { %6469 = vst [vmem:[#allocation10_spill] sm:$0xff] %v5364_v5  ;;  %v503_v44 = vshll.u32 %v6471_v34, 8  ;;  %v2872_v46 = vadd.f32 %v2870_v37, %v2868_v57  ;;  %v2878_v58 = vmul.f32 0.056487348, %v5016_v56  ;;  %v2676_v20 = vsub.f32 %v2604_v59, %v5333_v49 }
 0x129   :  { %v502_v19 = vsel %vm488_vm12, %v499_v29, %v501_v39  ;;  %v494_v33 = vsel %vm488_vm12, %v491_v42, %v493_v38  ;;  %v2882_v47 = vmul.f32 0.07614712, %v5024_v60  ;;  %v2750_v56 = vsub.f32 %v2678_v16, %v5364_v5 }
 0x12a   :  { %v5382_v9 = vmul.u32.u64.low %v503_v44, %v502_v19  ;;  %v5383_v51 = vmul.u32.u64.high %v503_v44, %v502_v19, %v5382_v9  ;;  %v2876_v21 = vadd.f32 %v2874_v17, %v2872_v46  ;;  %v5391_v14 = vmul.f32 %v2816_v0, %v2816_v0 }
 0x12b   :  { %v5386_v13 = vmul.u32.u64.low %v503_v44, %v498_v52  ;;  %v5387_v2 = vmul.u32.u64.high %v503_v44, %v498_v52, %v5386_v13  ;;  %v6474_v23 = vshll.u32 %v6473_v61, 30  ;;  %v877_v30 = vand.u32 2139095040, %v5374_v25 }
 0x12c   :  { %6472 = vst [vmem:[#allocation9_spill] sm:$0xff] %v5391_v14  ;;  %v2880_v6 = vadd.f32 %v2878_v58, %v2876_v21  ;;  %v2886_v45 = vmul.f32 0.13892782, %v5032_v4  ;;  %v2748_v60 = vsub.f32 %v2676_v20, %v5364_v5  ;;  %v510_v12 = vmul.u32 %v503_v44, %v494_v33 }
 0x12d   :  { %v5396_v22 = vsub.s32 %v6475_v24, %v6474_v23  ;;  %vm512_vm10 = vc.u32 %v5383_v51, %v5386_v13  ;;  %v513_v11 = vadd.s32 1, %v5387_v2  ;;  %v878_v27 = vshrl.u32 %v877_v30, 23 }
 0x12e   :  { %v2884_v53 = vadd.f32 %v2882_v47, %v2880_v6  ;;  %v2822_v63 = vsub.f32 %v2750_v56, %v5391_v14  ;;  %v2820_v4 = vsub.f32 %v2748_v60, %v5391_v14  ;;  %v5411_v50 = vmul.f32 0.5, %v3638_v31 }
 0x12f   :  { %v102_v62 = vsub.s32 0, %v5396_v22  ;;  %v514_v36 = vsel %vm512_vm10, %v513_v11, %v5387_v2  ;;  %v3622_v28 = vadd.s32 4294967169, %v878_v27  ;;  %v874_v57 = vand.u32 2147483647, %v5374_v25 }
 0x130   :  { %v2888_v26 = vadd.f32 %v2886_v45, %v2884_v53  ;;  %v515_v35 = vadd.s32 %v514_v36, %v510_v12  ;;  %v1296_v16 = vand.u32 2139095040, %v5411_v50  ;;  %v6477_v46 = vmov 683565275  }
 0x131   :  { %v884_v8 = vadd.s32 1, %v3622_v28  ;;  %v3587_v40 = vmin.u32 %v102_v62, %v5396_v22  ;;  %v881_v52 = vand.u32 8388607, %v874_v57  ;;  %v6478_v20 = vmov 2475754826   ;;  %v6483_v28 = vld [vmem:[#allocation5_spill] sm:$0xff] }
 0x132   :  { %v5413_v42 = vmul.f32 %v2888_v26, %v2888_v26  ;;  %v516_v55 = vadd.s32 536870912, %v515_v35  ;;  %v1297_v34 = vshrl.u32 %v1296_v16, 23  ;;  %v6479_v21 = vmov 2131351028  }
 0x133   :  { %vm885_vm11 = vcmp.gt.s32.totalorder %v884_v8, 0  ;;  %v104_v38 = vclz %v3587_v40  ;;  %v6480_v2 = vmov 2102212464   ;;  %v1293_v30 = vand.u32 2147483647, %v5411_v50 }
 0x134   :  { %6476 = vst [vmem:[#allocation12_spill] sm:$0xff] %v5413_v42  ;;  %v2894_v37 = vsub.f32 %v2822_v63, %v5413_v42  ;;  %v2892_v59 = vsub.f32 %v2820_v4, %v5413_v42  ;;  %v5418_v18 = vshrl.u32 %v516_v55, 30  ;;  %v886_v32 = vsel %vm885_vm11, %v884_v8, 0 }
 0x135   :  { %v888_v17 = vand.u32 31, %v886_v32  ;;  %v3588_v44 = vadd.s32 4294967294, %v104_v38  ;;  %v887_v39 = vshrl.u32 %v886_v32, 5  ;;  %v3640_v33 = vadd.s32 4294967169, %v1297_v34 }
 0x136   :  { %3028 = vmatprep.mubr.f32.mxu0 %v2894_v37  ;;  %3098 = vmatprep.mubr.f32.mxu1 %v2892_v59  ;;  %v518_v29 = vshll.u32 %v5418_v18, 30  ;;  %v6481_v45 = vmov 920167782   ;;  %v6482_v53 = vmov 1326507024   ;;  %v882_v27 = vor.u32 8388608, %v881_v52 }
 0x137   :  { %v889_v48 = vsub.s32 32, %v888_v17  ;;  %v891_v58 = vshll.u32 %v6477_v46, %v888_v17  ;;  %v894_v9 = vshll.u32 %v6478_v20, %v888_v17  ;;  %v897_v47 = vshll.u32 %v6479_v21, %v888_v17 }
 0x138   :  { %v5423_v1 = vsub.s32 %v515_v35, %v518_v29  ;;  %v900_v56 = vshll.u32 %v6480_v2, %v888_v17  ;;  %vm3589_vm14 = vcmp.lt.s32.totalorder %v3588_v44, 0  ;;  %v903_v12 = vshll.u32 %v6481_v45, %v888_v17  ;;  %v6484_v35 = vld [vmem:[#allocation4_spill] sm:$0xff] }
 0x139   :  { %v892_v19 = vshrl.u32 %v6478_v20, %v889_v48  ;;  %v895_v23 = vshrl.u32 %v6479_v21, %v889_v48  ;;  %v898_v24 = vshrl.u32 %v6480_v2, %v889_v48  ;;  %v901_v60 = vshrl.u32 %v6481_v45, %v889_v48 }
 0x13a   :  { %v521_v0 = vsub.s32 0, %v5423_v1  ;;  %v904_v11 = vshrl.u32 %v6482_v53, %v889_v48  ;;  %vm906_vm15 = vcmp.lt.s32.totalorder %v887_v39, 1  ;;  %v1303_v63 = vadd.s32 1, %v3640_v33 }
 0x13b   :  { %v893_v31 = vor.u32 %v892_v19, %v891_v58  ;;  %v896_v62 = vor.u32 %v895_v23, %v894_v9  ;;  %v899_v26 = vor.u32 %v898_v24, %v897_v47  ;;  %v902_v4 = vor.u32 %v901_v60, %v900_v56 }
 0x13c   :  { %v3605_v6 = vmin.u32 %v521_v0, %v5423_v1  ;;  %v905_v36 = vor.u32 %v904_v11, %v903_v12  ;;  %v92_v8 = vadd.s32 %v6484_v35, %v6483_v28  ;;  %v5443_v40 = vsel %vm3589_vm14, 0, %v3588_v44 }
 0x13d   :  { %v890_v55 = vshrl.u32 %v6477_v46, %v889_v48  ;;  %vm909_vm0 = vcmp.lt.s32.totalorder %v887_v39, 4  ;;  %v108_v37 = vsub.s32 32, %v5443_v40  ;;  %vm908_vm1 = vcmp.lt.s32.totalorder %v887_v39, 3 }
 0x13e   :  { %v523_v59 = vclz %v3605_v6  ;;  %v911_v32 = vsel %vm909_vm0, %v899_v26, 2102212464  ;;  %vm907_vm3 = vcmp.lt.s32.totalorder %v887_v39, 2  ;;  %v914_v16 = vsel %vm906_vm15, %v893_v31, %v896_v62 }
 0x13f   :  { %v922_v17 = vshll.u32 %v882_v27, 8  ;;  %vm1304_vm4 = vcmp.gt.s32.totalorder %v1303_v63, 0  ;;  %v915_v38 = vsel %vm909_vm0, %v902_v4, 920167782  ;;  %v918_v29 = vsel %vm906_vm15, %v896_v62, %v899_v26 }
 0x140   :  { %v919_v34 = vsel %vm909_vm0, %v905_v36, 1326507024  ;;  %v1300_v44 = vand.u32 8388607, %v1293_v30  ;;  %v910_v48 = vsel %vm906_vm15, %v890_v55, %v893_v31  ;;  %v912_v0 = vsel %vm908_vm1, %v896_v62, %v911_v32 }
 0x141   :  { %v916_v52 = vsel %vm908_vm1, %v899_v26, %v915_v38  ;;  %v920_v58 = vsel %vm908_vm1, %v902_v4, %v919_v34  ;;  %v3606_v19 = vadd.s32 4294967294, %v523_v59  ;;  %v1305_v47 = vsel %vm1304_vm4, %v1303_v63, 0 }
 0x142   :  { %v917_v33 = vsel %vm907_vm3, %v914_v16, %v916_v52  ;;  %v921_v9 = vsel %vm907_vm3, %v918_v29, %v920_v58  ;;  %v913_v24 = vsel %vm907_vm3, %v910_v48, %v912_v0  ;;  %v1307_v12 = vand.u32 31, %v1305_v47 }
 0x143   :  { %v5454_v56 = vmul.u32.u64.low %v922_v17, %v921_v9  ;;  %v5455_v23 = vmul.u32.u64.high %v922_v17, %v921_v9, %v5454_v56  ;;  %v5458_v6 = vmul.u32.u64.low %v922_v17, %v917_v33  ;;  %v5459_v60 = vmul.u32.u64.high %v922_v17, %v917_v33, %v5458_v6 }
 0x144   :  { %v109_v11 = vshll.u32 %v5396_v22, %v5443_v40  ;;  %v5464_v27 = vshrl.u32 %v92_v8, %v108_v37  ;;  %v112_v31 = vsub.s32 4294967266, %v5443_v40  ;;  %v1301_v62 = vor.u32 8388608, %v1300_v44 }
 0x145   :  { %vm3607_vm2 = vcmp.lt.s32.totalorder %v3606_v19, 0  ;;  %v1308_v63 = vsub.s32 32, %v1307_v12  ;;  %v1310_v26 = vshll.u32 %v6477_v46, %v1307_v12  ;;  %v1313_v39 = vshll.u32 %v6478_v20, %v1307_v12 }
 0x146   :  { %v929_v4 = vmul.u32 %v922_v17, %v913_v24  ;;  %vm931_vm5 = vc.u32 %v5455_v23, %v5458_v6  ;;  %v1316_v36 = vshll.u32 %v6479_v21, %v1307_v12  ;;  %v1319_v28 = vshll.u32 %v6480_v2, %v1307_v12 }
 0x147   :  { %v932_v35 = vadd.s32 1, %v5459_v60  ;;  %v1306_v8 = vshrl.u32 %v1305_v47, 5  ;;  %v1311_v55 = vshrl.u32 %v6478_v20, %v1308_v63  ;;  %v1314_v37 = vshrl.u32 %v6479_v21, %v1308_v63 }
 0x148   :  { %v526_v59 = vsel %vm3607_vm2, 0, %v3606_v19  ;;  %v1317_v32 = vshrl.u32 %v6480_v2, %v1308_v63  ;;  %v1320_v16 = vshrl.u32 %v6481_v45, %v1308_v63  ;;  %v1322_v17 = vshll.u32 %v6481_v45, %v1307_v12 }
 0x149   :  { %v933_v38 = vsel %vm931_vm5, %v932_v35, %v5459_v60  ;;  %v1312_v29 = vor.u32 %v1311_v55, %v1310_v26  ;;  %v1315_v34 = vor.u32 %v1314_v37, %v1313_v39  ;;  %v1323_v44 = vshrl.u32 %v6482_v53, %v1308_v63 }
 0x14a   :  { %v113_v48 = vadd.s32 127, %v112_v31  ;;  %v934_v0 = vadd.s32 %v933_v38, %v929_v4  ;;  %v1318_v52 = vor.u32 %v1317_v32, %v1316_v36  ;;  %v1321_v58 = vor.u32 %v1320_v16, %v1319_v28 }
 0x14b   :  { %v531_v20 = vsub.s32 4294967266, %v526_v59  ;;  %v1309_v21 = vshrl.u32 %v6477_v46, %v1308_v63  ;;  %vm1325_vm6 = vcmp.lt.s32.totalorder %v1306_v8, 1  ;;  %vm1327_vm8 = vcmp.lt.s32.totalorder %v1306_v8, 3 }
 0x14c   :  { %v935_v2 = vadd.s32 536870912, %v934_v0  ;;  %v1324_v19 = vor.u32 %v1323_v44, %v1322_v17  ;;  %vm1326_vm7 = vcmp.lt.s32.totalorder %v1306_v8, 2  ;;  %vm1328_vm9 = vcmp.lt.s32.totalorder %v1306_v8, 4 }
 0x14d   :  { %v1330_v45 = vsel %vm1328_vm9, %v1318_v52, 2102212464  ;;  %v1333_v33 = vsel %vm1325_vm6, %v1312_v29, %v1315_v34  ;;  %v1334_v9 = vsel %vm1328_vm9, %v1321_v58, 920167782  ;;  %v1341_v53 = vshll.u32 %v1301_v62, 8 }
 0x14e   :  { %v511_v47 = vadd.s32 %v5386_v13, %v5383_v51  ;;  %v527_v56 = vsub.s32 32, %v526_v59  ;;  %v5487_v24 = vshrl.u32 %v935_v2, 30  ;;  %v1335_v46 = vsel %vm1327_vm8, %v1318_v52, %v1334_v9 }
 0x14f   :  { %v114_v60 = vshll.u32 %v113_v48, 23  ;;  %v532_v12 = vadd.s32 127, %v531_v20  ;;  %v1336_v31 = vsel %vm1326_vm7, %v1333_v33, %v1335_v46  ;;  %v1337_v63 = vsel %vm1325_vm6, %v1315_v34, %v1318_v52 }
 0x150   :  { %v937_v26 = vshll.u32 %v5487_v24, 30  ;;  %v1329_v39 = vsel %vm1325_vm6, %v1309_v21, %v1312_v29  ;;  %v1331_v62 = vsel %vm1327_vm8, %v1315_v34, %v1330_v45  ;;  %v1338_v4 = vsel %vm1328_vm9, %v1324_v19, 1326507024 }
 0x151   :  { %v1339_v51 = vsel %vm1327_vm8, %v1321_v58, %v1338_v4  ;;  %v5497_v13 = vmul.u32.u64.low %v1341_v53, %v1336_v31  ;;  %v5498_v36 = vmul.u32.u64.high %v1341_v53, %v1336_v31, %v5497_v13  ;;  %v528_v28 = vshll.u32 %v5423_v1, %v526_v59  ;;  %v6485_v31 = vld [vmem:[#allocation2_spill] sm:$0xff] }
 0x152   :  { %v529_v35 = vshrl.u32 %v511_v47, %v527_v56  ;;  %v938_v55 = vsub.s32 %v934_v0, %v937_v26  ;;  %v1340_v37 = vsel %vm1326_vm7, %v1337_v63, %v1339_v51  ;;  %v533_v32 = vshll.u32 %v532_v12, 23 }
 0x153   :  { %v1332_v16 = vsel %vm1326_vm7, %v1329_v39, %v1331_v62  ;;  %v5504_v17 = vmul.u32.u64.low %v1341_v53, %v1340_v37  ;;  %v5505_v38 = vmul.u32.u64.high %v1341_v53, %v1340_v37, %v5504_v17  ;;  %v111_v29 = vor.u32 %v5464_v27, %v109_v11 }
 0x154   :  { %v115_v34 = vor.u32 4788187, %v114_v60  ;;  %v940_v44 = vsub.s32 0, %v938_v55  ;;  %v1351_v48 = vadd.s32 1, %v5498_v36  ;;  %v1348_v59 = vmul.u32 %v1341_v53, %v1332_v16 }
 0x155   :  { %v530_v0 = vor.u32 %v529_v35, %v528_v28  ;;  %v534_v52 = vor.u32 4788187, %v533_v32  ;;  %vm1350_vm12 = vc.u32 %v5505_v38, %v5497_v13  ;;  %v118_v58 = vcvt.s32.f32 %v111_v29  ;;  %v6489_v28 = vld [vmem:[#allocation3_spill] sm:$0xff] }
 0x156   :  { %v3623_v1 = vmin.u32 %v940_v44, %v938_v55  ;;  %v116_v8 = vand.u32 2147483647, %v115_v34  ;;  %v1352_v21 = vsel %vm1350_vm12, %v1351_v48, %v5498_v36  ;;  %v930_v19 = vadd.s32 %v5458_v6, %v5455_v23 }
 0x157   :  { %v1353_v22 = vadd.s32 %v1352_v21, %v1348_v59  ;;  %v535_v40 = vand.u32 2147483647, %v534_v52  ;;  %v537_v11 = vcvt.s32.f32 %v530_v0  ;;  %vm38_vm10 = vcmp.lt.s32.totalorder %v6485_v31, 0 }
 0x158   :  { %v942_v20 = vclz %v3623_v1  ;;  %v119_v27 = vmul.f32 %v118_v58, %v116_v8  ;;  %v6486_v6 = vand.u32 2147483647, %v6485_v31  ;;  %vm457_vm14 = vcmp.lt.s32.totalorder %v6489_v28, 0 }
 0x159   :  { %v1354_v45 = vadd.s32 536870912, %v1353_v22  ;;  %v538_v47 = vmul.f32 %v537_v11, %v535_v40  ;;  %v6490_v32 = vand.u32 2147483647, %v6489_v28  ;;  %v122_v48 = vsub.s32 4, %v6473_v61 }
 0x15a   :  { %v3624_v2 = vadd.s32 4294967294, %v942_v20  ;;  %v120_v60 = vxor.u32 2147483648, %v119_v27  ;;  %vm5523_vm11 = vcmp.le.f32.partialorder %v6486_v6, 0.7853982  ;;  %vm876_vm0 = vcmp.lt.s32.totalorder %v5374_v25, 0 }
 0x15b   :  { %v5517_v46 = vshrl.u32 %v1354_v45, 30  ;;  %v539_v62 = vxor.u32 2147483648, %v538_v47  ;;  %vm5532_vm15 = vcmp.le.f32.partialorder %v6490_v32, 0.7853982  ;;  %vm5548_vm1 = vcmp.le.f32.partialorder %v874_v57, 0.7853982 }
 0x15c   :  { %vm3625_vm13 = vcmp.lt.s32.totalorder %v3624_v2, 0  ;;  %v121_v36 = vsel %vm38_vm10, %v120_v60, %v119_v27  ;;  %v123_v20 = vsel %vm38_vm10, %v122_v48, %v6473_v61  ;;  %v541_v21 = vsub.s32 4, %v5418_v18 }
 0x15d   :  { %v945_v33 = vsel %vm3625_vm13, 0, %v3624_v2  ;;  %v1356_v26 = vshll.u32 %v5517_v46, 30  ;;  %v124_v17 = vsel %vm5523_vm11, %v6485_v31, %v121_v36  ;;  %v540_v29 = vsel %vm457_vm14, %v539_v62, %v538_v47 }
 0x15e   :  { %v946_v9 = vsub.s32 32, %v945_v33  ;;  %v947_v53 = vshll.u32 %v938_v55, %v945_v33  ;;  %v950_v56 = vsub.s32 4294967266, %v945_v33  ;;  %4159 = vcosq.f32 %v124_v17 }
 0x15f   :  { %v1357_v23 = vsub.s32 %v1353_v22, %v1356_v26  ;;  %v543_v0 = vsel %vm5532_vm15, %v6489_v28, %v540_v29  ;;  %4161 = vsinq.f32 %v124_v17  ;;  %v1349_v22 = vadd.s32 %v5497_v13, %v5505_v38 }
 0x160   :  { %v948_v12 = vshrl.u32 %v930_v19, %v946_v9  ;;  %v951_v63 = vadd.s32 127, %v950_v56  ;;  %4163 = vcosq.f32 %v543_v0  ;;  %v960_v57 = vsub.s32 4, %v5487_v24 }
 0x161   :  { %v1359_v37 = vsub.s32 0, %v1357_v23  ;;  %4165 = vsinq.f32 %v543_v0  ;;  %v125_v45 = vsel %vm5523_vm11, 0, %v123_v20  ;;  %v542_v33 = vsel %vm457_vm14, %v541_v21, %v5418_v18 }
 0x162   :  { %v949_v39 = vor.u32 %v948_v12, %v947_v53  ;;  %v952_v4 = vshll.u32 %v951_v63, 23  ;;  %v961_v9 = vsel %vm876_vm0, %v960_v57, %v5487_v24  ;;  %v129_v53 = vand.u32 3, %v125_v45 }
 0x163   :  { %v3641_v44 = vmin.u32 %v1359_v37, %v1357_v23  ;;  %v335_v12 = vadd.s32 3, %v125_v45  ;;  %v544_v63 = vsel %vm5532_vm15, 0, %v542_v33  ;;  %v1379_v51 = vsub.s32 4, %v5517_v46 }
 0x164   :  { %v953_v35 = vor.u32 4788187, %v952_v4  ;;  %v956_v55 = vcvt.s32.f32 %v949_v39  ;;  %v754_v18 = vadd.s32 3, %v544_v63  ;;  %v963_v39 = vsel %vm5548_vm1, 0, %v961_v9 }
 0x165   :  { %v1361_v59 = vclz %v3641_v44  ;;  %vm130_vm4 = vcmp.lt.s32.totalorder %v129_v53, 2  ;;  %v548_v24 = vand.u32 3, %v544_v63  ;;  %vm131_vm2 = vcmp.eq.s32.totalorder %v129_v53, 0 }
 0x166   :  { %v954_v34 = vand.u32 2147483647, %v953_v35  ;;  %v1173_v37 = vadd.s32 3, %v963_v39  ;;  %vm128_vm5 = vweird.f32 %v6485_v31  ;;  %vm134_vm6 = vcmp.eq.s32.totalorder %v129_v53, 2 }
 0x167   :  { %v3642_v58 = vadd.s32 4294967294, %v1361_v59  ;;  %v5584_v32 = vand.u32 3, %v335_v12  ;;  %v755_v16 = vand.u32 3, %v754_v18  ;;  %vm547_vm8 = vweird.f32 %v6489_v28 }
 0x168   :  { %v957_v1 = vmul.f32 %v956_v55, %v954_v34  ;;  %v5572_v60 = vpop.eup %4159  ;;  %v967_v34 = vand.u32 3, %v963_v39  ;;  %vm5589_vm7 = vcmp.le.f32.partialorder %v1293_v30, 0.7853982  ;;  %vm1295_vm9 = vcmp.lt.s32.totalorder %v5411_v50, 0 }
 0x169   :  { %vm3643_vm3 = vcmp.lt.s32.totalorder %v3642_v58, 0  ;;  %v5576_v26 = vpop.eup %4161  ;;  %v135_v55 = vxor.u32 2147483648, %v5572_v60  ;;  %vm553_vm12 = vcmp.eq.s32.totalorder %v548_v24, 2  ;;  %v1380_v0 = vsel %vm1295_vm9, %v1379_v51, %v5517_v46 }
 0x16a   :  { %v958_v8 = vxor.u32 2147483648, %v957_v1  ;;  %v1364_v11 = vsel %vm3643_vm3, 0, %v3642_v58  ;;  %v132_v35 = vxor.u32 2147483648, %v5576_v26  ;;  %vm550_vm13 = vcmp.eq.s32.totalorder %v548_v24, 0 }
 0x16b   :  { %v1365_v27 = vsub.s32 32, %v1364_v11  ;;  %v1366_v61 = vshll.u32 %v1357_v23, %v1364_v11  ;;  %v1369_v19 = vsub.s32 4294967266, %v1364_v11  ;;  %v4164_v23 = vpop.eup %4163  ;;  %v136_v30 = vsel %vm134_vm6, %v135_v55, %v5576_v26 }
 0x16c   :  { %v959_v2 = vsel %vm876_vm0, %v958_v8, %v957_v1  ;;  %v4166_v36 = vpop.eup %4165  ;;  %v554_v29 = vxor.u32 2147483648, %v4164_v23  ;;  %v133_v8 = vsel %vm131_vm2, %v5572_v60, %v132_v35  ;;  %v1174_v58 = vand.u32 3, %v1173_v37 }
 0x16d   :  { %v962_v40 = vsel %vm5548_vm1, %v5374_v25, %v959_v2  ;;  %v1367_v13 = vshrl.u32 %v1349_v22, %v1365_v27  ;;  %v1370_v38 = vadd.s32 127, %v1369_v19  ;;  %v551_v1 = vxor.u32 2147483648, %v4166_v36 }
 0x16e   :  { %4167 = vcosq.f32 %v962_v40  ;;  %vm549_vm10 = vcmp.lt.s32.totalorder %v548_v24, 2  ;;  %vm757_vm11 = vcmp.eq.s32.totalorder %v755_v16, 0  ;;  %vm760_vm14 = vcmp.eq.s32.totalorder %v755_v16, 2 }
 0x16f   :  { %4169 = vsinq.f32 %v962_v40  ;;  %v1368_v47 = vor.u32 %v1367_v13, %v1366_v61  ;;  %v1371_v56 = vshll.u32 %v1370_v38, 23  ;;  %v555_v21 = vsel %vm553_vm12, %v554_v29, %v4166_v36 }
 0x170   :  { %vm969_vm15 = vcmp.eq.s32.totalorder %v967_v34, 0  ;;  %v1382_v2 = vsel %vm5589_vm7, 0, %v1380_v0  ;;  %v552_v22 = vsel %vm550_vm13, %v4164_v23, %v551_v1  ;;  %vm972_vm0 = vcmp.eq.s32.totalorder %v967_v34, 2 }
 0x171   :  { %v1372_v62 = vor.u32 4788187, %v1371_v56  ;;  %v1375_v4 = vcvt.s32.f32 %v1368_v47  ;;  %vm1176_vm1 = vcmp.eq.s32.totalorder %v1174_v58, 0  ;;  %vm1179_vm3 = vcmp.eq.s32.totalorder %v1174_v58, 2 }
 0x172   :  { %v137_v11 = vsel %vm130_vm4, %v133_v8, %v136_v30  ;;  %vm756_vm2 = vcmp.lt.s32.totalorder %v755_v16, 2  ;;  %vm968_vm6 = vcmp.lt.s32.totalorder %v967_v34, 2  ;;  %v1592_v27 = vadd.s32 3, %v1382_v2 }
 0x173   :  { %v1373_v6 = vand.u32 2147483647, %v1372_v62  ;;  %v556_v61 = vsel %vm549_vm10, %v552_v22, %v555_v21  ;;  %v759_v19 = vsel %vm757_vm11, %v4164_v23, %v551_v1  ;;  %v762_v45 = vsel %vm760_vm14, %v554_v29, %v4166_v36 }
 0x174   :  { %v138_v47 = vsel %vm128_vm5, nan, %v137_v11  ;;  %vm338_vm4 = vcmp.eq.s32.totalorder %v5584_v32, 0  ;;  %v557_v53 = vsel %vm547_vm8, nan, %v556_v61  ;;  %v763_v56 = vsel %vm756_vm2, %v759_v19, %v762_v45 }
 0x175   :  { %v1376_v17 = vmul.f32 %v1375_v4, %v1373_v6  ;;  %v1386_v12 = vand.u32 3, %v1382_v2  ;;  %v1593_v63 = vand.u32 3, %v1592_v27  ;;  %vm966_vm12 = vweird.f32 %v5374_v25 }
 0x176   :  { %vm337_vm13 = vcmp.lt.s32.totalorder %v5584_v32, 2  ;;  %v340_v62 = vsel %vm338_vm4, %v5572_v60, %v132_v35  ;;  %v5630_v23 = vsel %vm547_vm8, nan, %v763_v56  ;;  %vm1385_vm10 = vweird.f32 %v5411_v50 }
 0x177   :  { %v1377_v59 = vxor.u32 2147483648, %v1376_v17  ;;  %v1707_v25 = vmul.f32 %v557_v53, %v138_v47  ;;  %vm1391_vm11 = vcmp.eq.s32.totalorder %v1386_v12, 2  ;;  %vm1598_vm14 = vcmp.eq.s32.totalorder %v1593_v63, 2 }
 0x178   :  { %v4168_v48 = vpop.eup %4167  ;;  %v1721_v28 = vmul.f32 %v5630_v23, %v138_v47  ;;  %vm3336_vm8 = vcmask 523264   ;;  %vm3422_vm2 = vcmask 261120  }
 0x179   :  { %v4170_v52 = vpop.eup %4169  ;;  %v1378_v20 = vsel %vm1295_vm9, %v1377_v59, %v1376_v17  ;;  %v973_v40 = vxor.u32 2147483648, %v4168_v48  ;;  %vm341_vm9 = vcmp.eq.s32.totalorder %v5584_v32, 2 }
 0x17a   :  { %v1381_v46 = vsel %vm5589_vm7, %v5411_v50, %v1378_v20  ;;  %v970_v57 = vxor.u32 2147483648, %v4170_v52  ;;  %vm1175_vm7 = vcmp.lt.s32.totalorder %v1174_v58, 2  ;;  %v343_v4 = vsel %vm341_vm9, %v135_v55, %v5576_v26 }
 0x17b   :  { %4171 = vcosq.f32 %v1381_v46  ;;  %v974_v13 = vsel %vm972_vm0, %v973_v40, %v4170_v52  ;;  %v1181_v9 = vsel %vm1179_vm3, %v973_v40, %v4170_v52  ;;  %v344_v35 = vsel %vm337_vm13, %v340_v62, %v343_v4 }
 0x17c   :  { %4173 = vsinq.f32 %v1381_v46  ;;  %v971_v33 = vsel %vm969_vm15, %v4168_v48, %v970_v57  ;;  %v1178_v38 = vsel %vm1176_vm1, %v4168_v48, %v970_v57  ;;  %vm1388_vm15 = vcmp.eq.s32.totalorder %v1386_v12, 0 }
 0x17d   :  { %v975_v18 = vsel %vm968_vm6, %v971_v33, %v974_v13  ;;  %v1182_v39 = vsel %vm1175_vm7, %v1178_v38, %v1181_v9  ;;  %vm1595_vm0 = vcmp.eq.s32.totalorder %v1593_v63, 0  ;;  %vm1387_vm1 = vcmp.lt.s32.totalorder %v1386_v12, 2 }
 0x17e   :  { %v5633_v6 = vsel %vm966_vm12, nan, %v975_v18  ;;  %v5635_v51 = vsel %vm966_vm12, nan, %v1182_v39  ;;  %vm1594_vm3 = vcmp.lt.s32.totalorder %v1593_v63, 2  ;;  %v345_v48 = vsel %vm128_vm5, nan, %v344_v35 }
 0x17f   :  { %v1709_v32 = vmul.f32 %v1707_v25, %v5633_v6  ;;  %v1715_v16 = vmul.f32 %v1707_v25, %v5635_v51  ;;  %v1723_v31 = vmul.f32 %v1721_v28, %v5633_v6  ;;  %v1729_v58 = vmul.f32 %v1721_v28, %v5635_v51 }
 0x180   :  { %v1735_v20 = vmul.f32 %v557_v53, %v345_v48  ;;  %vm4182_vm5 = vmmov 0   ;;  %vm3506_vm6 = vcmask 130048  }
 0x182   :  { %v1737_v27 = vmul.f32 %v1735_v20, %v5633_v6  ;;  %v1743_v39 = vmul.f32 %v1735_v20, %v5635_v51 }
 0x185   :  { %v4172_v24 = vpop.eup %4171 }
 0x186   :  { %v4174_v36 = vpop.eup %4173  ;;  %v1392_v37 = vxor.u32 2147483648, %v4172_v24 }
 0x187   :  { %v1389_v60 = vxor.u32 2147483648, %v4174_v36 }
 0x188   :  { %v1393_v26 = vsel %vm1391_vm11, %v1392_v37, %v4174_v36  ;;  %v1600_v55 = vsel %vm1598_vm14, %v1392_v37, %v4174_v36 }
 0x189   :  { %v1390_v17 = vsel %vm1388_vm15, %v4172_v24, %v1389_v60  ;;  %v1597_v29 = vsel %vm1595_vm0, %v4172_v24, %v1389_v60 }
 0x18a   :  { %v1394_v34 = vsel %vm1387_vm1, %v1390_v17, %v1393_v26  ;;  %v1601_v44 = vsel %vm1594_vm3, %v1597_v29, %v1600_v55 }
 0x18b   :  { %v5644_v1 = vsel %vm1385_vm10, nan, %v1394_v34  ;;  %v5648_v59 = vsel %vm1385_vm10, nan, %v1601_v44 }
 0x18c   :  { %v5651_v0 = vmul.f32 %v1709_v32, %v5644_v1  ;;  %v5654_v52 = vmul.f32 %v1709_v32, %v5648_v59  ;;  %v5657_v8 = vmul.f32 %v1715_v16, %v5644_v1  ;;  %v5661_v30 = vmul.f32 %v1715_v16, %v5648_v59 }
 0x18d   :  { %v5665_v50 = vmul.f32 %v1723_v31, %v5644_v1  ;;  %v5671_v22 = vmul.f32 %v1723_v31, %v5648_v59  ;;  %v5675_v11 = vmul.f32 %v1729_v58, %v5644_v1  ;;  %v5682_v13 = vmul.f32 %v1729_v58, %v5648_v59 }
 0x18e   :  { %v1763_v21 = vmul.f32 -0.039848488, %v5651_v0  ;;  %v1765_v46 = vmul.f32 0.1724955, %v5654_v52  ;;  %v1769_v2 = vmul.f32 0.050464205, %v5657_v8  ;;  %v5688_v12 = vmul.f32 %v1737_v27, %v5644_v1 }
 0x18f   :  { %v1773_v40 = vmul.f32 -0.57100374, %v5661_v30  ;;  %v1777_v19 = vmul.f32 -0.10426246, %v5665_v50  ;;  %v1827_v45 = vmul.f32 -0.03995849, %v5651_v0  ;;  %v5694_v25 = vmul.f32 %v1737_v27, %v5648_v59 }
 0x190   :  { %v1767_v57 = vadd.f32 %v1765_v46, %v1763_v21  ;;  %v1829_v33 = vmul.f32 -0.12118407, %v5654_v52  ;;  %v1781_v9 = vmul.f32 -0.059748597, %v5671_v22  ;;  %v1833_v47 = vmul.f32 0.1743222, %v5657_v8 }
 0x191   :  { %v1837_v56 = vmul.f32 0.4899346, %v5661_v30  ;;  %v1785_v18 = vmul.f32 -0.051029798, %v5675_v11  ;;  %v1841_v4 = vmul.f32 -0.07571072, %v5665_v50  ;;  %v5705_v44 = vmul.f32 %v1743_v39, %v5644_v1 }
 0x192   :  { %v1771_v61 = vadd.f32 %v1769_v2, %v1767_v57  ;;  %v1831_v53 = vadd.f32 %v1829_v33, %v1827_v45  ;;  %v1789_v36 = vmul.f32 0.02399257, %v5682_v13  ;;  %v1895_v35 = vmul.f32 -0.16710728, %v5651_v0 }
 0x193   :  { %v1845_v60 = vmul.f32 -0.20402385, %v5671_v22  ;;  %v1897_v28 = vmul.f32 -0.18671893, %v5654_v52  ;;  %v1901_v26 = vmul.f32 -0.031144673, %v5657_v8  ;;  %v1749_v31 = vmul.f32 %v5630_v23, %v345_v48 }
 0x194   :  { %v1775_v38 = vadd.f32 %v1773_v40, %v1771_v61  ;;  %v1835_v62 = vadd.f32 %v1833_v47, %v1831_v53  ;;  %v1793_v32 = vmul.f32 0.18019404, %v5688_v12  ;;  %v1849_v17 = vmul.f32 -0.1890674, %v5675_v11 }
 0x195   :  { %v1899_v29 = vadd.f32 %v1897_v28, %v1895_v35  ;;  %v1905_v34 = vmul.f32 0.18360002, %v5661_v30  ;;  %v1797_v20 = vmul.f32 -0.101234, %v5694_v25  ;;  %v1853_v46 = vmul.f32 0.06465545, %v5682_v13 }
 0x196   :  { %v1779_v63 = vadd.f32 %v1777_v19, %v1775_v38  ;;  %v1839_v37 = vadd.f32 %v1837_v56, %v1835_v62  ;;  %v1909_v57 = vmul.f32 -0.40619403, %v5665_v50  ;;  %v1857_v27 = vmul.f32 -0.3582292, %v5688_v12 }
 0x197   :  { %v1903_v2 = vadd.f32 %v1901_v26, %v1899_v29  ;;  %v1913_v61 = vmul.f32 0.07006678, %v5671_v22  ;;  %v1965_v19 = vmul.f32 -0.006700455, %v5651_v0  ;;  %v1967_v23 = vmul.f32 0.20106497, %v5654_v52 }
 0x198   :  { %v1783_v24 = vadd.f32 %v1781_v9, %v1779_v63  ;;  %v1843_v16 = vadd.f32 %v1841_v4, %v1839_v37  ;;  %v1971_v48 = vmul.f32 0.047977656, %v5657_v8  ;;  %v5717_v38 = vmul.f32 %v1743_v39, %v5648_v59 }
 0x199   :  { %v1907_v33 = vadd.f32 %v1905_v34, %v1903_v2  ;;  %v1751_v9 = vmul.f32 %v1749_v31, %v5633_v6  ;;  %v1861_v47 = vmul.f32 -0.10923188, %v5694_v25  ;;  %v1917_v53 = vmul.f32 0.3259069, %v5675_v11 }
 0x19a   :  { %v1787_v55 = vadd.f32 %v1785_v18, %v1783_v24  ;;  %v1847_v21 = vadd.f32 %v1845_v60, %v1843_v16  ;;  %v1969_v18 = vadd.f32 %v1967_v23, %v1965_v19  ;;  %v1975_v62 = vmul.f32 -0.2154318, %v5661_v30 }
 0x19b   :  { %v1911_v63 = vadd.f32 %v1909_v57, %v1907_v33  ;;  %v1757_v4 = vmul.f32 %v1749_v31, %v5635_v51  ;;  %v1921_v35 = vmul.f32 -0.17564082, %v5682_v13  ;;  %v1979_v6 = vmul.f32 0.2622359, %v5665_v50 }
 0x19c   :  { %v1791_v58 = vadd.f32 %v1789_v36, %v1787_v55  ;;  %v1851_v45 = vadd.f32 %v1849_v17, %v1847_v21  ;;  %v1801_v36 = vmul.f32 -0.16260491, %v5705_v44  ;;  %v1973_v60 = vadd.f32 %v1971_v48, %v1969_v18 }
 0x19d   :  { %v1915_v37 = vadd.f32 %v1913_v61, %v1911_v63  ;;  %v5728_v28 = vmul.f32 %v1751_v9, %v5644_v1  ;;  %v1805_v26 = vmul.f32 0.46712878, %v5717_v38  ;;  %v1865_v55 = vmul.f32 -0.08307569, %v5705_v44 }
 0x19e   :  { %v1795_v40 = vadd.f32 %v1793_v32, %v1791_v58  ;;  %v1855_v56 = vadd.f32 %v1853_v46, %v1851_v45  ;;  %v1925_v32 = vmul.f32 0.14113827, %v5688_v12  ;;  %v1977_v17 = vadd.f32 %v1975_v62, %v1973_v60 }
 0x19f   :  { %v1919_v16 = vadd.f32 %v1917_v53, %v1915_v37  ;;  %v1983_v29 = vmul.f32 -0.22375755, %v5671_v22  ;;  %v5735_v34 = vmul.f32 %v1751_v9, %v5648_v59  ;;  %v1987_v31 = vmul.f32 -0.23497823, %v5675_v11 }
 0x1a0   :  { %v1799_v24 = vadd.f32 %v1797_v20, %v1795_v40  ;;  %v1859_v39 = vadd.f32 %v1857_v27, %v1855_v56  ;;  %v2035_v58 = vmul.f32 0.22033308, %v5651_v0  ;;  %v2037_v20 = vmul.f32 0.0012439453, %v5654_v52 }
 0x1a1   :  { %v1923_v46 = vadd.f32 %v1921_v35, %v1919_v16  ;;  %v1981_v2 = vadd.f32 %v1979_v6, %v1977_v17  ;;  %v2041_v57 = vmul.f32 0.13018423, %v5657_v8  ;;  %v1869_v40 = vmul.f32 0.2962738, %v5717_v38 }
 0x1a2   :  { %v1863_v51 = vadd.f32 %v1861_v47, %v1859_v39  ;;  %v1803_v21 = vadd.f32 %v1801_v36, %v1799_v24  ;;  %v1929_v27 = vmul.f32 0.5070868, %v5694_v25  ;;  %v2039_v61 = vadd.f32 %v2037_v20, %v2035_v58 }
 0x1a3   :  { %v2045_v19 = vmul.f32 0.040183634, %v5661_v30  ;;  %v1927_v33 = vadd.f32 %v1925_v32, %v1923_v46  ;;  %v1985_v23 = vadd.f32 %v1983_v29, %v1981_v2  ;;  %v1991_v48 = vmul.f32 -0.26511264, %v5682_v13 }
 0x1a4   :  { %v1867_v45 = vadd.f32 %v1865_v55, %v1863_v51  ;;  %v5746_v9 = vmul.f32 %v1757_v4, %v5644_v1  ;;  %v5749_v47 = vmul.f32 %v1757_v4, %v5648_v59  ;;  %v2043_v53 = vadd.f32 %v2041_v57, %v2039_v61 }
 0x1a5   :  { %v2049_v56 = vmul.f32 -0.14598656, %v5665_v50  ;;  %v1807_v63 = vadd.f32 %v1805_v26, %v1803_v21  ;;  %v1809_v18 = vmul.f32 -0.34445626, %v5728_v28  ;;  %v1813_v62 = vmul.f32 0.14953478, %v5735_v34 }
 0x1a6   :  { %v1989_v24 = vadd.f32 %v1987_v31, %v1985_v23  ;;  %v1873_v36 = vmul.f32 0.016040504, %v5728_v28  ;;  %v1933_v35 = vmul.f32 0.16803797, %v5705_v44  ;;  %v2047_v39 = vadd.f32 %v2045_v19, %v2043_v53 }
 0x1a7   :  { %v2053_v1 = vmul.f32 0.50862885, %v5671_v22  ;;  %v1871_v37 = vadd.f32 %v1869_v40, %v1867_v45  ;;  %v1931_v60 = vadd.f32 %v1929_v27, %v1927_v33  ;;  %v1995_v4 = vmul.f32 0.12623855, %v5688_v12 }
 0x1a8   :  { %v1993_v59 = vadd.f32 %v1991_v48, %v1989_v24  ;;  %v1817_v6 = vmul.f32 0.15847088, %v5746_v9  ;;  %v1821_v26 = vmul.f32 -0.41103974, %v5749_v47  ;;  %v2051_v55 = vadd.f32 %v2049_v56, %v2047_v39 }
 0x1a9   :  { %v2057_v32 = vmul.f32 -0.083387434, %v5675_v11  ;;  %v1811_v51 = vadd.f32 %v1809_v18, %v1807_v63  ;;  %v1877_v16 = vmul.f32 0.4421369, %v5735_v34  ;;  %v1937_v17 = vmul.f32 0.4451631, %v5717_v38 }
 0x1aa   :  { %v1999_v29 = vmul.f32 0.15646647, %v5694_v25  ;;  %v2055_v31 = vadd.f32 %v2053_v1, %v2051_v55  ;;  %v2061_v58 = vmul.f32 -0.30342352, %v5682_v13  ;;  %v2107_v20 = vmul.f32 0.13798064, %v5651_v0 }
 0x1ab   :  { %v2109_v21 = vmul.f32 0.4726341, %v5654_v52  ;;  %v1875_v46 = vadd.f32 %v1873_v36, %v1871_v37  ;;  %v1935_v2 = vadd.f32 %v1933_v35, %v1931_v60  ;;  %v1997_v57 = vadd.f32 %v1995_v4, %v1993_v59 }
 0x1ac   :  { %v2113_v40 = vmul.f32 0.031633653, %v5657_v8  ;;  %v1881_v27 = vmul.f32 0.43548843, %v5746_v9  ;;  %v2059_v61 = vadd.f32 %v2057_v32, %v2055_v31  ;;  %v2117_v45 = vmul.f32 0.19602983, %v5661_v30 }
 0x1ad   :  { %v2111_v19 = vadd.f32 %v2109_v21, %v2107_v20  ;;  %v1815_v33 = vadd.f32 %v1813_v62, %v1811_v51  ;;  %v1885_v23 = vmul.f32 -0.07534558, %v5749_v47  ;;  %v1941_v48 = vmul.f32 0.17817709, %v5728_v28 }
 0x1ae   :  { %v2065_v53 = vmul.f32 -0.13804077, %v5688_v12  ;;  %v1945_v56 = vmul.f32 0.022893697, %v5735_v34  ;;  %v2063_v63 = vadd.f32 %v2061_v58, %v2059_v61  ;;  %v2121_v24 = vmul.f32 -0.47905242, %v5665_v50 }
 0x1af   :  { %v2115_v18 = vadd.f32 %v2113_v40, %v2111_v19  ;;  %v1879_v36 = vadd.f32 %v1877_v16, %v1875_v46  ;;  %v1939_v35 = vadd.f32 %v1937_v17, %v1935_v2  ;;  %v2001_v39 = vadd.f32 %v1999_v29, %v1997_v57 }
 0x1b0   :  { %v2003_v1 = vmul.f32 0.033522066, %v5705_v44  ;;  %v1949_v37 = vmul.f32 -0.21047758, %v5746_v9  ;;  %v1953_v62 = vmul.f32 -0.12461244, %v5749_v47  ;;  %v1819_v4 = vadd.f32 %v1817_v6, %v1815_v33 }
 0x1b1   :  { %v2119_v60 = vadd.f32 %v2117_v45, %v2115_v18  ;;  %v2125_v59 = vmul.f32 0.02632263, %v5671_v22  ;;  %v2007_v55 = vmul.f32 -0.07627838, %v5717_v38  ;;  %v2067_v32 = vadd.f32 %v2065_v53, %v2063_v63 }
 0x1b2   :  { %v2069_v51 = vmul.f32 0.10817712, %v5694_v25  ;;  %v2011_v31 = vmul.f32 0.55455494, %v5728_v28  ;;  %v2015_v16 = vmul.f32 0.5172271, %v5735_v34  ;;  %v1883_v58 = vadd.f32 %v1881_v27, %v1879_v36 }
 0x1b3   :  { %v2123_v17 = vadd.f32 %v2121_v24, %v2119_v60  ;;  %v2129_v29 = vmul.f32 0.07564436, %v5675_v11  ;;  %v1943_v20 = vadd.f32 %v1941_v48, %v1939_v35  ;;  %v2005_v21 = vadd.f32 %v2003_v1, %v2001_v39 }
 0x1b4   :  { %v2179_v46 = vmul.f32 -0.5783288, %v5651_v0  ;;  %v2133_v6 = vmul.f32 0.28616375, %v5682_v13  ;;  %v2181_v57 = vmul.f32 0.3395567, %v5654_v52  ;;  %v1823_v61 = vadd.f32 %v1821_v26, %v1819_v4 }
 0x1b5   :  { %v2127_v2 = vadd.f32 %v2125_v59, %v2123_v17  ;;  %v2185_v40 = vmul.f32 -0.38260955, %v5657_v8  ;;  %v2019_v19 = vmul.f32 -0.19908574, %v5746_v9  ;;  %v2071_v45 = vadd.f32 %v2069_v51, %v2067_v32 }
 0x1b6   :  { %v2073_v33 = vmul.f32 -0.53674155, %v5705_v44  ;;  %v2137_v27 = vmul.f32 0.26006335, %v5688_v12  ;;  %v2183_v48 = vadd.f32 %v2181_v57, %v2179_v46  ;;  %v2189_v63 = vmul.f32 0.14943722, %v5661_v30 }
 0x1b7   :  { %v2131_v53 = vadd.f32 %v2129_v29, %v2127_v2  ;;  %v1947_v18 = vadd.f32 %v1945_v56, %v1943_v20  ;;  %v2009_v24 = vadd.f32 %v2007_v55, %v2005_v21  ;;  %v5793_v36 = vmul.f32 -0.06656153, %v5749_v47 }
 0x1b8   :  { %v2077_v35 = vmul.f32 -0.1926495, %v5717_v38  ;;  %v1887_v39 = vadd.f32 %v1885_v23, %v1883_v58  ;;  %v2187_v1 = vadd.f32 %v2185_v40, %v2183_v48  ;;  %v2193_v60 = vmul.f32 0.0111268945, %v5665_v50  ;;  %v3736_v40 = vld [vmem:[%s6368_s1 + $0x380] sm:$0xff] }
 0x1b9   :  { %v2135_v26 = vadd.f32 %v2133_v6, %v2131_v53  ;;  %v5797_v59 = vmul.f32 %v1823_v61, %v1823_v61  ;;  %v2075_v4 = vadd.f32 %v2073_v33, %v2071_v45  ;;  %v2081_v32 = vmul.f32 0.20477228, %v5728_v28 }
 0x1ba   :  { %v2085_v51 = vmul.f32 -0.103755064, %v5735_v34  ;;  %v2141_v56 = vmul.f32 0.092609294, %v5694_v25  ;;  %v2191_v55 = vadd.f32 %v2189_v63, %v2187_v1  ;;  %v2197_v29 = vmul.f32 -0.16406001, %v5671_v22 }
 0x1bb   :  { %v2139_v17 = vadd.f32 %v2137_v27, %v2135_v26  ;;  %v1951_v20 = vadd.f32 %v1949_v37, %v1947_v18  ;;  %v2013_v21 = vadd.f32 %v2011_v31, %v2009_v24  ;;  %v2089_v23 = vmul.f32 0.122632734, %v5746_v9  ;;  %v3737_v37 = vld [vmem:[%s6368_s1 + $0x388] sm:$0xff] }
 0x1bc   :  { %v2251_v58 = vmul.f32 0.19615614, %v5651_v0  ;;  %v5805_v46 = vmul.f32 %v1887_v39, %v1887_v39  ;;  %v2195_v2 = vadd.f32 %v2193_v60, %v2191_v55  ;;  %v2201_v6 = vmul.f32 0.090498425, %v5675_v11 }
 0x1bd   :  { %v2253_v57 = vmul.f32 -0.07386673, %v5654_v52  ;;  %v2079_v31 = vadd.f32 %v2077_v35, %v2075_v4  ;;  %v2145_v61 = vmul.f32 -0.08071907, %v5705_v44  ;;  %v2205_v45 = vmul.f32 -0.38056466, %v5682_v13 }
 0x1be   :  { %v2257_v33 = vmul.f32 -0.21784738, %v5657_v8  ;;  %v2143_v53 = vadd.f32 %v2141_v56, %v2139_v17  ;;  %v2199_v27 = vadd.f32 %v2197_v29, %v2195_v2  ;;  %v2261_v63 = vmul.f32 -0.09294777, %v5661_v30 }
 0x1bf   :  { %v2255_v48 = vadd.f32 %v2253_v57, %v2251_v58  ;;  %v1955_v18 = vadd.f32 %v1953_v62, %v1951_v20  ;;  %v2017_v24 = vadd.f32 %v2015_v16, %v2013_v21  ;;  %v2093_v39 = vmul.f32 -0.3607713, %v5749_v47 }
 0x1c0   :  { %v4049_v26 = vpack.c.bf16 %v3737_v37, %v3736_v40  ;;  %v2203_v1 = vadd.f32 %v2201_v6, %v2199_v27  ;;  %v2209_v60 = vmul.f32 0.11088599, %v5688_v12  ;;  %v2265_v4 = vmul.f32 -0.1710493, %v5665_v50 }
 0x1c1   :  { %v2259_v35 = vadd.f32 %v2257_v33, %v2255_v48  ;;  %v5824_v55 = vadd.f32 %v5805_v46, %v5797_v59  ;;  %v2083_v17 = vadd.f32 %v2081_v32, %v2079_v31  ;;  %v2149_v56 = vmul.f32 -0.33583754, %v5717_v38 }
 0x1c2   :  { %v2213_v29 = vmul.f32 0.012223992, %v5694_v25  ;;  %4050 = vmatprep.subr.bf16.mxu1 %v4049_v26  ;;  %v2147_v62 = vadd.f32 %v2145_v61, %v2143_v53  ;;  %v2207_v16 = vadd.f32 %v2205_v45, %v2203_v1  ;;  %v2269_v21 = vmul.f32 -0.23058401, %v5671_v22 }
 0x1c3   :  { %v2263_v20 = vadd.f32 %v2261_v63, %v2259_v35  ;;  %v5829_v58 = vmul.f32 %v1955_v18, %v1955_v18  ;;  %v2021_v2 = vadd.f32 %v2019_v19, %v2017_v24  ;;  %v2153_v6 = vmul.f32 -0.20528896, %v5728_v28 }
 0x1c4   :  { %v2157_v57 = vmul.f32 0.38749725, %v5735_v34  ;;  %v2211_v40 = vadd.f32 %v2209_v60, %v2207_v16  ;;  %v2217_v32 = vmul.f32 -0.15019083, %v5705_v44  ;;  %v2273_v31 = vmul.f32 0.1851685, %v5675_v11 }
 0x1c5   :  { %v2267_v37 = vadd.f32 %v2265_v4, %v2263_v20  ;;  %v2087_v33 = vadd.f32 %v2085_v51, %v2083_v17  ;;  %v2277_v61 = vmul.f32 -0.07756747, %v5682_v13  ;;  %v2323_v45 = vmul.f32 -0.13813807, %v5651_v0 }
 0x1c6   :  { %v2325_v53 = vmul.f32 -0.042953648, %v5654_v52  ;;  %v2151_v27 = vadd.f32 %v2149_v56, %v2147_v62  ;;  %v2215_v48 = vadd.f32 %v2213_v29, %v2211_v40  ;;  %v2329_v63 = vmul.f32 0.06858787, %v5657_v8 }
 0x1c7   :  { %v2271_v19 = vadd.f32 %v2269_v21, %v2267_v37  ;;  %v2025_v18 = vadd.f32 %v5793_v36, %v2021_v2  ;;  %v2161_v24 = vmul.f32 -0.0949569, %v5746_v9  ;;  %v2333_v1 = vmul.f32 -0.26195437, %v5661_v30 }
 0x1c8   :  { %v2327_v26 = vadd.f32 %v2325_v53, %v2323_v45  ;;  %v2219_v60 = vadd.f32 %v2217_v32, %v2215_v48  ;;  %v2221_v51 = vmul.f32 -0.14872736, %v5717_v38  ;;  %v2281_v4 = vmul.f32 -0.3096704, %v5688_v12 }
 0x1c9   :  { %v2275_v35 = vadd.f32 %v2273_v31, %v2271_v19  ;;  %v1959_v17 = vadd.f32 %v5829_v58, %v5824_v55  ;;  %v2165_v56 = vmul.f32 0.059395105, %v5749_v47  ;;  %v2337_v62 = vmul.f32 -0.40316314, %v5665_v50 }
 0x1ca   :  { %v2331_v29 = vadd.f32 %v2329_v63, %v2327_v26  ;;  %v2091_v36 = vadd.f32 %v2089_v23, %v2087_v33  ;;  %v2155_v16 = vadd.f32 %v2153_v6, %v2151_v27  ;;  %v2285_v21 = vmul.f32 -0.042257134, %v5694_v25 }
 0x1cb   :  { %v2279_v20 = vadd.f32 %v2277_v61, %v2275_v35  ;;  %v5849_v2 = vmul.f32 %v2025_v18, %v2025_v18  ;;  %v2225_v40 = vmul.f32 -0.04202657, %v5728_v28  ;;  %v2341_v37 = vmul.f32 -0.322037, %v5671_v22 }
 0x1cc   :  { %v2335_v32 = vadd.f32 %v2333_v1, %v2331_v29  ;;  %v2223_v31 = vadd.f32 %v2221_v51, %v2219_v60  ;;  %v2229_v45 = vmul.f32 -0.136154, %v5735_v34  ;;  %v2289_v48 = vmul.f32 0.4633815, %v5705_v44 }
 0x1cd   :  { %v2283_v53 = vadd.f32 %v2281_v4, %v2279_v20  ;;  %v2345_v23 = vmul.f32 -0.20376693, %v5675_v11  ;;  %v2395_v6 = vmul.f32 0.43588674, %v5651_v0  ;;  %v2397_v33 = vmul.f32 -0.0100020645, %v5654_v52 }
 0x1ce   :  { %v2339_v19 = vadd.f32 %v2337_v62, %v2335_v32  ;;  %v2095_v61 = vadd.f32 %v2093_v39, %v2091_v36  ;;  %v2159_v27 = vadd.f32 %v2157_v57, %v2155_v16  ;;  %v2401_v18 = vmul.f32 -0.42941624, %v5657_v8 }
 0x1cf   :  { %v2287_v63 = vadd.f32 %v2285_v21, %v2283_v53  ;;  %v2349_v1 = vmul.f32 -0.21818987, %v5682_v13  ;;  %v2399_v60 = vadd.f32 %v2397_v33, %v2395_v6  ;;  %v2405_v51 = vmul.f32 0.012636037, %v5661_v30 }
 0x1d0   :  { %v2343_v26 = vadd.f32 %v2341_v37, %v2339_v19  ;;  %v2029_v35 = vadd.f32 %v5849_v2, %v1959_v17  ;;  %v2227_v4 = vadd.f32 %v2225_v40, %v2223_v31  ;;  %v2293_v62 = vmul.f32 -0.36182988, %v5717_v38 }
 0x1d1   :  { %v2291_v29 = vadd.f32 %v2289_v48, %v2287_v63  ;;  %v2353_v32 = vmul.f32 -0.5202973, %v5688_v12  ;;  %v2403_v39 = vadd.f32 %v2401_v18, %v2399_v60  ;;  %v2409_v57 = vmul.f32 0.21285872, %v5665_v50 }
 0x1d2   :  { %v2347_v20 = vadd.f32 %v2345_v23, %v2343_v26  ;;  %v5865_v36 = vmul.f32 %v2095_v61, %v2095_v61  ;;  %v2163_v16 = vadd.f32 %v2161_v24, %v2159_v27  ;;  %v2233_v21 = vmul.f32 0.35200626, %v5746_v9 }
 0x1d3   :  { %v2237_v37 = vmul.f32 -0.011036941, %v5749_v47  ;;  %v2297_v53 = vmul.f32 -0.005928705, %v5728_v28  ;;  %v2407_v40 = vadd.f32 %v2405_v51, %v2403_v39  ;;  %v2413_v31 = vmul.f32 -0.22473201, %v5671_v22 }
 0x1d4   :  { %v2351_v17 = vadd.f32 %v2349_v1, %v2347_v20  ;;  %v2231_v48 = vadd.f32 %v2229_v45, %v2227_v4  ;;  %v2295_v19 = vadd.f32 %v2293_v62, %v2291_v29  ;;  %v2357_v23 = vmul.f32 0.10070074, %v5694_v25 }
 0x1d5   :  { %v2417_v6 = vmul.f32 0.5158163, %v5675_v11  ;;  %v2411_v61 = vadd.f32 %v2409_v57, %v2407_v40  ;;  %v2467_v24 = vmul.f32 -0.20767276, %v5651_v0  ;;  %v2469_v27 = vmul.f32 0.19328892, %v5654_v52 }
 0x1d6   :  { %v2355_v33 = vadd.f32 %v2353_v32, %v2351_v17  ;;  %v2101_v63 = vsub.f32 %v2029_v35, %v5865_v36  ;;  %v2167_v18 = vadd.f32 %v2165_v56, %v2163_v16  ;;  %v2301_v26 = vmul.f32 0.018754255, %v5735_v34 }
 0x1d7   :  { %v2473_v1 = vmul.f32 0.2785027, %v5657_v8  ;;  %v2415_v60 = vadd.f32 %v2413_v31, %v2411_v61  ;;  %v2421_v45 = vmul.f32 -0.04667003, %v5682_v13  ;;  %v2471_v51 = vadd.f32 %v2469_v27, %v2467_v24 }
 0x1d8   :  { %v2477_v4 = vmul.f32 0.11051745, %v5661_v30  ;;  %v2235_v29 = vadd.f32 %v2233_v21, %v2231_v48  ;;  %v2299_v62 = vadd.f32 %v2297_v53, %v2295_v19  ;;  %v2361_v20 = vmul.f32 -0.23017849, %v5705_v44 }
 0x1d9   :  { %v5882_v32 = vadd.f32 %v5865_v36, %v2029_v35  ;;  %v2359_v39 = vadd.f32 %v2357_v23, %v2355_v33  ;;  %v2419_v57 = vadd.f32 %v2417_v6, %v2415_v60  ;;  %v2475_v56 = vadd.f32 %v2473_v1, %v2471_v51 }
 0x1da   :  { %v2481_v16 = vmul.f32 0.49311548, %v5665_v50  ;;  %v5885_v17 = vmul.f32 %v2167_v18, %v2167_v18  ;;  %v2305_v40 = vmul.f32 0.09521022, %v5746_v9  ;;  %v2309_v31 = vmul.f32 -0.56961584, %v5749_v47 }
 0x1db   :  { %v2365_v61 = vmul.f32 -0.08008001, %v5717_v38  ;;  %v2423_v21 = vadd.f32 %v2421_v45, %v2419_v57  ;;  %v2425_v53 = vmul.f32 -0.11770881, %v5688_v12  ;;  %v2479_v48 = vadd.f32 %v2477_v4, %v2475_v56 }
 0x1dc   :  { %v2485_v35 = vmul.f32 0.17025621, %v5671_v22  ;;  %v2239_v19 = vadd.f32 %v2237_v37, %v2235_v29  ;;  %v2303_v23 = vadd.f32 %v2301_v26, %v2299_v62  ;;  %v2369_v6 = vmul.f32 -0.16767043, %v5728_v28 }
 0x1dd   :  { %v2373_v33 = vmul.f32 -0.049375158, %v5735_v34  ;;  %v2363_v24 = vadd.f32 %v2361_v20, %v2359_v39  ;;  %v2483_v27 = vadd.f32 %v2481_v16, %v2479_v48  ;;  %v2489_v18 = vmul.f32 0.20062481, %v5675_v11 }
 0x1de   :  { %v2539_v1 = vmul.f32 -0.17334987, %v5651_v0  ;;  %v5897_v60 = vsub.f32 %v2101_v63, %v5885_v17  ;;  %v2377_v45 = vmul.f32 -0.32276356, %v5746_v9  ;;  %v2541_v51 = vmul.f32 -0.22317246, %v5654_v52 }
 0x1df   :  { %v2545_v37 = vmul.f32 0.018384203, %v5657_v8  ;;  %v2427_v26 = vadd.f32 %v2425_v53, %v2423_v21  ;;  %v2429_v4 = vmul.f32 0.017814746, %v5694_v25  ;;  %v2487_v29 = vadd.f32 %v2485_v35, %v2483_v27 }
 0x1e0   :  { %v2493_v62 = vmul.f32 -0.035365745, %v5682_v13  ;;  %v5905_v20 = vmul.f32 0.27459046, %v5749_v47  ;;  %v2433_v39 = vmul.f32 -0.41827205, %v5705_v44  ;;  %v2543_v57 = vadd.f32 %v2541_v51, %v2539_v1 }
 0x1e1   :  { %v2549_v63 = vmul.f32 -0.03534861, %v5661_v30  ;;  %v5909_v56 = vmul.f32 %v2239_v19, %v2239_v19  ;;  %v2307_v16 = vadd.f32 %v2305_v40, %v2303_v23  ;;  %v2367_v48 = vadd.f32 %v2365_v61, %v2363_v24 }
 0x1e2   :  { %v2491_v42 = vadd.f32 %v2489_v18, %v2487_v29  ;;  %v2437_v21 = vmul.f32 0.14922166, %v5717_v38  ;;  %v2441_v53 = vmul.f32 -0.031979617, %v5728_v28  ;;  %v2547_v35 = vadd.f32 %v2545_v37, %v2543_v57 }
 0x1e3   :  { %v2553_v27 = vmul.f32 -0.098390706, %v5665_v50  ;;  %v2431_v14 = vadd.f32 %v2429_v4, %v2427_v26  ;;  %v5915_v5 = vmul.f32 0.16279818, %v5735_v34  ;;  %v2497_v1 = vmul.f32 -0.30283126, %v5688_v12 }
 0x1e4   :  { %v2495_v49 = vadd.f32 %v2493_v62, %v2491_v42  ;;  %v5919_v19 = vmul.f32 -0.056323968, %v5746_v9  ;;  %v5922_v40 = vmul.f32 0.138554, %v5749_v47  ;;  %v2551_v61 = vadd.f32 %v2549_v63, %v2547_v35 }
 0x1e5   :  { %v2557_v23 = vmul.f32 0.34535056, %v5671_v22  ;;  %v2245_v24 = vsub.f32 %v5897_v60, %v5909_v56  ;;  %v2311_v18 = vadd.f32 %v2309_v31, %v2307_v16  ;;  %v2371_v51 = vadd.f32 %v2369_v6, %v2367_v48 }
 0x1e6   :  { %v2611_v37 = vmul.f32 -0.22524354, %v5651_v0  ;;  %v2555_v26 = vadd.f32 %v2553_v27, %v2551_v61  ;;  %v2561_v42 = vmul.f32 0.25705475, %v5675_v11  ;;  %v2613_v4 = vmul.f32 -0.16976355, %v5654_v52 }
 0x1e7   :  { %v2617_v29 = vmul.f32 -0.5593767, %v5657_v8  ;;  %v2435_v62 = vadd.f32 %v2433_v39, %v2431_v14  ;;  %v2499_v57 = vadd.f32 %v2497_v1, %v2495_v49  ;;  %v2501_v63 = vmul.f32 0.3510412, %v5694_v25 }
 0x1e8   :  { %v2505_v35 = vmul.f32 0.049280945, %v5705_v44  ;;  %v2559_v7 = vadd.f32 %v2557_v23, %v2555_v26  ;;  %v2565_v60 = vmul.f32 -0.39045212, %v5682_v13  ;;  %v2615_v31 = vadd.f32 %v2613_v4, %v2611_v37 }
 0x1e9   :  { %v2621_v6 = vmul.f32 0.177615, %v5661_v30  ;;  %v5935_v16 = vmul.f32 %v2311_v18, %v2311_v18  ;;  %v2375_v48 = vadd.f32 %v2373_v33, %v2371_v51  ;;  %v2509_v27 = vmul.f32 -0.068489514, %v5717_v38 }
 0x1ea   :  { %v2513_v61 = vmul.f32 -0.4375433, %v5728_v28  ;;  %v2563_v43 = vadd.f32 %v2561_v42, %v2559_v7  ;;  %v2569_v49 = vmul.f32 0.03490981, %v5688_v12  ;;  %v2619_v14 = vadd.f32 %v2617_v29, %v2615_v31 }
 0x1eb   :  { %v2625_v39 = vmul.f32 0.054189786, %v5665_v50  ;;  %v2439_v1 = vadd.f32 %v2437_v21, %v2435_v62  ;;  %v2503_v23 = vadd.f32 %v2501_v63, %v2499_v57  ;;  %v5942_v26 = vmul.f32 0.15559499, %v5735_v34 }
 0x1ec   :  { %v5945_v37 = vmul.f32 -0.22008787, %v5746_v9  ;;  %v5948_v33 = vmul.f32 -0.17301363, %v5749_v47  ;;  %v2567_v18 = vadd.f32 %v2565_v60, %v2563_v43  ;;  %v2623_v51 = vadd.f32 %v2621_v6, %v2619_v14 }
 0x1ed   :  { %v2629_v7 = vmul.f32 0.13485135, %v5671_v22  ;;  %v2379_v42 = vadd.f32 %v2377_v45, %v2375_v48  ;;  %v2573_v4 = vmul.f32 -0.57168925, %v5694_v25  ;;  %v2633_v29 = vmul.f32 -0.3693622, %v5675_v11 }
 0x1ee   :  { %v2683_v21 = vmul.f32 0.1121082, %v5651_v0  ;;  %v2571_v62 = vadd.f32 %v2569_v49, %v2567_v18  ;;  %v2627_v57 = vadd.f32 %v2625_v39, %v2623_v51  ;;  %v2685_v63 = vmul.f32 0.060212225, %v5654_v52 }
 0x1ef   :  { %v2689_v31 = vmul.f32 0.31969616, %v5657_v8  ;;  %v2317_v41 = vsub.f32 %v2245_v24, %v5935_v16  ;;  %v2443_v3 = vadd.f32 %v2441_v53, %v2439_v1  ;;  %v2507_v43 = vadd.f32 %v2505_v35, %v2503_v23 }
 0x1f0   :  { %v2577_v60 = vmul.f32 0.11030852, %v5705_v44  ;;  %v2631_v6 = vadd.f32 %v2629_v7, %v2627_v57  ;;  %v2637_v45 = vmul.f32 0.29794922, %v5682_v13  ;;  %v2687_v48 = vadd.f32 %v2685_v63, %v2683_v21 }
 0x1f1   :  { %v2693_v14 = vmul.f32 0.37718755, %v5661_v30  ;;  %v2383_v10 = vadd.f32 %v5905_v20, %v2379_v42  ;;  %v2575_v49 = vadd.f32 %v2573_v4, %v2571_v62  ;;  %v2581_v39 = vmul.f32 -0.052858215, %v5717_v38 }
 0x1f2   :  { %v2585_v18 = vmul.f32 -0.11827066, %v5728_v28  ;;  %v2635_v51 = vadd.f32 %v2633_v29, %v2631_v6  ;;  %v2641_v24 = vmul.f32 -0.029581817, %v5688_v12  ;;  %v2691_v53 = vadd.f32 %v2689_v31, %v2687_v48 }
 0x1f3   :  { %v2697_v35 = vmul.f32 0.036679335, %v5665_v50  ;;  %v2447_v1 = vadd.f32 %v5915_v5, %v2443_v3  ;;  %v2511_v23 = vadd.f32 %v2509_v27, %v2507_v43  ;;  %v2589_v7 = vmul.f32 0.4082859, %v5735_v34 }
 0x1f4   :  { %v5968_v21 = vmul.f32 -0.17733715, %v5746_v9  ;;  %v2639_v20 = vadd.f32 %v2637_v45, %v2635_v51  ;;  %v2645_v42 = vmul.f32 -0.07926444, %v5694_v25  ;;  %v2695_v4 = vadd.f32 %v2693_v14, %v2691_v53 }
 0x1f5   :  { %v2701_v62 = vmul.f32 -0.42536777, %v5671_v22  ;;  %v5972_v29 = vmul.f32 %v2383_v10, %v2383_v10  ;;  %v2579_v57 = vadd.f32 %v2577_v60, %v2575_v49  ;;  %v2649_v63 = vmul.f32 -0.16653843, %v5705_v44 }
 0x1f6   :  { %v2755_v31 = vmul.f32 0.15379748, %v5651_v0  ;;  %v2643_v3 = vadd.f32 %v2641_v24, %v2639_v20  ;;  %v2699_v5 = vadd.f32 %v2697_v35, %v2695_v4  ;;  %v2705_v27 = vmul.f32 0.0034906256, %v5675_v11 }
 0x1f7   :  { %v2757_v43 = vmul.f32 0.6405471, %v5654_v52  ;;  %v2451_v6 = vadd.f32 %v5919_v19, %v2447_v1  ;;  %v2515_v45 = vadd.f32 %v2513_v61, %v2511_v23  ;;  %v2709_v48 = vmul.f32 -0.23316088, %v5682_v13 }
 0x1f8   :  { %v2761_v14 = vmul.f32 -0.13205218, %v5657_v8  ;;  %v2647_v10 = vadd.f32 %v2645_v42, %v2643_v3  ;;  %v2703_v51 = vadd.f32 %v2701_v62, %v2699_v5  ;;  %v2765_v49 = vmul.f32 0.09509476, %v5661_v30 }
 0x1f9   :  { %v2759_v60 = vadd.f32 %v2757_v43, %v2755_v31  ;;  %v2583_v53 = vadd.f32 %v2581_v39, %v2579_v57  ;;  %v5983_v24 = vmul.f32 0.12623627, %v5749_v47  ;;  %v2653_v35 = vmul.f32 0.03624305, %v5717_v38 }
 0x1fa   :  { %v2713_v20 = vmul.f32 0.26998606, %v5688_v12  ;;  %v2651_v4 = vadd.f32 %v2649_v63, %v2647_v10  ;;  %v2707_v19 = vadd.f32 %v2705_v27, %v2703_v51  ;;  %v2769_v1 = vmul.f32 -0.050197896, %v5665_v50 }
 0x1fb   :  { %v2763_v61 = vadd.f32 %v2761_v14, %v2759_v60  ;;  %v2389_v23 = vadd.f32 %v5972_v29, %v2317_v41  ;;  %v2455_v42 = vadd.f32 %v5922_v40, %v2451_v6  ;;  %v2519_v62 = vadd.f32 %v5942_v26, %v2515_v45 }
 0x1fc   :  { %v2171_v39 = vadd.f32 %v5885_v17, %v5882_v32  ;;  %v2711_v57 = vadd.f32 %v2709_v48, %v2707_v19  ;;  %v2717_v31 = vmul.f32 -0.31256756, %v5694_v25  ;;  %v2773_v5 = vmul.f32 0.23410332, %v5671_v22 }
 0x1fd   :  { %v2767_v3 = vadd.f32 %v2765_v49, %v2763_v61  ;;  %v2587_v63 = vadd.f32 %v2585_v18, %v2583_v53  ;;  %v2655_v27 = vadd.f32 %v2653_v35, %v2651_v4  ;;  %v2657_v43 = vmul.f32 -0.05200314, %v5728_v28 }
 0x1fe   :  { %v2661_v14 = vmul.f32 0.10225741, %v5735_v34  ;;  %v2715_v41 = vadd.f32 %v2713_v20, %v2711_v57  ;;  %v2721_v40 = vmul.f32 -0.14268771, %v5705_v44  ;;  %v2777_v26 = vmul.f32 -0.055021897, %v5675_v11 }
 0x1ff   :  { %v2771_v6 = vadd.f32 %v2769_v1, %v2767_v3  ;;  %v2523_v32 = vadd.f32 %v5945_v37, %v2519_v62  ;;  %v2665_v45 = vmul.f32 -0.4314463, %v5746_v9  ;;  %v2827_v48 = vmul.f32 0.39887947, %v5651_v0 }
 0x200   :  { %v2243_v10 = vadd.f32 %v5909_v56, %v2171_v39  ;;  %v2719_v18 = vadd.f32 %v2717_v31, %v2715_v41  ;;  %v2725_v51 = vmul.f32 0.048368063, %v5717_v38  ;;  %v2781_v49 = vmul.f32 -0.06747322, %v5682_v13 }
 0x201   :  { %v2775_v60 = vadd.f32 %v2773_v5, %v2771_v6  ;;  %v2591_v53 = vadd.f32 %v2589_v7, %v2587_v63  ;;  %v2659_v35 = vadd.f32 %v2657_v43, %v2655_v27  ;;  %v2829_v20 = vmul.f32 -0.06535791, %v5654_v52 }
 0x202   :  { %v2833_v4 = vmul.f32 -0.22901326, %v5657_v8  ;;  %v2723_v19 = vadd.f32 %v2721_v40, %v2719_v18  ;;  %v2729_v37 = vmul.f32 -0.0801491, %v5728_v28  ;;  %v2785_v0 = vmul.f32 -0.3478909, %v5688_v12 }
 0x203   :  { %v2779_v61 = vadd.f32 %v2777_v26, %v2775_v60  ;;  %v6009_v1 = vmul.f32 %v2455_v42, %v2455_v42  ;;  %v2831_v62 = vadd.f32 %v2829_v20, %v2827_v48  ;;  %v2837_v39 = vmul.f32 0.1329734, %v5661_v30 }
 0x204   :  { %v2315_v57 = vadd.f32 %v5935_v16, %v2243_v10  ;;  %v2527_v7 = vadd.f32 %v5948_v33, %v2523_v32  ;;  %v2727_v31 = vadd.f32 %v2725_v51, %v2723_v19  ;;  %v2789_v52 = vmul.f32 -0.24118927, %v5694_v25 }
 0x205   :  { %v2783_v3 = vadd.f32 %v2781_v49, %v2779_v61  ;;  %v2595_v8 = vadd.f32 %v5968_v21, %v2591_v53  ;;  %v2663_v5 = vadd.f32 %v2661_v14, %v2659_v35  ;;  %v2835_v63 = vadd.f32 %v2833_v4, %v2831_v62 }
 0x206   :  { %v2841_v27 = vmul.f32 0.044230055, %v5665_v50  ;;  %v2731_v43 = vadd.f32 %v2729_v37, %v2727_v31  ;;  %v2733_v42 = vmul.f32 -0.26741216, %v5735_v34  ;;  %v2793_v30 = vmul.f32 0.2539412, %v5705_v44 }
 0x207   :  { %v2787_v41 = vadd.f32 %v2785_v0, %v2783_v3  ;;  %v2669_v40 = vmul.f32 -0.30685392, %v5749_v47  ;;  %v2839_v6 = vadd.f32 %v2837_v39, %v2835_v63  ;;  %v2845_v33 = vmul.f32 0.06287455, %v5671_v22 }
 0x208   :  { %v2387_v26 = vsub.f32 %v2315_v57, %v5972_v29  ;;  %v2461_v32 = vadd.f32 %v6009_v1, %v2389_v23  ;;  %v6023_v21 = vmul.f32 %v2527_v7, %v2527_v7  ;;  %v2797_v50 = vmul.f32 0.3794028, %v5717_v38 }
 0x209   :  { %v2791_v14 = vadd.f32 %v2789_v52, %v2787_v41  ;;  %v2599_v48 = vadd.f32 %v5983_v24, %v2595_v8  ;;  %v2667_v10 = vadd.f32 %v2665_v45, %v2663_v5  ;;  %v2843_v18 = vadd.f32 %v2841_v27, %v2839_v6  ;;  %v6497_v6 = vld [vmem:[#allocation16_spill] sm:$0xff] }
 0x20a   :  { %v2849_v51 = vmul.f32 -0.4378169, %v5675_v11  ;;  %v2735_v60 = vadd.f32 %v2733_v42, %v2731_v43  ;;  %v2737_v49 = vmul.f32 -0.37597, %v5746_v9  ;;  %v2801_v22 = vmul.f32 0.17571232, %v5728_v28 }
 0x20b   :  { %v2795_v53 = vadd.f32 %v2793_v30, %v2791_v14  ;;  %v2847_v35 = vadd.f32 %v2845_v33, %v2843_v18  ;;  %v2853_v23 = vmul.f32 -0.4670429, %v5682_v13  ;;  %v2459_v20 = vsub.f32 %v2387_v26, %v6009_v1  ;;  %v6498_v33 = vld [vmem:[#allocation15_spill] sm:$0xff] }
 0x20c   :  { %v2533_v4 = vadd.f32 %v6023_v21, %v2461_v32  ;;  %v2805_v24 = vmul.f32 -0.17115043, %v5735_v34  ;;  %v6034_v45 = vmul.f32 %v2599_v48, %v2599_v48  ;;  %v2671_v37 = vadd.f32 %v2669_v40, %v2667_v10  ;;  %v6500_v48 = vld [vmem:[#allocation13_spill] sm:$0xff] }
 0x20d   :  { %v2799_v19 = vadd.f32 %v2797_v50, %v2795_v53  ;;  %v2851_v11 = vadd.f32 %v2849_v51, %v2847_v35  ;;  %v2857_v61 = vmul.f32 0.19021145, %v5688_v12  ;;  %v2739_v0 = vadd.f32 %v2737_v49, %v2735_v60  ;;  %v6499_v50 = vld [vmem:[#allocation14_spill] sm:$0xff]  ;;  %v6501_v51 = vld [vmem:[#allocation17_spill] sm:$0xff] }
 0x20e   :  { %v2741_v62 = vmul.f32 -0.30015677, %v5749_v47  ;;  %v2809_v57 = vmul.f32 -0.15407239, %v5746_v9  ;;  %v2861_v7 = vmul.f32 0.22653322, %v5694_v25  ;;  %v2531_v31 = vsub.f32 %v2459_v20, %v6023_v21 }
 0x20f   :  { %v2803_v39 = vadd.f32 %v2801_v22, %v2799_v19  ;;  %v2855_v13 = vadd.f32 %v2853_v23, %v2851_v11  ;;  %v2605_v52 = vadd.f32 %v6034_v45, %v2533_v4  ;;  %v6042_v8 = vmul.f32 %v2671_v37, %v2671_v37  ;;  %v6502_v23 = vld [vmem:[#allocation18_spill] sm:$0xff] }
 0x210   :  { %v2865_v63 = vmul.f32 0.22427572, %v5705_v44  ;;  %v2743_v12 = vadd.f32 %v2741_v62, %v2739_v0  ;;  %v2813_v43 = vmul.f32 0.055876024, %v5749_v47  ;;  %v2869_v41 = vmul.f32 0.057605274, %v5717_v38 }
 0x211   :  { %v2807_v3 = vadd.f32 %v2805_v24, %v2803_v39  ;;  %v2859_v5 = vadd.f32 %v2857_v61, %v2855_v13  ;;  %v2603_v30 = vsub.f32 %v2531_v31, %v6034_v45  ;;  %v2873_v25 = vmul.f32 -0.4258715, %v5728_v28 }
 0x212   :  { %v2877_v40 = vmul.f32 0.056487348, %v5735_v34  ;;  %v1962_v26 = vsub.f32 %v6498_v33, %v6497_v6  ;;  %v1961_v32 = vsub.f32 %v5824_v55, %v5829_v58  ;;  %v2677_v44 = vsub.f32 %v2605_v52, %v6042_v8  ;;  %v3689_v52 = vld [vmem:[%s6368_s1 + $0x208] sm:$0xff] }
 0x213   :  { %v2811_v27 = vadd.f32 %v2809_v57, %v2807_v3  ;;  %v2863_v42 = vadd.f32 %v2861_v7, %v2859_v5  ;;  %v1894_v10 = vsub.f32 %v6500_v48, %v6499_v50  ;;  %v1893_v38 = vsub.f32 %v5797_v59, %v5805_v46  ;;  %v3688_v3 = vld [vmem:[%s6368_s1 + $0x200] sm:$0xff]  ;;  %v6503_v5 = vld [vmem:[#allocation19_spill] sm:$0xff]  ;;  %v3690_v50 = vld [vmem:[%s6368_s1 + $0x210] sm:$0xff] }
 0x214   :  { %v6059_v18 = vmul.f32 %v2743_v12, %v2743_v12  ;;  %v2032_v34 = vsub.f32 %v1962_v26, %v6501_v51  ;;  %v2031_v60 = vsub.f32 %v1961_v32, %v5849_v2  ;;  %v2675_v53 = vsub.f32 %v2603_v30, %v6042_v8  ;;  %v3738_v30 = vld [vmem:[%s6368_s1 + $0x390] sm:$0xff]  ;;  %v3691_v48 = vld [vmem:[%s6368_s1 + $0x218] sm:$0xff] }
 0x215   :  { %v2867_v14 = vadd.f32 %v2865_v63, %v2863_v42  ;;  %v2815_v28 = vadd.f32 %v2813_v43, %v2811_v27  ;;  %v1964_v55 = vadd.f32 %v6497_v6, %v1894_v10  ;;  %v1963_v22 = vadd.f32 %v5829_v58, %v1893_v38  ;;  %v3706_v27 = vld [vmem:[%s6368_s1 + $0x290] sm:$0xff]  ;;  %v3707_v43 = vld [vmem:[%s6368_s1 + $0x298] sm:$0xff] }
 0x216   :  { %v2881_v35 = vmul.f32 0.07614712, %v5746_v9  ;;  %v2104_v20 = vadd.f32 %v6502_v23, %v2032_v34  ;;  %v2103_v59 = vadd.f32 %v5865_v36, %v2031_v60  ;;  %v2885_v4 = vmul.f32 0.13892782, %v5749_v47  ;;  %v6505_v10 = vld [vmem:[#allocation21_spill] sm:$0xff] }
 0x217   :  { %v2871_v49 = vadd.f32 %v2869_v41, %v2867_v14  ;;  %v2034_v19 = vsub.f32 %v1964_v55, %v6501_v51  ;;  %v2033_v24 = vsub.f32 %v1963_v22, %v5849_v2  ;;  %v2749_v37 = vsub.f32 %v2677_v44, %v6059_v18  ;;  %v3723_v60 = vld [vmem:[%s6368_s1 + $0x318] sm:$0xff]  ;;  %v3709_v55 = vld [vmem:[%s6368_s1 + $0x2a8] sm:$0xff]  ;;  %v3740_v22 = vld [vmem:[%s6368_s1 + $0x3a0] sm:$0xff] }
 0x218   :  { %v6073_v11 = vmul.f32 %v2815_v28, %v2815_v28  ;;  %v2176_v61 = vadd.f32 %v5174_v15, %v2104_v20  ;;  %v2175_v58 = vadd.f32 %v5885_v17, %v2103_v59  ;;  %v2747_v0 = vsub.f32 %v2675_v53, %v6059_v18 }
 0x219   :  { %v2875_v46 = vadd.f32 %v2873_v25, %v2871_v49  ;;  %v2106_v62 = vadd.f32 %v6502_v23, %v2034_v19  ;;  %v2105_v39 = vadd.f32 %v5865_v36, %v2033_v24  ;;  %v3720_v36 = vld [vmem:[%s6368_s1 + $0x300] sm:$0xff]  ;;  %v3739_v25 = vld [vmem:[%s6368_s1 + $0x398] sm:$0xff]  ;;  %v4019_v44 = vpack.c.bf16 %v3689_v52, %v3688_v3 }
 0x21a   :  { %v2248_v47 = vsub.f32 %v2176_v61, %v5192_v54  ;;  %v2247_v2 = vsub.f32 %v2175_v58, %v5909_v56  ;;  %v2821_v31 = vsub.f32 %v2749_v37, %v6073_v11  ;;  %v4021_v14 = vpack.c.bf16 %v3707_v43, %v3706_v27  ;;  %v3708_v49 = vld [vmem:[%s6368_s1 + $0x2a0] sm:$0xff]  ;;  %v3693_v61 = vld [vmem:[%s6368_s1 + $0x228] sm:$0xff] }
 0x21b   :  { %v2879_v9 = vadd.f32 %v2877_v40, %v2875_v46  ;;  %v2178_v13 = vsub.f32 %v2106_v62, %v5174_v15  ;;  %v2177_v7 = vsub.f32 %v2105_v39, %v5885_v17  ;;  %v2819_v15 = vsub.f32 %v2747_v0, %v6073_v11  ;;  %v3721_v17 = vld [vmem:[%s6368_s1 + $0x308] sm:$0xff]  ;;  %v6504_v40 = vld [vmem:[#allocation20_spill] sm:$0xff]  ;;  %v6506_v23 = vld [vmem:[#allocation22_spill] sm:$0xff] }
 0x21c   :  { %v2320_v63 = vsub.f32 %v2248_v47, %v6503_v5  ;;  %v2319_v26 = vsub.f32 %v2247_v2, %v5935_v16  ;;  %v4053_v34 = vpack.c.bf16 %v3739_v25, %v3738_v30  ;;  %v4023_v19 = vpack.c.bf16 %v3691_v48, %v3690_v50  ;;  %v3692_v37 = vld [vmem:[%s6368_s1 + $0x220] sm:$0xff]  ;;  %v6507_v58 = vld [vmem:[#allocation23_spill] sm:$0xff]  ;;  %v3710_v47 = vld [vmem:[%s6368_s1 + $0x2b0] sm:$0xff] }
 0x21d   :  { %v2883_v57 = vadd.f32 %v2881_v35, %v2879_v9  ;;  %v2250_v42 = vadd.f32 %v5192_v54, %v2178_v13  ;;  %v2249_v41 = vadd.f32 %v5909_v56, %v2177_v7  ;;  %v4051_v56 = vpack.c.bf16 %v3721_v17, %v3720_v36  ;;  %v3741_v35 = vld [vmem:[%s6368_s1 + $0x3a8] sm:$0xff]  ;;  %v3711_v2 = vld [vmem:[%s6368_s1 + $0x2b8] sm:$0xff]  ;;  %v3742_v13 = vld [vmem:[%s6368_s1 + $0x3b0] sm:$0xff] }
 0x21e   :  { %v2392_v6 = vadd.f32 %v6504_v40, %v2320_v63  ;;  %v2391_v59 = vadd.f32 %v5972_v29, %v2319_v26  ;;  %v4025_v0 = vpack.c.bf16 %v3709_v55, %v3708_v49  ;;  %v4057_v62 = vpack.c.bf16 %v3741_v35, %v3740_v22  ;;  %v3725_v39 = vld [vmem:[%s6368_s1 + $0x328] sm:$0xff]  ;;  %v3743_v7 = vld [vmem:[%s6368_s1 + $0x3b8] sm:$0xff]  ;;  %v6509_v27 = vld [vmem:[#allocation10_spill] sm:$0xff] }
 0x21f   :  { %v2887_v12 = vadd.f32 %v2885_v4, %v2883_v57  ;;  %v2322_v32 = vsub.f32 %v2250_v42, %v6503_v5  ;;  %v2321_v54 = vsub.f32 %v2249_v41, %v5935_v16  ;;  %v3722_v16 = vld [vmem:[%s6368_s1 + $0x310] sm:$0xff]  ;;  %v4027_v63 = vpack.c.bf16 %v3693_v61, %v3692_v37  ;;  %v3695_v17 = vld [vmem:[%s6368_s1 + $0x238] sm:$0xff]  ;;  %v3712_v25 = vld [vmem:[%s6368_s1 + $0x2c0] sm:$0xff] }
 0x220   :  { %v2464_v38 = vadd.f32 %v6505_v10, %v2392_v6  ;;  %v4055_v24 = vpack.c.bf16 %v3723_v60, %v3722_v16  ;;  %v2463_v52 = vadd.f32 %v6009_v1, %v2391_v59  ;;  %v4029_v42 = vpack.c.bf16 %v3711_v2, %v3710_v47  ;;  %v3727_v30 = vld [vmem:[%s6368_s1 + $0x338] sm:$0xff]  ;;  %v3713_v6 = vld [vmem:[%s6368_s1 + $0x2c8] sm:$0xff]  ;;  %v3744_v26 = vld [vmem:[%s6368_s1 + $0x3c0] sm:$0xff] }
 0x221   :  { %v6114_v33 = vmul.f32 %v2887_v12, %v2887_v12  ;;  %v2394_v53 = vadd.f32 %v6504_v40, %v2322_v32  ;;  %v2393_v4 = vadd.f32 %v5972_v29, %v2321_v54  ;;  %v3724_v29 = vld [vmem:[%s6368_s1 + $0x320] sm:$0xff]  ;;  %v4061_v41 = vpack.c.bf16 %v3743_v7, %v3742_v13  ;;  %v3745_v32 = vld [vmem:[%s6368_s1 + $0x3c8] sm:$0xff]  ;;  %v6510_v54 = vld [vmem:[#allocation9_spill] sm:$0xff] }
 0x222   :  { %v2536_v20 = vsub.f32 %v2464_v38, %v6506_v23  ;;  %v4059_v12 = vpack.c.bf16 %v3725_v39, %v3724_v29  ;;  %v3696_v38 = vld [vmem:[%s6368_s1 + $0x240] sm:$0xff]  ;;  %v4033_v16 = vpack.c.bf16 %v3713_v6, %v3712_v25  ;;  %v4065_v60 = vpack.c.bf16 %v3745_v32, %v3744_v26  ;;  %v3729_v49 = vld [vmem:[%s6368_s1 + $0x348] sm:$0xff]  ;;  %v3715_v22 = vld [vmem:[%s6368_s1 + $0x2d8] sm:$0xff] }
 0x223   :  { %v2893_v28 = vsub.f32 %v2821_v31, %v6114_v33  ;;  %v2891_v51 = vsub.f32 %v2819_v15, %v6114_v33  ;;  %v2466_v46 = vsub.f32 %v2394_v53, %v6505_v10  ;;  %v6508_v31 = vld [vmem:[#allocation11_spill] sm:$0xff]  ;;  %v2465_v5 = vsub.f32 %v2393_v4, %v6009_v1  ;;  %v3694_v15 = vld [vmem:[%s6368_s1 + $0x230] sm:$0xff]  ;;  %v3699_v37 = vld [vmem:[%s6368_s1 + $0x258] sm:$0xff] }
 0x224   :  { %v2608_v9 = vsub.f32 %v2536_v20, %v6507_v58  ;;  %v3726_v1 = vld [vmem:[%s6368_s1 + $0x330] sm:$0xff]  ;;  %v4031_v48 = vpack.c.bf16 %v3695_v17, %v3694_v15  ;;  %v3748_v29 = vld [vmem:[%s6368_s1 + $0x3e0] sm:$0xff]  ;;  %v3749_v39 = vld [vmem:[%s6368_s1 + $0x3e8] sm:$0xff] }
 0x225   :  { %3029 = vmatmul.mubr.f32.vlgmr.msra.gmra.mrb[0].mxu0 %v2893_v28  ;;  %3099 = vmatmul.mubr.f32.vlgmr.msra.gmra.mrb[0].mxu1 %v2891_v51  ;;  %v2538_v57 = vadd.f32 %v6506_v23, %v2466_v46  ;;  %v2537_v50 = vadd.f32 %v6023_v21, %v2465_v5  ;;  %v4063_v10 = vpack.c.bf16 %v3727_v30, %v3726_v1  ;;  %v3697_v28 = vld [vmem:[%s6368_s1 + $0x248] sm:$0xff]  ;;  %v6511_v51 = vld [vmem:[#allocation12_spill] sm:$0xff]  ;;  %v3747_v23 = vld [vmem:[%s6368_s1 + $0x3d8] sm:$0xff] }
 0x226   :  { %4020 = vmatpush3.bf16.msra.mxu0 %v4019_v44  ;;  %4052 = vmatpush3.bf16.msra.mxu1 %v4051_v56  ;;  %v2680_v3 = vadd.f32 %v6508_v31, %v2608_v9  ;;  %v2535_v56 = vsub.f32 %v2463_v52, %v6023_v21  ;;  %v3728_v21 = vld [vmem:[%s6368_s1 + $0x340] sm:$0xff]  ;;  %v3714_v53 = vld [vmem:[%s6368_s1 + $0x2d0] sm:$0xff]  ;;  %v4035_v4 = vpack.c.bf16 %v3697_v28, %v3696_v38  ;;  %v3731_v9 = vld [vmem:[%s6368_s1 + $0x358] sm:$0xff] }
 0x227   :  { %4022 = vmatprep.subr.bf16.mxu0 %v4021_v14  ;;  %4054 = vmatprep.subr.bf16.mxu1 %v4053_v34  ;;  %v2610_v36 = vsub.f32 %v2538_v57, %v6507_v58  ;;  %v3746_v35 = vld [vmem:[%s6368_s1 + $0x3d0] sm:$0xff]  ;;  %v2609_v46 = vsub.f32 %v2537_v50, %v6034_v45  ;;  %v4037_v61 = vpack.c.bf16 %v3715_v22, %v3714_v53  ;;  %v3700_v7 = vld [vmem:[%s6368_s1 + $0x260] sm:$0xff]  ;;  %v3751_v15 = vld [vmem:[%s6368_s1 + $0x3f8] sm:$0xff] }
 0x228   :  { %v2752_v43 = vadd.f32 %v6509_v27, %v2680_v3  ;;  %v2607_v20 = vsub.f32 %v2535_v56, %v6034_v45  ;;  %v4069_v58 = vpack.c.bf16 %v3747_v23, %v3746_v35  ;;  %v3730_v45 = vld [vmem:[%s6368_s1 + $0x350] sm:$0xff]  ;;  %v4073_v52 = vpack.c.bf16 %v3749_v39, %v3748_v29  ;;  %v3703_v30 = vld [vmem:[%s6368_s1 + $0x278] sm:$0xff]  ;;  %v3322_v50 = vld [vmem:[%s6370_s3 + $0x8] sm:$0xff] }
 0x229   :  { %v2682_v40 = vadd.f32 %v6508_v31, %v2610_v36  ;;  %v2681_v57 = vadd.f32 %v6042_v8, %v2609_v46  ;;  %v4071_v13 = vpack.c.bf16 %v3731_v9, %v3730_v45  ;;  %v3701_v31 = vld [vmem:[%s6368_s1 + $0x268] sm:$0xff]  ;;  %v3718_v5 = vld [vmem:[%s6368_s1 + $0x2f0] sm:$0xff]  ;;  %v3325_v28 = vld [vmem:[%s6370_s3 + $0x20] sm:$0xff] }
 0x22a   :  { %4024 = vmatpush3.bf16.msra.mxu0 %v4023_v19  ;;  %4056 = vmatpush3.bf16.msra.mxu1 %v4055_v24  ;;  %v2824_v44 = vsub.f32 %v2752_v43, %v6510_v54  ;;  %v4067_v19 = vpack.c.bf16 %v3729_v49, %v3728_v21  ;;  %v3698_v24 = vld [vmem:[%s6368_s1 + $0x250] sm:$0xff]  ;;  %v2679_v47 = vadd.f32 %v6042_v8, %v2607_v20  ;;  %v3732_v8 = vld [vmem:[%s6368_s1 + $0x360] sm:$0xff]  ;;  %v3733_v36 = vld [vmem:[%s6368_s1 + $0x368] sm:$0xff]  ;;  %v4183_v49 = vmov 0.0  }
 0x22b   :  { %4026 = vmatprep.subr.bf16.mxu0 %v4025_v0  ;;  %4058 = vmatprep.subr.bf16.mxu1 %v4057_v62  ;;  %v2754_v14 = vsub.f32 %v2682_v40, %v6509_v27  ;;  %v3716_v0 = vld [vmem:[%s6368_s1 + $0x2e0] sm:$0xff]  ;;  %v3717_v62 = vld [vmem:[%s6368_s1 + $0x2e8] sm:$0xff]  ;;  %v4039_v2 = vpack.c.bf16 %v3699_v37, %v3698_v24  ;;  %v2753_v27 = vsub.f32 %v2681_v57, %v6059_v18  ;;  %v3735_v40 = vld [vmem:[%s6368_s1 + $0x378] sm:$0xff] }
 0x22c   :  { %v2896_v34 = vsub.f32 %v2824_v44, %v6511_v51  ;;  %v4041_v3 = vpack.c.bf16 %v3717_v62, %v3716_v0  ;;  %v2751_v17 = vadd.f32 %v6059_v18, %v2679_v47  ;;  %v4043_v43 = vpack.c.bf16 %v3701_v31, %v3700_v7  ;;  %v3734_v18 = vld [vmem:[%s6368_s1 + $0x370] sm:$0xff]  ;;  %v3411_v53 = vld [vmem:[%s6371_s5] sm:$0xff] }
 0x22d   :  { %v2826_v55 = vadd.f32 %v6510_v54, %v2754_v14  ;;  %v2825_v26 = vadd.f32 %v6073_v11, %v2753_v27  ;;  %v4079_v54 = vpack.c.bf16 %v3735_v40, %v3734_v18  ;;  %v4181_v14 = vmov 0.0|0.0   ;;  %v3752_v62 = vld [vmem:[%s6372_s2] ss:$0 sm:$0xff]  ;;  %v3413_v57 = vld [vmem:[%s6371_s5 + $0x10] sm:$0xff] }
 0x22e   :  { %4028 = vmatpush3.bf16.msra.mxu0 %v4027_v63  ;;  %4060 = vmatpush3.bf16.msra.mxu1 %v4059_v12  ;;  %v3719_v63 = vld [vmem:[%s6368_s1 + $0x2f8] sm:$0xff]  ;;  %v3750_v12 = vld [vmem:[%s6368_s1 + $0x3f0] sm:$0xff]  ;;  %v2823_v6 = vsub.f32 %v2751_v17, %v6073_v11  ;;  %v3321_v11 = vld [vmem:[%s6370_s3] sm:$0xff] }
 0x22f   :  { %4030 = vmatprep.subr.bf16.mxu0 %v4029_v42  ;;  %4062 = vmatprep.subr.bf16.mxu1 %v4061_v41  ;;  %v2898_v59 = vsub.f32 %v2826_v55, %v6511_v51  ;;  %v4075_v42 = vpack.c.bf16 %v3733_v36, %v3732_v8  ;;  %v3702_v41 = vld [vmem:[%s6368_s1 + $0x270] sm:$0xff]  ;;  %v4045_v1 = vpack.c.bf16 %v3719_v63, %v3718_v5  ;;  %v3326_v51 = vld [vmem:[%s6370_s3 + $0x28] sm:$0xff]  ;;  %v3753_v7 = vld [vmem:[%s6373_s4] ss:$0 sm:$0xff] }
 0x230   :  { %3201 = vmatprep.mubr.f32.mxu0 %v2896_v34  ;;  %v4077_v25 = vpack.c.bf16 %v3751_v15, %v3750_v12  ;;  %v4047_v32 = vpack.c.bf16 %v3703_v30, %v3702_v41  ;;  %v2895_v44 = vsub.f32 %v2823_v6, %v6114_v33  ;;  %v2897_v56 = vsub.f32 %v2825_v26, %v6114_v33  ;;  %v3323_v33 = vld [vmem:[%s6370_s3 + $0x10] sm:$0xff]  ;;  %v3412_v55 = vld [vmem:[%s6371_s5 + $0x8] sm:$0xff]  ;;  %v3497_v36 = vld [vmem:[%s6374_s7] sm:$0xff] }
 0x231   :  { %3305 = vmatprep.mubr.f32.mxu1 %v2898_v59  ;;  %v4088_v34 = vpack.c.bf16 %v3326_v51, %v3325_v28  ;;  %v4094_v22 = vpack.c.bf16 %v3412_v55, %v3411_v53  ;;  %v3498_v5 = vld [vmem:[%s6374_s7 + $0x8] sm:$0xff]  ;;  %v3755_v12 = vld [vmem:[%s6375_s6] ss:$0 sm:$0xff] }
 0x232   :  { %4032 = vmatpush3.bf16.msra.mxu0 %v4031_v48  ;;  %4064 = vmatpush3.bf16.msra.mxu1 %v4063_v10  ;;  %v4082_v48 = vpack.c.bf16 %v3322_v50, %v3321_v11  ;;  %v3324_v10 = vld [vmem:[%s6370_s3 + $0x18] sm:$0xff]  ;;  %v4100_v63 = vpack.c.bf16 %v3498_v5, %v3497_v36 }
 0x233   :  { %4034 = vmatprep.subr.bf16.mxu0 %v4033_v16  ;;  %4066 = vmatprep.subr.bf16.mxu1 %v4065_v60  ;;  %v4085_v38 = vpack.c.bf16 %v3324_v10, %v3323_v33  ;;  %v3327_v16 = vld [vmem:[%s6370_s3 + $0x30] sm:$0xff]  ;;  %v3328_v60 = vld [vmem:[%s6370_s3 + $0x38] sm:$0xff] }
 0x234   :  { %v4091_v21 = vpack.c.bf16 %v3328_v60, %v3327_v16 }
 0x236   :  { %4036 = vmatpush3.bf16.msra.mxu0 %v4035_v4  ;;  %4068 = vmatpush3.bf16.msra.mxu1 %v4067_v19 }
 0x237   :  { %4038 = vmatprep.subr.bf16.mxu0 %v4037_v61  ;;  %4070 = vmatprep.subr.bf16.mxu1 %v4069_v58 }
 0x23a   :  { %4040 = vmatpush3.bf16.msra.mxu0 %v4039_v2  ;;  %4072 = vmatpush3.bf16.msra.mxu1 %v4071_v13  ;;  %v3414_v2 = vld [vmem:[%s6371_s5 + $0x18] sm:$0xff] }
 0x23b   :  { %4042 = vmatprep.subr.bf16.mxu0 %v4041_v3  ;;  %4074 = vmatprep.subr.bf16.mxu1 %v4073_v52  ;;  %v4097_v13 = vpack.c.bf16 %v3414_v2, %v3413_v57 }
 0x23e   :  { %4044 = vmatpush3.bf16.msra.mxu0 %v4043_v43  ;;  %4076 = vmatpush3.bf16.msra.mxu1 %v4075_v42  ;;  %v3757_v42 = vld [vmem:[%s6376_s8] ss:$0 sm:$0xff] }
 0x23f   :  { %4046 = vmatprep.subr.bf16.mxu0 %v4045_v1  ;;  %4078 = vmatprep.subr.bf16.mxu1 %v4077_v25 }
 0x242   :  { %4048 = vmatpush3.bf16.msra.mxu0 %v4047_v32  ;;  %4080 = vmatpush3.bf16.msra.mxu1 %v4079_v54 }
 0x243   :  { %4081 = vmatprep.subr.bf16.mxu0 %v4181_v14  ;;  %4093 = vmatprep.subr.bf16.mxu1 %v4181_v14 }
 0x245   :  { %3202 = vmatmul.mubr.f32.vlgmr.msra.gmra.mrb[2].mxu0 %v2895_v44  ;;  %3306 = vmatmul.mubr.f32.vlgmr.msra.gmra.mrb[2].mxu1 %v2897_v56 }
 0x246   :  { %4083 = vmatpush3.bf16.msra.mxu0 %v4082_v48  ;;  %3932 = vmatprep.mubr.msk.f32.mxu0 %vm4182_vm5, %v4183_v49 }
 0x247   :  { %4084 = vmatprep.subr.bf16.mxu0 %v4181_v14  ;;  %3943 = vmatprep.mubr.msk.f32.mxu1 %vm4182_vm5, %v4183_v49 }
 0x248   :  { %4095 = vmatpush3.bf16.msra.mxu1 %v4094_v22 }
 0x249   :  { %4096 = vmatprep.subr.bf16.mxu1 %v4181_v14 }
 0x24a   :  { %4086 = vmatpush3.bf16.msra.mxu0 %v4085_v38 }
 0x24b   :  { %4087 = vmatprep.subr.bf16.mxu0 %v4181_v14 }
 0x24c   :  { %4098 = vmatpush3.bf16.msra.mxu1 %v4097_v13 }
 0x24d   :  { %4099 = vmatprep.subr.bf16.mxu1 %v4181_v14 }
 0x24e   :  { %4089 = vmatpush3.bf16.msra.mxu0 %v4088_v34 }
 0x24f   :  { %4090 = vmatprep.subr.bf16.mxu0 %v4181_v14 }
 0x252   :  { %4092 = vmatpush3.bf16.msra.mxu0 %v4091_v21 }
 0x2f8   :  { %v3791_v35 = vpop.f32.mrb[0].mxu0  ;;  %v3826_v23 = vpop.f32.mrb[0].mxu1 }
 0x2f9   :  { %v3792_v20 = vpop.f32.mrb[1].mxu0  ;;  %v3827_v59 = vpop.f32.mrb[1].mxu1 }
 0x2fa   :  { %v3793_v46 = vadd.f32 %v3792_v20, %v3791_v35  ;;  %v3828_v4 = vadd.f32 %v3827_v59, %v3826_v23 }
 0x2fc   :  { %v3101_v19 = vadd.f32 %v3828_v4, %v3793_v46 }
 0x318   :  { %v3861_v24 = vpop.f32.mrb[2].mxu0  ;;  %v3896_v37 = vpop.f32.mrb[2].mxu1 }
 0x319   :  { %v3862_v61 = vpop.f32.mrb[3].mxu0  ;;  %v3897_v58 = vpop.f32.mrb[3].mxu1 }
 0x31a   :  { %v3863_v45 = vadd.f32 %v3862_v61, %v3861_v24  ;;  %v3898_v9 = vadd.f32 %v3897_v58, %v3896_v37 }
 0x31c   :  { %v3207_v0 = vadd.f32 %v3863_v45, %v3101_v19 }
 0x31e   :  { %v3311_v29 = vadd.f32 %v3898_v9, %v3207_v0 }
 0x320   :  { %v3319_v39 = vadd.f32 %v3752_v62, %v3311_v29 }
 0x322   :  { %v3320_v47 = vmax.f32 %v3319_v39, 0.0 }
 0x324   :  { %3933 = vmatmul.mubr.msk.f32.vlgmr.msra.gmra.mrb[4].mxu0 %vm3336_vm8, %v3320_v47 }
 0x3f7   :  { %v3406_v31 = vpop.f32.mrb[4].mxu0 }
 0x3f8   :  { %v3407_v3 = vadd.f32 %v3753_v7, %v3406_v31  ;;  %v3934_v52 = vpop.f32.mrb[5].mxu0 }
 0x3fa   :  { %v3410_v8 = vmax.f32 %v3407_v3, 0.0 }
 0x3fc   :  { %3944 = vmatmul.mubr.msk.f32.vlgmr.msra.gmra.mrb[4].mxu1 %vm3422_vm2, %v3410_v8 }
 0x3fd   :  { %3950 = vmatprep.mubr.msk.f32.mxu1 %vm4182_vm5, %v4183_v49  ;;  %4101 = vmatpush3.bf16.msra.mxu1 %v4100_v63 }
 0x4cf   :  { %v3492_v15 = vpop.f32.mrb[4].mxu1 }
 0x4d0   :  { %v3493_v17 = vadd.f32 %v3755_v12, %v3492_v15  ;;  %v3945_v27 = vpop.f32.mrb[5].mxu1 }
 0x4d2   :  { %v3496_v43 = vmax.f32 %v3493_v17, 0.0 }
 0x4d4   :  { %3951 = vmatmul.mubr.msk.f32.vlgmr.msra.gmra.mrb[6].mxu1 %vm3506_vm6, %v3496_v43 }
 0x5a7   :  { %v3576_v41 = vpop.f32.mrb[6].mxu1 }
 0x5a8   :  { %v3577_v1 = vadd.f32 %v3757_v42, %v3576_v41  ;;  %v3952_v30 = vpop.f32.mrb[7].mxu1 }
 0x5aa   :  { %v3580_v25 = vmax.f32 %v3577_v1, 0.0 }
 0x5ac   :  { %3581 = vst [vmem:[%s6377_s9] sm:$0xff] %v3580_v25 }

</bundles_post_ra>
